<compile_context>
chip_gen: v7x
topology: tpu7x:2x2x1
jax: 0.10.0
libtpu: 0.0.40
codegen_flags: <defaults>
</compile_context>

<pallas_src>
import jax
import jax.numpy as jnp
from jax.experimental import pallas as pl
from jax.experimental.pallas import tpu as pltpu


def _puremf_forward_kernel(users_ref, items_ref,        # SMEM scalar prefetch: (Bp,) int32
                           user_tbl_ref, item_tbl_ref,  # VMEM-resident full tables
                           o_ref,                       # VMEM (1, TB) f32 output block
                           u_buf, i_buf):               # VMEM scratch: (TB, D) x 2
    tb, _d = u_buf.shape
    base = pl.program_id(0) * tb

    # ---- embedding gather: in-VMEM dynamic-slice row copies (no DMAs) --------
    @pl.loop(0, tb)
    def _gather(r):
        u = users_ref[base + r]
        it = items_ref[base + r]
        u_buf[pl.ds(r, 1), :] = user_tbl_ref[pl.ds(u, 1), :]
        i_buf[pl.ds(r, 1), :] = item_tbl_ref[pl.ds(it, 1), :]

    # ---- score = sigmoid(sum_d(u * i)) ----------------------------------------
    prod = u_buf[...] * i_buf[...]                       # (TB, D) f32   (VPU)
    scores = jnp.sum(prod, axis=1)                       # (TB,) reduce over D (XLU)
    o_ref[...] = jax.nn.sigmoid(scores)[None, :].astype(o_ref.dtype)  # lane-dense (1, TB)


def puremf_forward(user_table, item_table, users, items, *, tb=512):
    """PureMF.forward(users, items) -> sigmoid(<u_emb, i_emb>), shape (B,)."""
    B = int(users.shape[0])
    n_users, D = user_table.shape
    n_items, D_i = item_table.shape
    assert D == D_i, "user / item latent dims must match"

    users = users.astype(jnp.int32)
    items = items.astype(jnp.int32)

    # VMEM-residency budget check (lane-padded f32 rows).  Fits easily for
    # recommender-sized tables at D=32; larger tables need the HBM fallback.
    lane_d = ((D + 127) // 128) * 128
    tbl_bytes = (n_users + n_items) * lane_d * 4
    assert tbl_bytes <= 16 * 1024 * 1024, (
        "embedding tables too large for VMEM-resident gather; "
        "TODO(synk): add HBM-resident coalesced-gather fallback")

    if B <= tb:
        tb = B                       # single block covering the whole batch
        bp = B
    else:
        assert tb % 128 == 0, "row tile must be a multiple of 128 (lane-dense output)"
        bp = ((B + tb - 1) // tb) * tb
        if bp != B:                  # ragged batch only: pad indices with 0, drop below
            pad = bp - B
            users = jnp.concatenate([users, jnp.zeros((pad,), jnp.int32)])
            items = jnp.concatenate([items, jnp.zeros((pad,), jnp.int32)])

    grid = (bp // tb,)

    out = pl.pallas_call(
        _puremf_forward_kernel,
        out_shape=jax.ShapeDtypeStruct((1, bp), jnp.float32),
        grid_spec=pltpu.PrefetchScalarGridSpec(
            num_scalar_prefetch=2,                         # users, items -> SMEM
            grid=grid,
            in_specs=[
                # Full-table blocks with constant index_map -> fetched once,
                # stay VMEM-resident across all grid steps.
                pl.BlockSpec((n_users, D), lambda i, u, it: (0, 0)),
                pl.BlockSpec((n_items, D), lambda i, u, it: (0, 0)),
            ],
            out_specs=pl.BlockSpec((1, tb), lambda i, u, it: (0, i)),
            scratch_shapes=[pltpu.VMEM((tb, D), jnp.float32),
                            pltpu.VMEM((tb, D), jnp.float32)],
        ),
        compiler_params=pltpu.CompilerParams(
            dimension_semantics=("parallel",),
            vmem_limit_bytes=32 * 1024 * 1024,
        ),
    )(users, items, user_table, item_table)

    return out[0, :B]


if __name__ == "__main__":
    # Synthetic PureMF "config/dataset": small deterministic shapes.
    num_users = 300      # dataset.n_users
    num_items = 500      # dataset.m_items
    latent_dim = 32      # config['latent_dim_rec']
    batch = 1024         # 2 grid steps of 512 rows -> megacore 'parallel' engages

    key = jax.random.PRNGKey(0)
    k_user, k_item, k_u_idx, k_i_idx = jax.random.split(key, 4)

    # "using Normal distribution N(0,1) initialization for PureMF"
    embedding_user = jax.random.normal(k_user, (num_users, latent_dim), jnp.float32)
    embedding_item = jax.random.normal(k_item, (num_items, latent_dim), jnp.float32)

    users = jax.random.randint(k_u_idx, (batch,), 0, num_users, dtype=jnp.int32)
    items = jax.random.randint(k_i_idx, (batch,), 0, num_items, dtype=jnp.int32)

    scores = puremf_forward(embedding_user, embedding_item, users, items, tb=512)
    scores = jax.block_until_ready(scores)

    # Pure-JAX reference of the PyTorch forward.
    ref = jax.nn.sigmoid(
        jnp.sum(embedding_user[users] * embedding_item[items], axis=1))
    assert scores.shape == (batch,)
    assert jnp.allclose(scores, ref, atol=1e-5, rtol=1e-5)

    print("KERNEL_OK")
</pallas_src>

<mosaic_0001>
module attributes {stable_mosaic.version = 11 : i64} {
  func.func @_puremf_forward_kernel(%arg0: i32, %arg1: memref<1024xi32, #tpu.memory_space<smem>>, %arg2: memref<1024xi32, #tpu.memory_space<smem>>, %arg3: memref<300x32xf32, #tpu.memory_space<vmem>>, %arg4: memref<500x32xf32, #tpu.memory_space<vmem>>, %arg5: memref<1x512xf32, #tpu.memory_space<vmem>>, %arg6: memref<512x32xf32, #tpu.memory_space<vmem>>, %arg7: memref<512x32xf32, #tpu.memory_space<vmem>>) attributes {dimension_semantics = [#tpu.dimension_semantics<parallel>], iteration_bounds = array<i64: 2>, scalar_prefetch = 2 : i64, scratch_operands = 2 : i64, tpu.core_type = #tpu.core_type<tc>, window_params = [{pipeline_mode = #tpu.pipeline_mode<synchronous>, transform_indices = @transform_0, window_bounds = array<i64: 300, 32>}, {pipeline_mode = #tpu.pipeline_mode<synchronous>, transform_indices = @transform_1, window_bounds = array<i64: 500, 32>}, {transform_indices = @transform_2, window_bounds = array<i64: 1, 512>}]} {
    %c512_i32 = arith.constant 512 : i32
    %0 = arith.muli %arg0, %c512_i32 : i32
    %c0_i32 = arith.constant 0 : i32
    %c512_i32_0 = arith.constant 512 : i32
    %1 = arith.addi %c0_i32, %c512_i32_0 : i32
    %c1_i32 = arith.constant 1 : i32
    scf.for %arg8 = %c0_i32 to %1 step %c1_i32  : i32 {
      %c1_i32_8 = arith.constant 1 : i32
      %13 = arith.muli %arg8, %c1_i32_8 : i32
      %c0_i32_9 = arith.constant 0 : i32
      %14 = arith.addi %c0_i32_9, %13 : i32
      %15 = arith.addi %0, %14 : i32
      %16 = arith.index_cast %15 : i32 to index
      %17 = memref.load %arg1[%16] : memref<1024xi32, #tpu.memory_space<smem>>
      %18 = arith.addi %0, %14 : i32
      %19 = arith.index_cast %18 : i32 to index
      %20 = memref.load %arg2[%19] : memref<1024xi32, #tpu.memory_space<smem>>
      %21 = arith.index_cast %17 : i32 to index
      %c0_10 = arith.constant 0 : index
      %22 = vector.load %arg3[%21, %c0_10] : memref<300x32xf32, #tpu.memory_space<vmem>>, vector<1x32xf32>
      %23 = arith.index_cast %14 : i32 to index
      %c0_11 = arith.constant 0 : index
      %24 = vector.load %arg6[%23, %c0_11] : memref<512x32xf32, #tpu.memory_space<vmem>>, vector<1x32xf32>
      tpu.vector_store %arg6[%23, %c0_11], %22 {strides = array<i32>} : memref<512x32xf32, #tpu.memory_space<vmem>>, vector<1x32xf32>,
      %25 = arith.index_cast %20 : i32 to index
      %c0_12 = arith.constant 0 : index
      %26 = vector.load %arg4[%25, %c0_12] : memref<500x32xf32, #tpu.memory_space<vmem>>, vector<1x32xf32>
      %27 = arith.index_cast %14 : i32 to index
      %c0_13 = arith.constant 0 : index
      %28 = vector.load %arg7[%27, %c0_13] : memref<512x32xf32, #tpu.memory_space<vmem>>, vector<1x32xf32>
      tpu.vector_store %arg7[%27, %c0_13], %26 {strides = array<i32>} : memref<512x32xf32, #tpu.memory_space<vmem>>, vector<1x32xf32>,
    }
    %c512_i32_1 = arith.constant 512 : i32
    %c0 = arith.constant 0 : index
    %c0_2 = arith.constant 0 : index
    %2 = vector.load %arg6[%c0, %c0_2] : memref<512x32xf32, #tpu.memory_space<vmem>>, vector<512x32xf32>
    %c0_3 = arith.constant 0 : index
    %c0_4 = arith.constant 0 : index
    %3 = vector.load %arg7[%c0_3, %c0_4] : memref<512x32xf32, #tpu.memory_space<vmem>>, vector<512x32xf32>
    %4 = arith.mulf %2, %3 : vector<512x32xf32>
    %cst = arith.constant dense<0.000000e+00> : vector<512xf32>
    %5 = vector.multi_reduction <add>, %4, %cst [1] : vector<512x32xf32> to vector<512xf32>
    %6 = arith.negf %5 : vector<512xf32>
    %7 = math.exp %6 : vector<512xf32>
    %cst_5 = arith.constant 1.000000e+00 : f32
    %8 = vector.broadcast %cst_5 : f32 to vector<512xf32>
    %9 = arith.addf %8, %7 : vector<512xf32>
    %10 = arith.divf %8, %9 : vector<512xf32>
    %11 = vector.shape_cast %10 : vector<512xf32> to vector<1x512xf32>
    %c0_6 = arith.constant 0 : index
    %c0_7 = arith.constant 0 : index
    %12 = vector.load %arg5[%c0_6, %c0_7] : memref<1x512xf32, #tpu.memory_space<vmem>>, vector<1x512xf32>
    tpu.vector_store %arg5[%c0_6, %c0_7], %11 {strides = array<i32>} : memref<1x512xf32, #tpu.memory_space<vmem>>, vector<1x512xf32>,
    return
  }
  func.func @transform_0(%arg0: i32, %arg1: memref<1024xi32, #tpu.memory_space<smem>>, %arg2: memref<1024xi32, #tpu.memory_space<smem>>) -> (i32, i32) {
    %c0_i32 = arith.constant 0 : i32
    %c0_i32_0 = arith.constant 0 : i32
    %c0_i32_1 = arith.constant 0 : i32
    return %c0_i32, %c0_i32_0 : i32, i32
  }
  func.func @transform_1(%arg0: i32, %arg1: memref<1024xi32, #tpu.memory_space<smem>>, %arg2: memref<1024xi32, #tpu.memory_space<smem>>) -> (i32, i32) {
    %c0_i32 = arith.constant 0 : i32
    %c0_i32_0 = arith.constant 0 : i32
    %c0_i32_1 = arith.constant 0 : i32
    return %c0_i32, %c0_i32_0 : i32, i32
  }
  func.func @transform_2(%arg0: i32, %arg1: memref<1024xi32, #tpu.memory_space<smem>>, %arg2: memref<1024xi32, #tpu.memory_space<smem>>) -> (i32, i32) {
    %c0_i32 = arith.constant 0 : i32
    %c0_i32_0 = arith.constant 0 : i32
    return %c0_i32, %arg0 : i32, i32
  }
}

</mosaic_0001>

<bundles_post_ra>
// kernel: tpu_custom_call.1
= control target key start
LH: loop header
LB: loop body
LE: loop exit
PB: predicated region body
PF: predicated region fallthrough
CT: control target
= control target key end

     0   :  { %s9362_s0 = inlined_call_operand.vmem [shape: s32[1024], index: 0, kind: input, shape index: {}]   ;;  %s9363_s2 = inlined_call_operand.vmem [shape: f32[300,32], index: 2, kind: input, shape index: {}]   ;;  %s9364_s3 = inlined_call_operand.vmem [shape: f32[500,32], index: 3, kind: input, shape index: {}]   ;;  %s9365_s4 = inlined_call_operand.hbm [shape: f32[1,1024], index: 4, kind: output, shape index: {}]   ;;  %s9366_s1 = inlined_call_operand.vmem [shape: s32[1024], index: 1, kind: input, shape index: {}]  }
   0x1   :  { %s9_s17 = sshll.u32 %s9362_s0, 4  ;;  %s13_s20 = sshll.u32 %s9366_s1, 4  ;;  %s10_s17 = int_to_ptr.vmem [resolvable:$true] %s9_s17  ;;  %s14_s20 = int_to_ptr.vmem [resolvable:$true] %s13_s20 }
   0x2   :  { %s7196_s21 = scalar_lea.vmem %s10_s17, 128  ;;  %p7201_p1 = scmp.lt.s32.totalorder %s10_s17, %s10_s17 }
   0x3   :  { %p7197_p0 = scmp.ne.s32.totalorder %s10_s17, %s7196_s21  ;;  %p7202_p2 = scmp.lt.s32.totalorder %s7196_s21, %s7196_s21 }
   0x5   :  { %p7203_p3 = por %p7202_p2, %p7201_p1 }
   0x7   :  { %p7204_p4 = pnand %p7203_p3, %p7197_p0 }
   0x9   :  { %7207 = shalt.err (!%p7204_p4)  }
   0xa   :  { %s7294_s22 = smov [#allocation5]   ;;  %s7208_s23 = scalar_lea.vmem %s14_s20, 128 }
   0xb   :  { %12 = dma.vmem_to_smem %s10_s17, 128, %s7294_s22, [#allocation4] }
   0xc   :  { %p7209_p5 = scmp.ne.s32.totalorder %s14_s20, %s7208_s23  ;;  %p7213_p6 = scmp.lt.s32.totalorder %s14_s20, %s14_s20 }
   0xd   :  { %p7214_p7 = scmp.lt.s32.totalorder %s7208_s23, %s7208_s23 }
   0xf   :  { %p7215_p8 = por %p7214_p7, %p7213_p6 }
  0x11   :  { %p7216_p9 = pnand %p7215_p8, %p7209_p5 }
  0x13   :  { %7219 = shalt.err (!%p7216_p9)  }
  0x14   :  { %s7295_s0 = smov [#allocation6]  }
  0x15   :  { %16 = dma.vmem_to_smem %s14_s20, 128, %s7295_s0, [#allocation4] }
  0x16   :  { %7268 = dma.done.wait [#allocation4], 256 }
  0x17   :  { %7269 = vsyncadd [#allocation4], 4294967040 }
  0x18   :  { %18 = sfence }
  0x19   :  { %19 = vsyncpa [#allocation8], 0 }
  0x1a   :  { %21 = vsyncpa [#allocation8 + $0x1], 0  ;;  %s7330_s1 = smov 0   ;;  %s7332_s24 = smov 0  }
  0x1b   :  { %s7334_s25 = smov 0   ;;  %s7336_s26 = smov 0  }
  0x1c LB: > { %s7351_s27 = sadd.s32 4294967295, %s7288_s26   ;;  %s6812_s28 = sadd.s32 4294967294, %s7288_s26   ;;  %s7288_s26 = sphi %s7336_s26, %s9386_s26   ;;  %s7284_s25 = sphi %s7334_s25, %s9385_s25   ;;  %s7280_s24 = sphi %s7332_s24, %s9384_s24   ;;  %s7276_s1 = sphi %s7330_s1, %s9383_s1  }
  0x1d   : > { %s7355_s29 = sadd.s32 1, %s7288_s26   ;;  %s76_s30 = sadd.s32 1, %s7284_s25 }
  0x1e   : > { %s73_s5 = ssub.s32 %s7288_s26, %s7355_s29  ;;  %p86_p10 = scmp.ne.s32.totalorder %s7284_s25, %s7280_s24 }
  0x1f   : > { %p74_p11 = scmp.eq.s32.totalorder %s73_s5, 0  ;;  %p87_p12 = scmp.eq.s32.totalorder %s7351_s27, 1 }
  0x20   : > { %p92_p13 = scmp.ne.s32.totalorder %s7280_s24, %s7276_s1  ;;  %p93_p0 = scmp.eq.s32.totalorder %s6812_s28, 1 }
  0x21   : > { %s7366_s6 = scalar_select %p74_p11, %s7284_s25, %s76_s30  }
  0x22   : > { %p7368_p1 = por %p87_p12, %p86_p10  ;;  %p7372_p2 = por %p93_p0, %p92_p13 }
  0x23   : > { %p6814_p3 = scmp.ge.s32.totalorder %s7288_s26, 1  ;;  %p117_p4 = scmp.lt.s32.totalorder %s7288_s26, 3 }
  0x25   : > { %p118_p5 = pnand %p6814_p3, %p117_p4 }
  0x27   : > { %121 = sbr.rel (%p118_p5) target bundleno = 788 (0x314), region = 28 }
  0x2e   : > { %s131_s9 = sand.u32 1, %s7280_s24   ;;  %s6816_s10 = sshll.u32 %s7351_s27, 9 }
  0x2f   : > { %s7382_s11 = sshll.u32 %s131_s9, 2  ;;  %s7290_s13 = smov 0  }
  0x30   : > { %s133_s12 = scalar_lea.vmem [#allocation7], %s7382_s11 }
  0x31 LB: >> { %s142_s14 = sadd.s32 %s7292_s13, %s6816_s10  ;;  %vm148_vm0 = vcmask 253952   ;;  %s147_s23 = scalar_lea.vmem [#allocation2], %s7292_s13  ;;  %s7292_s13 = sphi %s7290_s13, %s141_s13  }
  0x32   : >> { %s143_s15 = sld [smem:[#allocation5 + %s142_s14]]  ;;  %s152_s0 = scalar_lea.vmem [#allocation3], %s7292_s13 }
  0x33   : >> { %s144_s16 = sld [smem:[#allocation6 + %s142_s14]]  ;;  %s141_s13 = sadd.s32 1, %s7292_s13  }
  0x34   : >> { %p138_p6 = scmp.ge.s32.totalorder %s141_s13, 512  }
  0x35   : > { %vm346_vm1 = vcmask (%p138_p6), 261120   ;;  %vm6374_vm2 = vcmask (%p138_p6), 130112   ;;  %vm6381_vm3 = vcmask (%p138_p6), 195712   ;;  %vm6388_vm4 = vcmask (%p138_p6), 261312   ;;  %s6886_s28 = sshll.u32 (%p138_p6), %s7351_s27, 6  ;;  %s6756_s30 = sshll.u32 (%p138_p6), %s133_s12, 4  ;;  %s9318_s30 = int_to_ptr.vmem [resolvable:$true] %s6756_s30 }
  0x36   : > { %140 = sbr.rel (!%p138_p6) target bundleno = 49 (0x31), region = 71  ;;  %vm6395_vm5 = vcmask (%p138_p6), 326912   ;;  %vm6402_vm6 = vcmask (%p138_p6), 392512   ;;  %vm6409_vm7 = vcmask (%p138_p6), 458112   ;;  %vm6416_vm8 = vcmask (%p138_p6), 523712   ;;  %s9316_s13 = scalar_lea.hbm (%p138_p6), %s9365_s4, %s6886_s28 }
  0x37   : > { %vm6423_vm9 = vcmask (%p138_p6), 589312   ;;  %vm6430_vm10 = vcmask (%p138_p6), 654912   ;;  %vm6437_vm11 = vcmask (%p138_p6), 720512   ;;  %vm6444_vm12 = vcmask (%p138_p6), 786112   ;;  %s6742_s27 = scalar_lea.sflag (%p138_p6), [#allocation8], %s131_s9  ;;  %s7220_s14 = scalar_lea.vmem (%p138_p6), %s9318_s30, 64 }
  0x38   : >> { %s145_s19 = scalar_lea.vmem %s9363_s2, %s143_s15  ;;  %vm6451_vm13 = vcmask (%p138_p6), 851712   ;;  %vm6458_vm14 = vcmask (%p138_p6), 917312   ;;  %vm6465_vm15 = vcmask (%p138_p6), 982912   ;;  %p7221_p7 = scmp.ne.s32.totalorder (%p138_p6), %s9318_s30, %s7220_s14 }
  0x39   : >> { %s150_s22 = scalar_lea.vmem %s9364_s3, %s144_s16  ;;  %v146_v0 = vld [vmem:[%s145_s19] sm:$0x1]  ;;  %s7298_s15 = smov (%p138_p6), [#allocation7]  }
  0x3a   : >> { %v151_v1 = vld [vmem:[%s150_s22] sm:$0x1]  ;;  %149 = vst.msk [vmem:[%s147_s23] sm:$0x1] %vm148_vm0, %v146_v0  ;;  %p7222_p8 = pnand (%p138_p6), %p7221_p7, %p7368_p1  ;;  %s7224_s16 = sshll.u32 (%p138_p6), %s7298_s15, 4  ;;  %s7225_s16 = int_to_ptr.vmem [resolvable:$false] %s7224_s16 }
  0x3b   : >> { %153 = vst.msk [vmem:[%s152_s0] sm:$0x1] %vm148_vm0, %v151_v1  ;;  %vm6472_vm0 = vcmask (%p138_p6), 1048512   ;;  %s7226_s17 = scalar_lea.vmem (%p138_p6), %s7225_s16, 128  ;;  %p7227_p10 = scmp.lt.s32.totalorder (%p138_p6), %s9318_s30, %s7225_s16 }
  0x3c   : > { %p7223_p9 = pneg (%p138_p6), %p7222_p8  ;;  %p7228_p11 = scmp.lt.s32.totalorder (%p138_p6), %s7226_s17, %s7220_s14 }
  0x3e   : > { %p7229_p12 = por %p7228_p11, %p7227_p10 }
  0x40   : > { %p7230_p13 = pnand %p7229_p12, %p7223_p9 }
  0x41   : > { %v156_v2 = vld [vmem:[#allocation2 + $0x10] sm:$0xff]  ;;  %v154_v4 = vld [vmem:[#allocation2] sm:$0xff]  ;;  %v157_v7 = vld [vmem:[#allocation2 + $0x18] sm:$0xff] }
  0x42   : > { %v220_v3 = vld [vmem:[#allocation3 + $0x10] sm:$0xff]  ;;  %v218_v6 = vld [vmem:[#allocation3] sm:$0xff]  ;;  %v221_v8 = vld [vmem:[#allocation3 + $0x18] sm:$0xff] }
  0x43   : > { %v284_v5 = vmul.f32 %v220_v3, %v156_v2  ;;  %v282_v9 = vmul.f32 %v218_v6, %v154_v4  ;;  %v285_v10 = vmul.f32 %v221_v8, %v157_v7  ;;  %v155_v11 = vld [vmem:[#allocation2 + $0x8] sm:$0xff]  ;;  %v158_v17 = vld [vmem:[#allocation2 + $0x20] sm:$0xff]  ;;  %v161_v24 = vld [vmem:[#allocation2 + $0x38] sm:$0xff] }
  0x44   : > { %v219_v12 = vld [vmem:[#allocation3 + $0x8] sm:$0xff]  ;;  %v222_v18 = vld [vmem:[#allocation3 + $0x20] sm:$0xff]  ;;  %v225_v25 = vld [vmem:[#allocation3 + $0x38] sm:$0xff] }
  0x45   : > { %v159_v13 = vld [vmem:[#allocation2 + $0x28] sm:$0xff]  ;;  %v353_v14 = vsel %vm346_vm1, %v284_v5, 0.0  ;;  %v283_v15 = vmul.f32 %v219_v12, %v155_v11  ;;  %v347_v19 = vsel %vm346_vm1, %v282_v9, 0.0  ;;  %v356_v20 = vsel %vm346_vm1, %v285_v10, 0.0  ;;  %v160_v26 = vld [vmem:[#allocation2 + $0x30] sm:$0xff]  ;;  %v162_v34 = vld [vmem:[#allocation2 + $0x40] sm:$0xff] }
  0x46   : > { %v223_v16 = vld [vmem:[#allocation3 + $0x28] sm:$0xff]  ;;  %354 = vadd.xlane.f32.xlu1 %v353_v14  ;;  %348 = vadd.xlane.f32.xlu0 %v347_v19  ;;  %v286_v23 = vmul.f32 %v222_v18, %v158_v17  ;;  %v224_v27 = vld [vmem:[#allocation3 + $0x30] sm:$0xff]  ;;  %v289_v29 = vmul.f32 %v225_v25, %v161_v24  ;;  %v226_v35 = vld [vmem:[#allocation3 + $0x40] sm:$0xff] }
  0x47   : > { %v287_v21 = vmul.f32 %v223_v16, %v159_v13  ;;  %v350_v22 = vsel %vm346_vm1, %v283_v15, 0.0  ;;  %v288_v31 = vmul.f32 %v224_v27, %v160_v26  ;;  %v163_v32 = vld [vmem:[#allocation2 + $0x48] sm:$0xff]  ;;  %v290_v39 = vmul.f32 %v226_v35, %v162_v34  ;;  %v165_v40 = vld [vmem:[#allocation2 + $0x58] sm:$0xff]  ;;  %v164_v42 = vld [vmem:[#allocation2 + $0x50] sm:$0xff] }
  0x48   : > { %v359_v30 = vsel %vm346_vm1, %v286_v23, 0.0  ;;  %v227_v33 = vld [vmem:[#allocation3 + $0x48] sm:$0xff]  ;;  %v368_v36 = vsel %vm346_vm1, %v289_v29, 0.0  ;;  %v229_v41 = vld [vmem:[#allocation3 + $0x58] sm:$0xff]  ;;  %v228_v43 = vld [vmem:[#allocation3 + $0x50] sm:$0xff] }
  0x49   : > { %v362_v28 = vsel %vm346_vm1, %v287_v21, 0.0  ;;  %v291_v37 = vmul.f32 %v227_v33, %v163_v32  ;;  %v365_v38 = vsel %vm346_vm1, %v288_v31, 0.0  ;;  %v293_v45 = vmul.f32 %v229_v41, %v165_v40  ;;  %v167_v48 = vld [vmem:[#allocation2 + $0x68] sm:$0xff]  ;;  %v166_v50 = vld [vmem:[#allocation2 + $0x60] sm:$0xff]  ;;  %v169_v56 = vld [vmem:[#allocation2 + $0x78] sm:$0xff] }
  0x4a   : > { %357 = vadd.xlane.f32.xlu1 %v356_v20  ;;  %351 = vadd.xlane.f32.xlu0 %v350_v22  ;;  %v371_v46 = vsel %vm346_vm1, %v290_v39, 0.0  ;;  %v292_v47 = vmul.f32 %v228_v43, %v164_v42  ;;  %v231_v49 = vld [vmem:[#allocation3 + $0x68] sm:$0xff]  ;;  %v230_v51 = vld [vmem:[#allocation3 + $0x60] sm:$0xff]  ;;  %v233_v57 = vld [vmem:[#allocation3 + $0x78] sm:$0xff] }
  0x4b   : > { %v374_v44 = vsel %vm346_vm1, %v291_v37, 0.0  ;;  %v380_v52 = vsel %vm346_vm1, %v293_v45, 0.0  ;;  %v295_v53 = vmul.f32 %v231_v49, %v167_v48  ;;  %v294_v55 = vmul.f32 %v230_v51, %v166_v50  ;;  %v168_v58 = vld [vmem:[#allocation2 + $0x70] sm:$0xff]  ;;  %v171_v0 = vld [vmem:[#allocation2 + $0x88] sm:$0xff]  ;;  %v170_v2 = vld [vmem:[#allocation2 + $0x80] sm:$0xff] }
  0x4c   : > { %v377_v54 = vsel %vm346_vm1, %v292_v47, 0.0  ;;  %v232_v59 = vld [vmem:[#allocation3 + $0x70] sm:$0xff]  ;;  %v297_v61 = vmul.f32 %v233_v57, %v169_v56  ;;  %v235_v1 = vld [vmem:[#allocation3 + $0x88] sm:$0xff]  ;;  %v234_v3 = vld [vmem:[#allocation3 + $0x80] sm:$0xff] }
  0x4d   : > { %v386_v60 = vsel %vm346_vm1, %v295_v53, 0.0  ;;  %v383_v62 = vsel %vm346_vm1, %v294_v55, 0.0  ;;  %v296_v63 = vmul.f32 %v232_v59, %v168_v58  ;;  %v299_v5 = vmul.f32 %v235_v1, %v171_v0  ;;  %v173_v8 = vld [vmem:[#allocation2 + $0x98] sm:$0xff]  ;;  %v172_v10 = vld [vmem:[#allocation2 + $0x90] sm:$0xff]  ;;  %v175_v16 = vld [vmem:[#allocation2 + $0xa8] sm:$0xff] }
  0x4e   : > { %363 = vadd.xlane.f32.xlu1 %v362_v28  ;;  %360 = vadd.xlane.f32.xlu0 %v359_v30  ;;  %v392_v4 = vsel %vm346_vm1, %v297_v61, 0.0  ;;  %v298_v7 = vmul.f32 %v234_v3, %v170_v2  ;;  %v237_v9 = vld [vmem:[#allocation3 + $0x98] sm:$0xff]  ;;  %v236_v11 = vld [vmem:[#allocation3 + $0x90] sm:$0xff]  ;;  %v239_v17 = vld [vmem:[#allocation3 + $0xa8] sm:$0xff] }
  0x4f   : > { %v389_v6 = vsel %vm346_vm1, %v296_v63, 0.0  ;;  %v398_v12 = vsel %vm346_vm1, %v299_v5, 0.0  ;;  %v301_v13 = vmul.f32 %v237_v9, %v173_v8  ;;  %v300_v15 = vmul.f32 %v236_v11, %v172_v10  ;;  %v174_v18 = vld [vmem:[#allocation2 + $0xa0] sm:$0xff]  ;;  %v177_v24 = vld [vmem:[#allocation2 + $0xb8] sm:$0xff]  ;;  %v176_v26 = vld [vmem:[#allocation2 + $0xb0] sm:$0xff] }
  0x50   : > { %v395_v14 = vsel %vm346_vm1, %v298_v7, 0.0  ;;  %v238_v19 = vld [vmem:[#allocation3 + $0xa0] sm:$0xff]  ;;  %v303_v21 = vmul.f32 %v239_v17, %v175_v16  ;;  %v241_v25 = vld [vmem:[#allocation3 + $0xb8] sm:$0xff]  ;;  %v240_v27 = vld [vmem:[#allocation3 + $0xb0] sm:$0xff] }
  0x51   : > { %v404_v20 = vsel %vm346_vm1, %v301_v13, 0.0  ;;  %v401_v22 = vsel %vm346_vm1, %v300_v15, 0.0  ;;  %v302_v23 = vmul.f32 %v238_v19, %v174_v18  ;;  %v305_v29 = vmul.f32 %v241_v25, %v177_v24  ;;  %v179_v32 = vld [vmem:[#allocation2 + $0xc8] sm:$0xff]  ;;  %v178_v34 = vld [vmem:[#allocation2 + $0xc0] sm:$0xff]  ;;  %v181_v40 = vld [vmem:[#allocation2 + $0xd8] sm:$0xff] }
  0x52   : > { %369 = vadd.xlane.f32.xlu1 %v368_v36  ;;  %366 = vadd.xlane.f32.xlu0 %v365_v38  ;;  %v410_v28 = vsel %vm346_vm1, %v303_v21, 0.0  ;;  %v304_v31 = vmul.f32 %v240_v27, %v176_v26  ;;  %v243_v33 = vld [vmem:[#allocation3 + $0xc8] sm:$0xff]  ;;  %v242_v35 = vld [vmem:[#allocation3 + $0xc0] sm:$0xff]  ;;  %v245_v41 = vld [vmem:[#allocation3 + $0xd8] sm:$0xff] }
  0x53   : > { %v407_v30 = vsel %vm346_vm1, %v302_v23, 0.0  ;;  %v416_v36 = vsel %vm346_vm1, %v305_v29, 0.0  ;;  %v307_v37 = vmul.f32 %v243_v33, %v179_v32  ;;  %v306_v39 = vmul.f32 %v242_v35, %v178_v34  ;;  %v180_v42 = vld [vmem:[#allocation2 + $0xd0] sm:$0xff]  ;;  %v183_v48 = vld [vmem:[#allocation2 + $0xe8] sm:$0xff]  ;;  %v182_v50 = vld [vmem:[#allocation2 + $0xe0] sm:$0xff] }
  0x54   : > { %v413_v38 = vsel %vm346_vm1, %v304_v31, 0.0  ;;  %v244_v43 = vld [vmem:[#allocation3 + $0xd0] sm:$0xff]  ;;  %v309_v45 = vmul.f32 %v245_v41, %v181_v40  ;;  %v247_v49 = vld [vmem:[#allocation3 + $0xe8] sm:$0xff]  ;;  %v246_v51 = vld [vmem:[#allocation3 + $0xe0] sm:$0xff] }
  0x55   : > { %v308_v47 = vmul.f32 %v244_v43, %v180_v42  ;;  %v311_v53 = vmul.f32 %v247_v49, %v183_v48  ;;  %v310_v55 = vmul.f32 %v246_v51, %v182_v50  ;;  %v185_v56 = vld [vmem:[#allocation2 + $0xf8] sm:$0xff]  ;;  %v184_v58 = vld [vmem:[#allocation2 + $0xf0] sm:$0xff]  ;;  %v187_v1 = vld [vmem:[#allocation2 + $0x108] sm:$0xff] }
  0x56   : > { %375 = vadd.xlane.f32.xlu1 %v374_v44  ;;  %372 = vadd.xlane.f32.xlu0 %v371_v46  ;;  %v422_v44 = vsel %vm346_vm1, %v307_v37, 0.0  ;;  %v419_v46 = vsel %vm346_vm1, %v306_v39, 0.0  ;;  %v249_v57 = vld [vmem:[#allocation3 + $0xf8] sm:$0xff]  ;;  %v248_v59 = vld [vmem:[#allocation3 + $0xf0] sm:$0xff]  ;;  %v251_v2 = vld [vmem:[#allocation3 + $0x108] sm:$0xff] }
  0x57   : > { %v313_v61 = vmul.f32 %v249_v57, %v185_v56  ;;  %v431_v63 = vsel %vm346_vm1, %v310_v55, 0.0  ;;  %v312_v0 = vmul.f32 %v248_v59, %v184_v58  ;;  %v186_v3 = vld [vmem:[#allocation2 + $0x100] sm:$0xff]  ;;  %v189_v9 = vld [vmem:[#allocation2 + $0x118] sm:$0xff]  ;;  %v188_v11 = vld [vmem:[#allocation2 + $0x110] sm:$0xff] }
  0x58   : > { %v253_v10 = vld [vmem:[#allocation3 + $0x118] sm:$0xff]  ;;  %v191_v17 = vld [vmem:[#allocation2 + $0x128] sm:$0xff]  ;;  %v190_v19 = vld [vmem:[#allocation2 + $0x120] sm:$0xff] }
  0x59   : > { %v440_v5 = vsel %vm346_vm1, %v313_v61, 0.0  ;;  %v437_v7 = vsel %vm346_vm1, %v312_v0, 0.0  ;;  %v255_v18 = vld [vmem:[#allocation3 + $0x128] sm:$0xff]  ;;  %v193_v25 = vld [vmem:[#allocation2 + $0x138] sm:$0xff]  ;;  %v192_v27 = vld [vmem:[#allocation2 + $0x130] sm:$0xff] }
  0x5a   : > { %381 = vadd.xlane.f32.xlu1 %v380_v52  ;;  %378 = vadd.xlane.f32.xlu0 %v377_v54  ;;  %v428_v52 = vsel %vm346_vm1, %v309_v45, 0.0  ;;  %v425_v54 = vsel %vm346_vm1, %v308_v47, 0.0  ;;  %v257_v26 = vld [vmem:[#allocation3 + $0x138] sm:$0xff]  ;;  %v195_v33 = vld [vmem:[#allocation2 + $0x148] sm:$0xff]  ;;  %v194_v35 = vld [vmem:[#allocation2 + $0x140] sm:$0xff] }
  0x5b   : > { %v259_v34 = vld [vmem:[#allocation3 + $0x148] sm:$0xff]  ;;  %v197_v41 = vld [vmem:[#allocation2 + $0x158] sm:$0xff]  ;;  %v196_v43 = vld [vmem:[#allocation2 + $0x150] sm:$0xff] }
  0x5c   : > { %v261_v42 = vld [vmem:[#allocation3 + $0x158] sm:$0xff]  ;;  %v199_v49 = vld [vmem:[#allocation2 + $0x168] sm:$0xff]  ;;  %v198_v51 = vld [vmem:[#allocation2 + $0x160] sm:$0xff] }
  0x5d   : > { %v263_v50 = vld [vmem:[#allocation3 + $0x168] sm:$0xff]  ;;  %v201_v57 = vld [vmem:[#allocation2 + $0x178] sm:$0xff]  ;;  %v200_v59 = vld [vmem:[#allocation2 + $0x170] sm:$0xff] }
  0x5e   : > { %387 = vadd.xlane.f32.xlu1 %v386_v60  ;;  %384 = vadd.xlane.f32.xlu0 %v383_v62  ;;  %v434_v60 = vsel %vm346_vm1, %v311_v53, 0.0  ;;  %v7296_v62 = vmov 0   ;;  %v265_v58 = vld [vmem:[#allocation3 + $0x178] sm:$0xff] }
  0x5f   : > { %6939 = vset.pattern.permute.xlu1 %v7296_v62  ;;  %6938 = vset.pattern.permute.xlu0 %v7296_v62  ;;  %v329_v62 = vmul.f32 %v265_v58, %v201_v57  ;;  %v217_v57 = vld [vmem:[#allocation2 + $0x1f8] sm:$0xff] }
  0x60   : > { %v281_v58 = vld [vmem:[#allocation3 + $0x1f8] sm:$0xff] }
  0x62   : > { %393 = vadd.xlane.f32.xlu1 %v392_v4  ;;  %390 = vadd.xlane.f32.xlu0 %v389_v6  ;;  %v250_v4 = vld [vmem:[#allocation3 + $0x100] sm:$0xff]  ;;  %v315_v6 = vmul.f32 %v251_v2, %v187_v1  ;;  %v203_v1 = vld [vmem:[#allocation2 + $0x188] sm:$0xff] }
  0x63   : > { %v314_v8 = vmul.f32 %v250_v4, %v186_v3  ;;  %v267_v2 = vld [vmem:[#allocation3 + $0x188] sm:$0xff]  ;;  %v202_v3 = vld [vmem:[#allocation2 + $0x180] sm:$0xff] }
  0x64   : > { %v446_v13 = vsel %vm346_vm1, %v315_v6, 0.0  ;;  %v266_v4 = vld [vmem:[#allocation3 + $0x180] sm:$0xff]  ;;  %v331_v6 = vmul.f32 %v267_v2, %v203_v1 }
  0x65   : > { %v443_v15 = vsel %vm346_vm1, %v314_v8, 0.0  ;;  %v330_v8 = vmul.f32 %v266_v4, %v202_v3 }
  0x66   : > { %399 = vadd.xlane.f32.xlu1 %v398_v12  ;;  %396 = vadd.xlane.f32.xlu0 %v395_v14  ;;  %v252_v12 = vld [vmem:[#allocation3 + $0x110] sm:$0xff]  ;;  %v317_v14 = vmul.f32 %v253_v10, %v189_v9  ;;  %v205_v9 = vld [vmem:[#allocation2 + $0x198] sm:$0xff] }
  0x67   : > { %v316_v16 = vmul.f32 %v252_v12, %v188_v11  ;;  %v269_v10 = vld [vmem:[#allocation3 + $0x198] sm:$0xff]  ;;  %v204_v11 = vld [vmem:[#allocation2 + $0x190] sm:$0xff] }
  0x68   : > { %v452_v21 = vsel %vm346_vm1, %v317_v14, 0.0  ;;  %v268_v12 = vld [vmem:[#allocation3 + $0x190] sm:$0xff]  ;;  %v333_v14 = vmul.f32 %v269_v10, %v205_v9 }
  0x69   : > { %v449_v23 = vsel %vm346_vm1, %v316_v16, 0.0  ;;  %v332_v16 = vmul.f32 %v268_v12, %v204_v11 }
  0x6a   : > { %405 = vadd.xlane.f32.xlu1 %v404_v20  ;;  %402 = vadd.xlane.f32.xlu0 %v401_v22  ;;  %v254_v20 = vld [vmem:[#allocation3 + $0x120] sm:$0xff]  ;;  %v319_v22 = vmul.f32 %v255_v18, %v191_v17  ;;  %v207_v17 = vld [vmem:[#allocation2 + $0x1a8] sm:$0xff] }
  0x6b   : > { %v318_v24 = vmul.f32 %v254_v20, %v190_v19  ;;  %v271_v18 = vld [vmem:[#allocation3 + $0x1a8] sm:$0xff]  ;;  %v206_v19 = vld [vmem:[#allocation2 + $0x1a0] sm:$0xff] }
  0x6c   : > { %v458_v29 = vsel %vm346_vm1, %v319_v22, 0.0  ;;  %v270_v20 = vld [vmem:[#allocation3 + $0x1a0] sm:$0xff]  ;;  %v335_v22 = vmul.f32 %v271_v18, %v207_v17 }
  0x6d   : > { %v455_v31 = vsel %vm346_vm1, %v318_v24, 0.0  ;;  %v334_v24 = vmul.f32 %v270_v20, %v206_v19  ;;  %v9367_v19 = vlaneseq }
  0x6e   : > { %411 = vadd.xlane.f32.xlu1 %v410_v28  ;;  %408 = vadd.xlane.f32.xlu0 %v407_v30  ;;  %v256_v28 = vld [vmem:[#allocation3 + $0x130] sm:$0xff]  ;;  %v321_v30 = vmul.f32 %v257_v26, %v193_v25  ;;  %v209_v25 = vld [vmem:[#allocation2 + $0x1b8] sm:$0xff] }
  0x6f   : > { %v320_v32 = vmul.f32 %v256_v28, %v192_v27  ;;  %v273_v26 = vld [vmem:[#allocation3 + $0x1b8] sm:$0xff]  ;;  %v208_v27 = vld [vmem:[#allocation2 + $0x1b0] sm:$0xff] }
  0x70   : > { %v464_v37 = vsel %vm346_vm1, %v321_v30, 0.0  ;;  %v272_v28 = vld [vmem:[#allocation3 + $0x1b0] sm:$0xff]  ;;  %v337_v30 = vmul.f32 %v273_v26, %v209_v25 }
  0x71   : > { %v461_v39 = vsel %vm346_vm1, %v320_v32, 0.0  ;;  %v336_v32 = vmul.f32 %v272_v28, %v208_v27  ;;  %v7456_v28 = vshrl.u32 %v9367_v19, 7 }
  0x72   : > { %417 = vadd.xlane.f32.xlu1 %v416_v36  ;;  %414 = vadd.xlane.f32.xlu0 %v413_v38  ;;  %v258_v36 = vld [vmem:[#allocation3 + $0x140] sm:$0xff]  ;;  %v323_v38 = vmul.f32 %v259_v34, %v195_v33  ;;  %v211_v33 = vld [vmem:[#allocation2 + $0x1c8] sm:$0xff] }
  0x73   : > { %v322_v40 = vmul.f32 %v258_v36, %v194_v35  ;;  %v275_v34 = vld [vmem:[#allocation3 + $0x1c8] sm:$0xff]  ;;  %v210_v35 = vld [vmem:[#allocation2 + $0x1c0] sm:$0xff] }
  0x74   : > { %v470_v45 = vsel %vm346_vm1, %v323_v38, 0.0  ;;  %v274_v36 = vld [vmem:[#allocation3 + $0x1c0] sm:$0xff]  ;;  %v339_v38 = vmul.f32 %v275_v34, %v211_v33 }
  0x75   : > { %v467_v47 = vsel %vm346_vm1, %v322_v40, 0.0  ;;  %v338_v40 = vmul.f32 %v274_v36, %v210_v35 }
  0x76   : > { %423 = vadd.xlane.f32.xlu1 %v422_v44  ;;  %420 = vadd.xlane.f32.xlu0 %v419_v46  ;;  %v260_v44 = vld [vmem:[#allocation3 + $0x150] sm:$0xff]  ;;  %v325_v46 = vmul.f32 %v261_v42, %v197_v41  ;;  %v213_v41 = vld [vmem:[#allocation2 + $0x1d8] sm:$0xff] }
  0x77   : > { %v324_v48 = vmul.f32 %v260_v44, %v196_v43  ;;  %v277_v42 = vld [vmem:[#allocation3 + $0x1d8] sm:$0xff]  ;;  %v212_v43 = vld [vmem:[#allocation2 + $0x1d0] sm:$0xff] }
  0x78   : > { %v476_v53 = vsel %vm346_vm1, %v325_v46, 0.0  ;;  %v276_v44 = vld [vmem:[#allocation3 + $0x1d0] sm:$0xff]  ;;  %v341_v46 = vmul.f32 %v277_v42, %v213_v41 }
  0x79   : > { %v473_v55 = vsel %vm346_vm1, %v324_v48, 0.0  ;;  %v340_v48 = vmul.f32 %v276_v44, %v212_v43 }
  0x7a   : > { %429 = vadd.xlane.f32.xlu1 %v428_v52  ;;  %426 = vadd.xlane.f32.xlu0 %v425_v54  ;;  %v262_v52 = vld [vmem:[#allocation3 + $0x160] sm:$0xff]  ;;  %v327_v54 = vmul.f32 %v263_v50, %v199_v49  ;;  %v215_v49 = vld [vmem:[#allocation2 + $0x1e8] sm:$0xff] }
  0x7b   : > { %v326_v56 = vmul.f32 %v262_v52, %v198_v51  ;;  %v279_v50 = vld [vmem:[#allocation3 + $0x1e8] sm:$0xff]  ;;  %v214_v51 = vld [vmem:[#allocation2 + $0x1e0] sm:$0xff] }
  0x7c   : > { %v482_v61 = vsel %vm346_vm1, %v327_v54, 0.0  ;;  %v278_v52 = vld [vmem:[#allocation3 + $0x1e0] sm:$0xff]  ;;  %v343_v54 = vmul.f32 %v279_v50, %v215_v49  ;;  %v7471_v49 = vsub.s32 4, %v7456_v28  ;;  %v7474_v50 = vsub.s32 5, %v7456_v28 }
  0x7e   : > { %435 = vadd.xlane.f32.xlu1 %v434_v60  ;;  %432 = vadd.xlane.f32.xlu0 %v431_v63  ;;  %v264_v60 = vld [vmem:[#allocation3 + $0x170] sm:$0xff]  ;;  %v479_v63 = vsel %vm346_vm1, %v326_v56, 0.0  ;;  %v342_v56 = vmul.f32 %v278_v52, %v214_v51 }
  0x7f   : > { %v328_v0 = vmul.f32 %v264_v60, %v200_v59  ;;  %v216_v59 = vld [vmem:[#allocation2 + $0x1f0] sm:$0xff] }
  0x80   : > { %v280_v60 = vld [vmem:[#allocation3 + $0x1f0] sm:$0xff] }
  0x82   : > { %441 = vadd.xlane.f32.xlu1 %v440_v5  ;;  %438 = vadd.xlane.f32.xlu0 %v437_v7  ;;  %v488_v5 = vsel %vm346_vm1, %v329_v62, 0.0  ;;  %v485_v7 = vsel %vm346_vm1, %v328_v0, 0.0  ;;  %v345_v62 = vmul.f32 %v281_v58, %v217_v57  ;;  %v344_v0 = vmul.f32 %v280_v60, %v216_v59 }
  0x84   : > { %v536_v1 = vsel %vm346_vm1, %v345_v62, 0.0  ;;  %v533_v2 = vsel %vm346_vm1, %v344_v0, 0.0 }
  0x86   : > { %447 = vadd.xlane.f32.xlu1 %v446_v13  ;;  %444 = vadd.xlane.f32.xlu0 %v443_v15  ;;  %v494_v13 = vsel %vm346_vm1, %v331_v6, 0.0  ;;  %v491_v15 = vsel %vm346_vm1, %v330_v8, 0.0 }
  0x8a   : > { %453 = vadd.xlane.f32.xlu1 %v452_v21  ;;  %450 = vadd.xlane.f32.xlu0 %v449_v23  ;;  %v500_v21 = vsel %vm346_vm1, %v333_v14, 0.0  ;;  %v497_v23 = vsel %vm346_vm1, %v332_v16, 0.0 }
  0x8e   : > { %459 = vadd.xlane.f32.xlu1 %v458_v29  ;;  %456 = vadd.xlane.f32.xlu0 %v455_v31  ;;  %v506_v29 = vsel %vm346_vm1, %v335_v22, 0.0  ;;  %v503_v31 = vsel %vm346_vm1, %v334_v24, 0.0 }
  0x92   : > { %465 = vadd.xlane.f32.xlu1 %v464_v37  ;;  %462 = vadd.xlane.f32.xlu0 %v461_v39  ;;  %v512_v37 = vsel %vm346_vm1, %v337_v30, 0.0  ;;  %v509_v39 = vsel %vm346_vm1, %v336_v32, 0.0  ;;  %v7297_v32 = vmov 1966171168  }
  0x93   : > { %v3040_v33 = vunpack.c.l.s4 %v7297_v32 }
  0x95   : > { %v3041_v43 = vunpack.c.0.s8 %v3040_v33 }
  0x96   : > { %471 = vadd.xlane.f32.xlu1 %v470_v45  ;;  %468 = vadd.xlane.f32.xlu0 %v467_v47  ;;  %v518_v45 = vsel %vm346_vm1, %v339_v38, 0.0  ;;  %v515_v47 = vsel %vm346_vm1, %v338_v40, 0.0 }
  0x97   : > { %v7485_v59 = vsub.s32 %v3041_v43, %v7456_v28 }
  0x99   : > { %9374 = vst [vmem:[#allocation11_spill] sm:$0xff] %v7485_v59 }
  0x9a   : > { %477 = vadd.xlane.f32.xlu1 %v476_v53  ;;  %474 = vadd.xlane.f32.xlu0 %v473_v55  ;;  %v524_v53 = vsel %vm346_vm1, %v341_v46, 0.0  ;;  %v521_v55 = vsel %vm346_vm1, %v340_v48, 0.0  ;;  %v7465_v46 = vsub.s32 2, %v7456_v28  ;;  %v7468_v48 = vsub.s32 3, %v7456_v28 }
  0x9e   : > { %483 = vadd.xlane.f32.xlu1 %v482_v61  ;;  %480 = vadd.xlane.f32.xlu0 %v479_v63  ;;  %v530_v61 = vsel %vm346_vm1, %v343_v54, 0.0  ;;  %v527_v63 = vsel %vm346_vm1, %v342_v56, 0.0  ;;  %v7477_v54 = vsub.s32 6, %v7456_v28 }
  0xa2   : > { %489 = vadd.xlane.f32.xlu1 %v488_v5  ;;  %486 = vadd.xlane.f32.xlu0 %v485_v7 }
  0xa6   : > { %495 = vadd.xlane.f32.xlu1 %v494_v13  ;;  %492 = vadd.xlane.f32.xlu0 %v491_v15 }
  0xaa   : > { %501 = vadd.xlane.f32.xlu1 %v500_v21  ;;  %498 = vadd.xlane.f32.xlu0 %v497_v23 }
  0xae   : > { %507 = vadd.xlane.f32.xlu1 %v506_v29  ;;  %504 = vadd.xlane.f32.xlu0 %v503_v31 }
  0xb2   : > { %513 = vadd.xlane.f32.xlu1 %v512_v37  ;;  %510 = vadd.xlane.f32.xlu0 %v509_v39  ;;  %v7459_v39 = vsub.s32 0, %v7456_v28 }
  0xb6   : > { %519 = vadd.xlane.f32.xlu1 %v518_v45  ;;  %516 = vadd.xlane.f32.xlu0 %v515_v47  ;;  %v7462_v45 = vsub.s32 1, %v7456_v28 }
  0xba   : > { %525 = vadd.xlane.f32.xlu1 %v524_v53  ;;  %522 = vadd.xlane.f32.xlu0 %v521_v55  ;;  %v7480_v55 = vsub.s32 7, %v7456_v28 }
  0xbe   : > { %531 = vadd.xlane.f32.xlu1 %v530_v61  ;;  %528 = vadd.xlane.f32.xlu0 %v527_v63 }
  0xc2   : > { %537 = vadd.xlane.f32.xlu1 %v536_v1  ;;  %534 = vadd.xlane.f32.xlu0 %v533_v2 }
  0xd3   : > { %v355_v3 = vpop.xlane.xlu1 %354  ;;  %v349_v5 = vpop.xlane.xlu0 %348 }
  0xd4   : > { %v6819_v4 = vmul.f32 -1.442695, %v355_v3  ;;  %v6817_v6 = vmul.f32 -1.442695, %v349_v5 }
  0xd6   : > { %6940 = vpow2.f32 %v6819_v4 }
  0xd7   : > { %6942 = vpow2.f32 %v6817_v6  ;;  %v358_v7 = vpop.xlane.xlu1 %357  ;;  %v352_v9 = vpop.xlane.xlu0 %351 }
  0xd8   : > { %v6820_v8 = vmul.f32 -1.442695, %v358_v7  ;;  %v6818_v10 = vmul.f32 -1.442695, %v352_v9 }
  0xda   : > { %6944 = vpow2.f32 %v6820_v8 }
  0xdb   : > { %6946 = vpow2.f32 %v6818_v10  ;;  %v364_v11 = vpop.xlane.xlu1 %363  ;;  %v361_v13 = vpop.xlane.xlu0 %360 }
  0xdc   : > { %v6822_v12 = vmul.f32 -1.442695, %v364_v11  ;;  %v6821_v14 = vmul.f32 -1.442695, %v361_v13 }
  0xde   : > { %6948 = vpow2.f32 %v6822_v12 }
  0xdf   : > { %6950 = vpow2.f32 %v6821_v14  ;;  %v370_v15 = vpop.xlane.xlu1 %369  ;;  %v367_v18 = vpop.xlane.xlu0 %366 }
  0xe0   : > { %v6941_v16 = vpop.eup %6940  ;;  %v6824_v17 = vmul.f32 -1.442695, %v370_v15  ;;  %v6823_v22 = vmul.f32 -1.442695, %v367_v18 }
  0xe1   : > { %v6943_v20 = vpop.eup %6942  ;;  %v733_v21 = vadd.f32 1.0, %v6941_v16 }
  0xe2   : > { %v731_v23 = vadd.f32 1.0, %v6943_v20  ;;  %6952 = vpow2.f32 %v6824_v17 }
  0xe3   : > { %6954 = vrcp.f32 %v733_v21  ;;  %v376_v24 = vpop.xlane.xlu1 %375  ;;  %v373_v27 = vpop.xlane.xlu0 %372 }
  0xe4   : > { %v6945_v25 = vpop.eup %6944  ;;  %6956 = vrcp.f32 %v731_v23  ;;  %v6826_v26 = vmul.f32 -1.442695, %v376_v24  ;;  %v6825_v31 = vmul.f32 -1.442695, %v373_v27 }
  0xe5   : > { %v6947_v29 = vpop.eup %6946  ;;  %v734_v30 = vadd.f32 1.0, %v6945_v25  ;;  %6958 = vpow2.f32 %v6823_v22 }
  0xe6   : > { %v732_v34 = vadd.f32 1.0, %v6947_v29  ;;  %6960 = vpow2.f32 %v6826_v26 }
  0xe7   : > { %6962 = vrcp.f32 %v734_v30  ;;  %v382_v35 = vpop.xlane.xlu1 %381  ;;  %v379_v38 = vpop.xlane.xlu0 %378 }
  0xe8   : > { %v6949_v36 = vpop.eup %6948  ;;  %6964 = vrcp.f32 %v732_v34  ;;  %v6828_v37 = vmul.f32 -1.442695, %v382_v35  ;;  %v6827_v42 = vmul.f32 -1.442695, %v379_v38 }
  0xe9   : > { %v6951_v40 = vpop.eup %6950  ;;  %v736_v41 = vadd.f32 1.0, %v6949_v36  ;;  %6966 = vpow2.f32 %v6825_v31 }
  0xea   : > { %v735_v44 = vadd.f32 1.0, %v6951_v40  ;;  %6968 = vpow2.f32 %v6828_v37 }
  0xeb   : > { %6970 = vrcp.f32 %v736_v41  ;;  %v388_v47 = vpop.xlane.xlu1 %387  ;;  %v385_v53 = vpop.xlane.xlu0 %384 }
  0xec   : > { %v6953_v51 = vpop.eup %6952  ;;  %6972 = vrcp.f32 %v735_v44  ;;  %v6830_v52 = vmul.f32 -1.442695, %v388_v47  ;;  %v6829_v58 = vmul.f32 -1.442695, %v385_v53 }
  0xed   : > { %v7482_v56 = vpop.eup %6954  ;;  %v738_v57 = vadd.f32 1.0, %v6953_v51  ;;  %6974 = vpow2.f32 %v6827_v42 }
  0xee   : > { %v6957_v60 = vpop.eup %6956  ;;  %6976 = vpow2.f32 %v6830_v52  ;;  %v1054_v61 = vrot.slane %v7482_v56, %v7459_v39  ;;  %v1058_v62 = vrot.slane %v7482_v56, %v7462_v45  ;;  %v1062_v63 = vrot.slane %v7482_v56, %v7465_v46 }
  0xef   : > { %v6959_v0 = vpop.eup %6958  ;;  %6978 = vrcp.f32 %v738_v57  ;;  %v394_v1 = vpop.xlane.xlu1 %393  ;;  %v990_v2 = vrot.slane %v6957_v60, %v7459_v39  ;;  %v994_v3 = vrot.slane %v6957_v60, %v7462_v45  ;;  %v998_v4 = vrot.slane %v6957_v60, %v7465_v46 }
  0xf0   : > { %v6961_v5 = vpop.eup %6960  ;;  %v737_v6 = vadd.f32 1.0, %v6959_v0  ;;  %6980 = vpow2.f32 %v6829_v58  ;;  %v6832_v7 = vmul.f32 -1.442695, %v394_v1  ;;  %v391_v8 = vpop.xlane.xlu0 %390  ;;  %v1002_v9 = vrot.slane %v6957_v60, %v7468_v48 }
  0xf1   : > { %v7497_v10 = vpop.eup %6962  ;;  %v740_v11 = vadd.f32 1.0, %v6961_v5  ;;  %v6831_v12 = vmul.f32 -1.442695, %v391_v8  ;;  %v1006_v13 = vrot.slane %v6957_v60, %v7471_v49  ;;  %v1010_v14 = vrot.slane %v6957_v60, %v7474_v50 }
  0xf2   : > { %v7501_v15 = vpop.eup %6964  ;;  %6982 = vrcp.f32 %v737_v6  ;;  %v1014_v16 = vrot.slane %v6957_v60, %v7477_v54  ;;  %v1018_v17 = vrot.slane %v6957_v60, %v7480_v55  ;;  %v3035_v18 = vcombine.low %v990_v2, %v994_v3 }
  0xf3   : > { %v6967_v20 = vpop.eup %6966  ;;  %6984 = vrcp.f32 %v740_v11  ;;  %v400_v21 = vpop.xlane.xlu1 %399  ;;  %v3036_v22 = vcombine.low %v998_v4, %v1002_v9  ;;  %v3037_v23 = vcombine.low %v1006_v13, %v1010_v14  ;;  %v1022_v24 = vrot.slane %v7501_v15, %v7459_v39 }
  0xf4   : > { %v6969_v25 = vpop.eup %6968  ;;  %v739_v26 = vadd.f32 1.0, %v6967_v20  ;;  %6986 = vpow2.f32 %v6832_v7  ;;  %v6834_v27 = vmul.f32 -1.442695, %v400_v21  ;;  %v397_v29 = vpop.xlane.xlu0 %396  ;;  %v3038_v30 = vcombine.low %v1014_v16, %v1018_v17 }
  0xf5   : > { %v7507_v31 = vpop.eup %6970  ;;  %v742_v32 = vadd.f32 1.0, %v6969_v25  ;;  %6988 = vpow2.f32 %v6831_v12  ;;  %v6833_v33 = vmul.f32 -1.442695, %v397_v29  ;;  %v3045_v34 = vrot.slane %v3035_v18, %v7485_v59 }
  0xf6   : > { %v7510_v35 = vpop.eup %6972  ;;  %6990 = vrcp.f32 %v739_v26  ;;  %v3052_v36 = vrot.slane %v3036_v22, %v7485_v59  ;;  %v3059_v37 = vrot.slane %v3037_v23, %v7485_v59  ;;  %v3066_v38 = vrot.slane %v3038_v30, %v7485_v59 }
  0xf7   : > { %v6975_v40 = vpop.eup %6974  ;;  %6992 = vrcp.f32 %v742_v32  ;;  %v406_v41 = vpop.xlane.xlu1 %405  ;;  %v1026_v42 = vrot.slane %v7501_v15, %v7462_v45  ;;  %v1030_v43 = vrot.slane %v7501_v15, %v7465_v46  ;;  %v1034_v44 = vrot.slane %v7501_v15, %v7468_v48 }
  0xf8   : > { %v6977_v47 = vpop.eup %6976  ;;  %v741_v51 = vadd.f32 1.0, %v6975_v40  ;;  %6994 = vpow2.f32 %v6834_v27  ;;  %v6836_v52 = vmul.f32 -1.442695, %v406_v41  ;;  %v403_v53 = vpop.xlane.xlu0 %402  ;;  %v3067_v57 = vcombine.low %v3045_v34, %v3052_v36 }
  0xf9   : > { %v7521_v58 = vpop.eup %6978  ;;  %v744_v60 = vadd.f32 1.0, %v6977_v47  ;;  %6996 = vpow2.f32 %v6833_v33  ;;  %v6835_v0 = vmul.f32 -1.442695, %v403_v53  ;;  %v3068_v1 = vcombine.low %v3059_v37, %v3066_v38 }
  0xfa   : > { %v6981_v2 = vpop.eup %6980  ;;  %6998 = vrcp.f32 %v741_v51  ;;  %v3075_v3 = vrot.slane %v3067_v57, %v7485_v59  ;;  %v1038_v4 = vrot.slane %v7501_v15, %v7471_v49  ;;  %v1042_v5 = vrot.slane %v7501_v15, %v7474_v50 }
  0xfb   : > { %7000 = vrcp.f32 %v744_v60  ;;  %v743_v6 = vadd.f32 1.0, %v6981_v2  ;;  %v3082_v7 = vrot.slane %v3068_v1, %v7485_v59  ;;  %v412_v8 = vpop.xlane.xlu1 %411  ;;  %v1046_v9 = vrot.slane %v7501_v15, %v7477_v54 }
  0xfc   : > { %v7531_v11 = vpop.eup %6982  ;;  %7002 = vpow2.f32 %v6836_v52  ;;  %v6838_v12 = vmul.f32 -1.442695, %v412_v8  ;;  %v409_v13 = vpop.xlane.xlu0 %408  ;;  %v1050_v14 = vrot.slane %v7501_v15, %v7480_v55  ;;  %v3084_v16 = vcombine.low %v1022_v24, %v1026_v42 }
  0xfd   : > { %v7535_v17 = vpop.eup %6984  ;;  %7004 = vrcp.f32 %v743_v6  ;;  %v3083_v18 = vcombine.low %v3075_v3, %v3082_v7  ;;  %v6837_v20 = vmul.f32 -1.442695, %v409_v13  ;;  %v3085_v21 = vcombine.low %v1030_v43, %v1034_v44 }
  0xfe   : > { %v6987_v22 = vpop.eup %6986  ;;  %7006 = vpow2.f32 %v6835_v0  ;;  %v3086_v23 = vcombine.low %v1038_v4, %v1042_v5  ;;  %v3087_v25 = vcombine.low %v1046_v9, %v1050_v14  ;;  %v3094_v26 = vrot.slane %v3084_v16, %v7485_v59 }
  0xff   : > { %v6989_v27 = vpop.eup %6988  ;;  %v746_v29 = vadd.f32 1.0, %v6987_v22  ;;  %6172 = vperm.xlu0 %6938, %v3083_v18   ;;  %7008 = vpow2.f32 %v6838_v12  ;;  %v3101_v30 = vrot.slane %v3085_v21, %v7485_v59  ;;  %v418_v15 = vpop.xlane.xlu1 %417  ;;  %v1066_v24 = vrot.slane %v7482_v56, %v7468_v48 }
 0x100   : > { %v7541_v32 = vpop.eup %6990  ;;  %v745_v33 = vadd.f32 1.0, %v6989_v27  ;;  %7010 = vpow2.f32 %v6837_v20  ;;  %v3108_v34 = vrot.slane %v3086_v23, %v7485_v59  ;;  %v3115_v36 = vrot.slane %v3087_v25, %v7485_v59  ;;  %v415_v37 = vpop.xlane.xlu0 %414 }
 0x101   : > { %v7545_v38 = vpop.eup %6992  ;;  %7012 = vrcp.f32 %v746_v29  ;;  %v3116_v40 = vcombine.low %v3094_v26, %v3101_v30  ;;  %v6840_v41 = vmul.f32 -1.442695, %v418_v15  ;;  %v6839_v42 = vmul.f32 -1.442695, %v415_v37 }
 0x102   : > { %v6995_v43 = vpop.eup %6994  ;;  %7014 = vrcp.f32 %v745_v33  ;;  %v3117_v44 = vcombine.low %v3108_v34, %v3115_v36  ;;  %v1070_v47 = vrot.slane %v7482_v56, %v7471_v49  ;;  %v1074_v51 = vrot.slane %v7482_v56, %v7474_v50 }
 0x103   : > { %v6997_v52 = vpop.eup %6996  ;;  %v748_v53 = vadd.f32 1.0, %v6995_v43  ;;  %v3124_v57 = vrot.slane %v3116_v40, %v7485_v59  ;;  %7016 = vpow2.f32 %v6840_v41  ;;  %v1078_v60 = vrot.slane %v7482_v56, %v7477_v54  ;;  %v424_v0 = vpop.xlane.xlu1 %423 }
 0x104   : > { %v7554_v1 = vpop.eup %6998  ;;  %v747_v2 = vadd.f32 1.0, %v6997_v52  ;;  %v3131_v3 = vrot.slane %v3117_v44, %v7485_v59  ;;  %7018 = vpow2.f32 %v6839_v42  ;;  %v1082_v4 = vrot.slane %v7482_v56, %v7480_v55 }
 0x105   : > { %v7559_v5 = vpop.eup %7000  ;;  %7020 = vrcp.f32 %v748_v53  ;;  %v3133_v6 = vcombine.low %v1054_v61, %v1058_v62  ;;  %v3134_v7 = vcombine.low %v1062_v63, %v1066_v24  ;;  %v3135_v8 = vcombine.low %v1070_v47, %v1074_v51  ;;  %v421_v61 = vpop.xlane.xlu0 %420 }
 0x106   : > { %v7003_v9 = vpop.eup %7002  ;;  %7022 = vrcp.f32 %v747_v2  ;;  %v3132_v12 = vcombine.low %v3124_v57, %v3131_v3  ;;  %v3136_v13 = vcombine.low %v1078_v60, %v1082_v4  ;;  %v6842_v14 = vmul.f32 -1.442695, %v424_v0 }
 0x107   : > { %v7570_v16 = vpop.eup %7004  ;;  %v750_v18 = vadd.f32 1.0, %v7003_v9  ;;  %v3143_v20 = vrot.slane %v3133_v6, %v7485_v59  ;;  %v3150_v21 = vrot.slane %v3134_v7, %v7485_v59  ;;  %v3157_v22 = vrot.slane %v3135_v8, %v7485_v59  ;;  %v430_v47 = vpop.xlane.xlu1 %429 }
 0x108   : > { %v7007_v62 = vpop.eup %7006  ;;  %6175 = vperm.xlu1 %6939, %v3132_v12   ;;  %v3164_v56 = vrot.slane %v3136_v13, %v7485_v59  ;;  %7024 = vpow2.f32 %v6842_v14  ;;  %v6841_v63 = vmul.f32 -1.442695, %v421_v61  ;;  %v1086_v23 = vrot.slane %v7497_v10, %v7459_v39 }
 0x109   : > { %v7009_v25 = vpop.eup %7008  ;;  %7026 = vrcp.f32 %v750_v18  ;;  %v749_v26 = vadd.f32 1.0, %v7007_v62  ;;  %v3165_v27 = vcombine.low %v3143_v20, %v3150_v21  ;;  %v1090_v29 = vrot.slane %v7497_v10, %v7462_v45  ;;  %v427_v13 = vpop.xlane.xlu0 %426 }
 0x10a   : > { %v7011_v30 = vpop.eup %7010  ;;  %v752_v15 = vadd.f32 1.0, %v7009_v25  ;;  %v3166_v24 = vcombine.low %v3157_v22, %v3164_v56  ;;  %7028 = vpow2.f32 %v6841_v63  ;;  %v1094_v33 = vrot.slane %v7497_v10, %v7465_v46 }
 0x10b   : > { %v7582_v34 = vpop.eup %7012  ;;  %7030 = vrcp.f32 %v749_v26  ;;  %v751_v36 = vadd.f32 1.0, %v7011_v30  ;;  %v3173_v37 = vrot.slane %v3165_v27, %v7485_v59  ;;  %v1098_v40 = vrot.slane %v7497_v10, %v7468_v48 }
 0x10c   : > { %v7587_v41 = vpop.eup %7014  ;;  %7032 = vrcp.f32 %v752_v15  ;;  %v3180_v42 = vrot.slane %v3166_v24, %v7485_v59  ;;  %v1102_v43 = vrot.slane %v7497_v10, %v7471_v49  ;;  %v1106_v44 = vrot.slane %v7497_v10, %v7474_v50 }
 0x10d   : > { %v7017_v51 = vpop.eup %7016  ;;  %7034 = vrcp.f32 %v751_v36  ;;  %v1110_v52 = vrot.slane %v7497_v10, %v7477_v54  ;;  %v1114_v53 = vrot.slane %v7497_v10, %v7480_v55  ;;  %v3182_v57 = vcombine.low %v1086_v23, %v1090_v29 }
 0x10e   : > { %v7019_v60 = vpop.eup %7018  ;;  %v754_v0 = vadd.f32 1.0, %v7017_v51  ;;  %v3181_v2 = vcombine.low %v3173_v37, %v3180_v42  ;;  %v3183_v3 = vcombine.low %v1094_v33, %v1098_v40  ;;  %v3184_v4 = vcombine.low %v1102_v43, %v1106_v44 }
 0x10f   : > { %v7598_v6 = vpop.eup %7020  ;;  %v753_v7 = vadd.f32 1.0, %v7019_v60  ;;  %v3185_v8 = vcombine.low %v1110_v52, %v1114_v53  ;;  %v3192_v9 = vrot.slane %v3182_v57, %v7485_v59  ;;  %v6844_v12 = vmul.f32 -1.442695, %v430_v47 }
 0x110   : > { %v7601_v14 = vpop.eup %7022  ;;  %7036 = vrcp.f32 %v754_v0  ;;  %6178 = vperm.xlu1 %6939, %v3181_v2   ;;  %v3199_v10 = vrot.slane %v3183_v3, %v7485_v59  ;;  %v3206_v18 = vrot.slane %v3184_v4, %v7485_v59  ;;  %v6843_v20 = vmul.f32 -1.442695, %v427_v13 }
 0x111   : > { %7038 = vrcp.f32 %v753_v7  ;;  %v3213_v21 = vrot.slane %v3185_v8, %v7485_v59  ;;  %v1278_v22 = vrot.slane %v7535_v17, %v7459_v39  ;;  %v1282_v61 = vrot.slane %v7535_v17, %v7462_v45  ;;  %v436_v8 = vpop.xlane.xlu1 %435 }
 0x112   : > { %v7025_v62 = vpop.eup %7024  ;;  %v3214_v56 = vcombine.low %v3192_v9, %v3199_v10  ;;  %7040 = vpow2.f32 %v6844_v12  ;;  %v1286_v63 = vrot.slane %v7535_v17, %v7465_v46  ;;  %v1290_v23 = vrot.slane %v7535_v17, %v7468_v48 }
 0x113   : > { %v7614_v25 = vpop.eup %7026  ;;  %v756_v26 = vadd.f32 1.0, %v7025_v62  ;;  %v3215_v27 = vcombine.low %v3206_v18, %v3213_v21  ;;  %7042 = vpow2.f32 %v6843_v20  ;;  %v1294_v29 = vrot.slane %v7535_v17, %v7471_v49  ;;  %v433_v62 = vpop.xlane.xlu0 %432 }
 0x114   : > { %v7029_v30 = vpop.eup %7028  ;;  %v3222_v15 = vrot.slane %v3214_v56, %v7485_v59  ;;  %v1298_v24 = vrot.slane %v7535_v17, %v7474_v50  ;;  %v1302_v33 = vrot.slane %v7535_v17, %v7477_v54  ;;  %v1306_v36 = vrot.slane %v7535_v17, %v7480_v55 }
 0x115   : > { %v7625_v37 = vpop.eup %7030  ;;  %7044 = vrcp.f32 %v756_v26  ;;  %v755_v40 = vadd.f32 1.0, %v7029_v30  ;;  %v3229_v42 = vrot.slane %v3215_v27, %v7485_v59  ;;  %v3476_v43 = vcombine.low %v1278_v22, %v1282_v61 }
 0x116   : > { %v7628_v44 = vpop.eup %7032  ;;  %v3477_v47 = vcombine.low %v1286_v63, %v1290_v23  ;;  %v3478_v51 = vcombine.low %v1294_v29, %v1298_v24  ;;  %v3479_v52 = vcombine.low %v1302_v33, %v1306_v36  ;;  %v1118_v53 = vrot.slane %v7510_v35, %v7459_v39 }
 0x117   : > { %v7632_v57 = vpop.eup %7034  ;;  %7046 = vrcp.f32 %v755_v40  ;;  %v3230_v60 = vcombine.low %v3222_v15, %v3229_v42  ;;  %v3486_v17 = vrot.slane %v3476_v43, %v7485_v59  ;;  %v1122_v0 = vrot.slane %v7510_v35, %v7462_v45 }
 0x118   : > { %v3493_v2 = vrot.slane %v3477_v47, %v7485_v59  ;;  %v3500_v3 = vrot.slane %v3478_v51, %v7485_v59  ;;  %v3507_v4 = vrot.slane %v3479_v52, %v7485_v59  ;;  %v1126_v7 = vrot.slane %v7510_v35, %v7465_v46 }
 0x119   : > { %6181 = vperm.xlu1 %6939, %v3230_v60   ;;  %v1130_v9 = vrot.slane %v7510_v35, %v7468_v48  ;;  %v1134_v12 = vrot.slane %v7510_v35, %v7471_v49  ;;  %v1138_v13 = vrot.slane %v7510_v35, %v7474_v50  ;;  %v1142_v10 = vrot.slane %v7510_v35, %v7477_v54 }
 0x11a   : > { %v7650_v18 = vpop.eup %7036  ;;  %v3508_v20 = vcombine.low %v3486_v17, %v3493_v2  ;;  %v3509_v21 = vcombine.low %v3500_v3, %v3507_v4  ;;  %v1146_v22 = vrot.slane %v7510_v35, %v7480_v55  ;;  %v3231_v61 = vcombine.low %v1118_v53, %v1122_v0 }
 0x11b   : > { %v7654_v56 = vpop.eup %7038  ;;  %v3232_v63 = vcombine.low %v1126_v7, %v1130_v9  ;;  %v3233_v23 = vcombine.low %v1134_v12, %v1138_v13  ;;  %v6846_v26 = vmul.f32 -1.442695, %v436_v8  ;;  %v6845_v27 = vmul.f32 -1.442695, %v433_v62 }
 0x11c   : > { %v7041_v29 = vpop.eup %7040  ;;  %v3516_v30 = vrot.slane %v3508_v20, %v7485_v59  ;;  %v3523_v15 = vrot.slane %v3509_v21, %v7485_v59  ;;  %v3234_v24 = vcombine.low %v1142_v10, %v1146_v22  ;;  %v3241_v33 = vrot.slane %v3231_v61, %v7485_v59 }
 0x11d   : > { %v7043_v36 = vpop.eup %7042  ;;  %v758_v40 = vadd.f32 1.0, %v7041_v29  ;;  %v3248_v35 = vrot.slane %v3232_v63, %v7485_v59  ;;  %v3255_v42 = vrot.slane %v3233_v23, %v7485_v59  ;;  %7048 = vpow2.f32 %v6846_v26 }
 0x11e   : > { %v3524_v43 = vcombine.low %v3516_v30, %v3523_v15  ;;  %v3262_v47 = vrot.slane %v3234_v24, %v7485_v59  ;;  %7050 = vpow2.f32 %v6845_v27  ;;  %v757_v52 = vadd.f32 1.0, %v7043_v36  ;;  %v442_v30 = vpop.xlane.xlu1 %441 }
 0x11f   : > { %v7662_v51 = vpop.eup %7044  ;;  %v3263_v53 = vcombine.low %v3241_v33, %v3248_v35  ;;  %v1342_v60 = vrot.slane %v7545_v38, %v7459_v39  ;;  %v1346_v17 = vrot.slane %v7545_v38, %v7462_v45  ;;  %7052 = vrcp.f32 %v758_v40 }
 0x120   : > { %6199 = vperm.xlu0 %6938, %v3524_v43   ;;  %v3264_v0 = vcombine.low %v3255_v42, %v3262_v47  ;;  %v1350_v2 = vrot.slane %v7545_v38, %v7465_v46  ;;  %v1354_v3 = vrot.slane %v7545_v38, %v7468_v48  ;;  %v1358_v8 = vrot.slane %v7545_v38, %v7471_v49 }
 0x121   : > { %v7672_v4 = vpop.eup %7046  ;;  %v3271_v7 = vrot.slane %v3263_v53, %v7485_v59  ;;  %v1362_v9 = vrot.slane %v7545_v38, %v7474_v50  ;;  %v1366_v12 = vrot.slane %v7545_v38, %v7477_v54  ;;  %v1370_v10 = vrot.slane %v7545_v38, %v7480_v55 }
 0x122   : > { %v3278_v13 = vrot.slane %v3264_v0, %v7485_v59  ;;  %v3574_v20 = vcombine.low %v1342_v60, %v1346_v17  ;;  %v3575_v21 = vcombine.low %v1350_v2, %v1354_v3  ;;  %v1150_v61 = vrot.slane %v7507_v31, %v7459_v39 }
 0x123   : > { %v3576_v22 = vcombine.low %v1358_v8, %v1362_v9  ;;  %v1154_v62 = vrot.slane %v7507_v31, %v7462_v45  ;;  %v1158_v63 = vrot.slane %v7507_v31, %v7465_v46  ;;  %v3577_v26 = vcombine.low %v1366_v12, %v1370_v10  ;;  %v439_v10 = vpop.xlane.xlu0 %438 }
 0x124   : > { %v3279_v23 = vcombine.low %v3271_v7, %v3278_v13  ;;  %v3584_v27 = vrot.slane %v3574_v20, %v7485_v59  ;;  %v3591_v29 = vrot.slane %v3575_v21, %v7485_v59  ;;  %v1162_v15 = vrot.slane %v7507_v31, %v7468_v48 }
 0x125   : > { %v3598_v38 = vrot.slane %v3576_v22, %v7485_v59  ;;  %v1166_v24 = vrot.slane %v7507_v31, %v7471_v49  ;;  %v1170_v33 = vrot.slane %v7507_v31, %v7474_v50  ;;  %v3605_v36 = vrot.slane %v3577_v26, %v7485_v59 }
 0x126   : > { %6184 = vperm.xlu1 %6939, %v3279_v23   ;;  %v3606_v40 = vcombine.low %v3584_v27, %v3591_v29  ;;  %v1174_v35 = vrot.slane %v7507_v31, %v7477_v54  ;;  %v1178_v42 = vrot.slane %v7507_v31, %v7480_v55  ;;  %v3280_v47 = vcombine.low %v1150_v61, %v1154_v62 }
 0x127   : > { %v7049_v43 = vpop.eup %7048  ;;  %v3281_v53 = vcombine.low %v1158_v63, %v1162_v15  ;;  %v3282_v60 = vcombine.low %v1166_v24, %v1170_v33  ;;  %v6848_v17 = vmul.f32 -1.442695, %v442_v30  ;;  %v3607_v3 = vcombine.low %v3598_v38, %v3605_v36 }
 0x128   : > { %v7051_v0 = vpop.eup %7050  ;;  %v760_v2 = vadd.f32 1.0, %v7049_v43  ;;  %v3614_v7 = vrot.slane %v3606_v40, %v7485_v59  ;;  %v3283_v8 = vcombine.low %v1174_v35, %v1178_v42  ;;  %7054 = vrcp.f32 %v757_v52 }
 0x129   : > { %v3290_v9 = vrot.slane %v3280_v47, %v7485_v59  ;;  %v3297_v12 = vrot.slane %v3281_v53, %v7485_v59  ;;  %v3304_v13 = vrot.slane %v3282_v60, %v7485_v59  ;;  %v7708_v31 = vpop.eup %7052  ;;  %v7710_v20 = vadd.f32 1.0, %v7051_v0 }
 0x12a   : > { %v3621_v21 = vrot.slane %v3607_v3, %v7485_v59  ;;  %v3311_v22 = vrot.slane %v3283_v8, %v7485_v59  ;;  %v6847_v61 = vmul.f32 -1.442695, %v439_v10  ;;  %7056 = vrcp.f32 %v760_v2 }
 0x12b   : > { %v3312_v62 = vcombine.low %v3290_v9, %v3297_v12  ;;  %v1406_v52 = vrot.slane %v7559_v5, %v7459_v39  ;;  %v1410_v63 = vrot.slane %v7559_v5, %v7462_v45  ;;  %7058 = vpow2.f32 %v6848_v17 }
 0x12c   : > { %v3622_v23 = vcombine.low %v3614_v7, %v3621_v21  ;;  %v3313_v26 = vcombine.low %v3304_v13, %v3311_v22  ;;  %v1414_v27 = vrot.slane %v7559_v5, %v7465_v46  ;;  %7060 = vpow2.f32 %v6847_v61  ;;  %v448_v7 = vpop.xlane.xlu1 %447 }
 0x12d   : > { %v3320_v29 = vrot.slane %v3312_v62, %v7485_v59  ;;  %v1418_v30 = vrot.slane %v7559_v5, %v7468_v48  ;;  %v1422_v38 = vrot.slane %v7559_v5, %v7471_v49  ;;  %v1426_v24 = vrot.slane %v7559_v5, %v7474_v50 }
 0x12e   : > { %6205 = vperm.xlu0 %6938, %v3622_v23   ;;  %v3327_v15 = vrot.slane %v3313_v26, %v7485_v59  ;;  %v1430_v33 = vrot.slane %v7559_v5, %v7477_v54  ;;  %v1434_v36 = vrot.slane %v7559_v5, %v7480_v55  ;;  %v3672_v40 = vcombine.low %v1406_v52, %v1410_v63  ;;  %v445_v52 = vpop.xlane.xlu0 %444 }
 0x12f   : > { %v3673_v35 = vcombine.low %v1414_v27, %v1418_v30  ;;  %v1182_v42 = vrot.slane %v7531_v11, %v7459_v39  ;;  %v1186_v43 = vrot.slane %v7531_v11, %v7462_v45  ;;  %v3674_v53 = vcombine.low %v1422_v38, %v1426_v24 }
 0x130   : > { %v3328_v47 = vcombine.low %v3320_v29, %v3327_v15  ;;  %v3675_v60 = vcombine.low %v1430_v33, %v1434_v36  ;;  %v1190_v17 = vrot.slane %v7531_v11, %v7465_v46  ;;  %v3682_v0 = vrot.slane %v3672_v40, %v7485_v59 }
 0x131   : > { %v3689_v2 = vrot.slane %v3673_v35, %v7485_v59  ;;  %v1194_v5 = vrot.slane %v7531_v11, %v7468_v48  ;;  %v1198_v3 = vrot.slane %v7531_v11, %v7471_v49  ;;  %v3696_v8 = vrot.slane %v3674_v53, %v7485_v59 }
 0x132   : > { %6187 = vperm.xlu1 %6939, %v3328_v47   ;;  %v3703_v9 = vrot.slane %v3675_v60, %v7485_v59  ;;  %v1202_v12 = vrot.slane %v7531_v11, %v7474_v50  ;;  %v1206_v13 = vrot.slane %v7531_v11, %v7477_v54  ;;  %v7750_v10 = vpop.eup %7054  ;;  %v1210_v22 = vrot.slane %v7531_v11, %v7480_v55 }
 0x133   : > { %v3704_v21 = vcombine.low %v3682_v0, %v3689_v2  ;;  %v3329_v61 = vcombine.low %v1182_v42, %v1186_v43  ;;  %v3330_v62 = vcombine.low %v1190_v17, %v1194_v5  ;;  %v6850_v26 = vmul.f32 -1.442695, %v448_v7 }
 0x134   : > { %v3705_v63 = vcombine.low %v3696_v8, %v3703_v9  ;;  %v3331_v23 = vcombine.low %v1198_v3, %v1202_v12  ;;  %v6849_v27 = vmul.f32 -1.442695, %v445_v52  ;;  %v7754_v29 = vpop.eup %7056  ;;  %v3332_v38 = vcombine.low %v1206_v13, %v1210_v22 }
 0x135   : > { %v3712_v30 = vrot.slane %v3704_v21, %v7485_v59  ;;  %v3339_v15 = vrot.slane %v3329_v61, %v7485_v59  ;;  %v3346_v24 = vrot.slane %v3330_v62, %v7485_v59  ;;  %v7059_v33 = vpop.eup %7058  ;;  %7062 = vpow2.f32 %v6850_v26 }
 0x136   : > { %v3719_v36 = vrot.slane %v3705_v63, %v7485_v59  ;;  %v3353_v11 = vrot.slane %v3331_v23, %v7485_v59  ;;  %v1470_v40 = vrot.slane %v7582_v34, %v7459_v39  ;;  %v7061_v35 = vpop.eup %7060  ;;  %v762_v42 = vadd.f32 1.0, %v7059_v33 }
 0x137   : > { %v3360_v43 = vrot.slane %v3332_v38, %v7485_v59  ;;  %v3361_v47 = vcombine.low %v3339_v15, %v3346_v24  ;;  %7064 = vpow2.f32 %v6849_v27  ;;  %v1474_v60 = vrot.slane %v7582_v34, %v7462_v45 }
 0x138   : > { %7066 = vrcp.f32 %v7710_v20  ;;  %v3720_v53 = vcombine.low %v3712_v30, %v3719_v36  ;;  %v1478_v17 = vrot.slane %v7582_v34, %v7465_v46  ;;  %v761_v0 = vadd.f32 1.0, %v7061_v35  ;;  %v454_v30 = vpop.xlane.xlu1 %453 }
 0x139   : > { %v3362_v2 = vcombine.low %v3353_v11, %v3360_v43  ;;  %v3369_v5 = vrot.slane %v3361_v47, %v7485_v59  ;;  %v1482_v3 = vrot.slane %v7582_v34, %v7468_v48  ;;  %7068 = vrcp.f32 %v762_v42 }
 0x13a   : > { %6211 = vperm.xlu0 %6938, %v3720_v53   ;;  %v1486_v7 = vrot.slane %v7582_v34, %v7471_v49  ;;  %v1490_v20 = vrot.slane %v7582_v34, %v7474_v50  ;;  %v1494_v8 = vrot.slane %v7582_v34, %v7477_v54  ;;  %v1498_v12 = vrot.slane %v7582_v34, %v7480_v55 }
 0x13b   : > { %v3376_v9 = vrot.slane %v3362_v2, %v7485_v59  ;;  %v3770_v13 = vcombine.low %v1470_v40, %v1474_v60  ;;  %v3771_v21 = vcombine.low %v1478_v17, %v1482_v3  ;;  %v1214_v61 = vrot.slane %v7521_v58, %v7459_v39 }
 0x13c   : > { %v3772_v22 = vcombine.low %v1486_v7, %v1490_v20  ;;  %v1218_v62 = vrot.slane %v7521_v58, %v7462_v45  ;;  %v1222_v52 = vrot.slane %v7521_v58, %v7465_v46  ;;  %v3773_v23 = vcombine.low %v1494_v8, %v1498_v12 }
 0x13d   : > { %v3377_v63 = vcombine.low %v3369_v5, %v3376_v9  ;;  %v3780_v26 = vrot.slane %v3770_v13, %v7485_v59  ;;  %v3787_v27 = vrot.slane %v3771_v21, %v7485_v59  ;;  %v1226_v38 = vrot.slane %v7521_v58, %v7468_v48  ;;  %v451_v9 = vpop.xlane.xlu0 %450 }
 0x13e   : > { %v3794_v34 = vrot.slane %v3772_v22, %v7485_v59  ;;  %v1230_v15 = vrot.slane %v7521_v58, %v7471_v49  ;;  %v1234_v24 = vrot.slane %v7521_v58, %v7474_v50  ;;  %v3801_v33 = vrot.slane %v3773_v23, %v7485_v59 }
 0x13f   : > { %6190 = vperm.xlu1 %6939, %v3377_v63   ;;  %v3802_v36 = vcombine.low %v3780_v26, %v3787_v27  ;;  %v1238_v11 = vrot.slane %v7521_v58, %v7477_v54  ;;  %v1242_v40 = vrot.slane %v7521_v58, %v7480_v55  ;;  %v7063_v35 = vpop.eup %7062  ;;  %v3378_v42 = vcombine.low %v1214_v61, %v1218_v62 }
 0x140   : > { %v3379_v43 = vcombine.low %v1222_v52, %v1226_v38  ;;  %v3380_v47 = vcombine.low %v1230_v15, %v1234_v24  ;;  %v6852_v53 = vmul.f32 -1.442695, %v454_v30  ;;  %v764_v17 = vadd.f32 1.0, %v7063_v35 }
 0x141   : > { %v7065_v60 = vpop.eup %7064  ;;  %v3803_v2 = vcombine.low %v3794_v34, %v3801_v33  ;;  %v3810_v5 = vrot.slane %v3802_v36, %v7485_v59  ;;  %v3381_v3 = vcombine.low %v1238_v11, %v1242_v40  ;;  %7070 = vrcp.f32 %v761_v0 }
 0x142   : > { %v7802_v7 = vpop.eup %7066  ;;  %v3388_v20 = vrot.slane %v3378_v42, %v7485_v59  ;;  %v3395_v8 = vrot.slane %v3379_v43, %v7485_v59  ;;  %v3402_v58 = vrot.slane %v3380_v47, %v7485_v59  ;;  %v7807_v12 = vadd.f32 1.0, %v7065_v60 }
 0x143   : > { %v3817_v13 = vrot.slane %v3803_v2, %v7485_v59  ;;  %v3409_v21 = vrot.slane %v3381_v3, %v7485_v59  ;;  %v6851_v22 = vmul.f32 -1.442695, %v451_v9  ;;  %v7811_v61 = vpop.eup %7068  ;;  %7072 = vrcp.f32 %v764_v17 }
 0x144   : > { %v3410_v62 = vcombine.low %v3388_v20, %v3395_v8  ;;  %v1534_v0 = vrot.slane %v7598_v6, %v7459_v39  ;;  %v1538_v52 = vrot.slane %v7598_v6, %v7462_v45  ;;  %7074 = vpow2.f32 %v6852_v53 }
 0x145   : > { %v3818_v63 = vcombine.low %v3810_v5, %v3817_v13  ;;  %v3411_v23 = vcombine.low %v3402_v58, %v3409_v21  ;;  %v1542_v26 = vrot.slane %v7598_v6, %v7465_v46  ;;  %7076 = vpow2.f32 %v6851_v22  ;;  %v460_v5 = vpop.xlane.xlu1 %459 }
 0x146   : > { %v3418_v27 = vrot.slane %v3410_v62, %v7485_v59  ;;  %v1546_v30 = vrot.slane %v7598_v6, %v7468_v48  ;;  %v1550_v34 = vrot.slane %v7598_v6, %v7471_v49  ;;  %v1554_v15 = vrot.slane %v7598_v6, %v7474_v50 }
 0x147   : > { %6217 = vperm.xlu0 %6938, %v3818_v63   ;;  %v3425_v38 = vrot.slane %v3411_v23, %v7485_v59  ;;  %v1558_v24 = vrot.slane %v7598_v6, %v7477_v54  ;;  %v1562_v33 = vrot.slane %v7598_v6, %v7480_v55  ;;  %v3868_v36 = vcombine.low %v1534_v0, %v1538_v52  ;;  %v457_v0 = vpop.xlane.xlu0 %456 }
 0x148   : > { %v3869_v11 = vcombine.low %v1542_v26, %v1546_v30  ;;  %v1246_v40 = vrot.slane %v7541_v32, %v7459_v39  ;;  %v1250_v35 = vrot.slane %v7541_v32, %v7462_v45  ;;  %v3870_v43 = vcombine.low %v1550_v34, %v1554_v15 }
 0x149   : > { %v3426_v42 = vcombine.low %v3418_v27, %v3425_v38  ;;  %v3871_v47 = vcombine.low %v1558_v24, %v1562_v33  ;;  %v1254_v53 = vrot.slane %v7541_v32, %v7465_v46  ;;  %v3878_v60 = vrot.slane %v3868_v36, %v7485_v59 }
 0x14a   : > { %v3885_v17 = vrot.slane %v3869_v11, %v7485_v59  ;;  %v1258_v6 = vrot.slane %v7541_v32, %v7468_v48  ;;  %v1262_v2 = vrot.slane %v7541_v32, %v7471_v49  ;;  %v3892_v3 = vrot.slane %v3870_v43, %v7485_v59 }
 0x14b   : > { %6193 = vperm.xlu1 %6939, %v3426_v42   ;;  %v3899_v20 = vrot.slane %v3871_v47, %v7485_v59  ;;  %v1266_v8 = vrot.slane %v7541_v32, %v7474_v50  ;;  %v1270_v58 = vrot.slane %v7541_v32, %v7477_v54  ;;  %v7849_v9 = vpop.eup %7070  ;;  %v1274_v21 = vrot.slane %v7541_v32, %v7480_v55 }
 0x14c   : > { %v3900_v13 = vcombine.low %v3878_v60, %v3885_v17  ;;  %v3427_v22 = vcombine.low %v1246_v40, %v1250_v35  ;;  %v3428_v62 = vcombine.low %v1254_v53, %v1258_v6  ;;  %v6854_v23 = vmul.f32 -1.442695, %v460_v5 }
 0x14d   : > { %v3901_v52 = vcombine.low %v3892_v3, %v3899_v20  ;;  %v3429_v63 = vcombine.low %v1262_v2, %v1266_v8  ;;  %v6853_v26 = vmul.f32 -1.442695, %v457_v0  ;;  %v7853_v27 = vpop.eup %7072  ;;  %v3430_v34 = vcombine.low %v1270_v58, %v1274_v21 }
 0x14e   : > { %v3908_v30 = vrot.slane %v3900_v13, %v7485_v59  ;;  %v3437_v38 = vrot.slane %v3427_v22, %v7485_v59  ;;  %v3444_v15 = vrot.slane %v3428_v62, %v7485_v59  ;;  %v7075_v24 = vpop.eup %7074  ;;  %7078 = vpow2.f32 %v6854_v23 }
 0x14f   : > { %v3915_v33 = vrot.slane %v3901_v52, %v7485_v59  ;;  %v3451_v32 = vrot.slane %v3429_v63, %v7485_v59  ;;  %v7077_v36 = vpop.eup %7076  ;;  %v3458_v11 = vrot.slane %v3430_v34, %v7485_v59  ;;  %7080 = vpow2.f32 %v6853_v26 }
 0x150   : > { %v3459_v40 = vcombine.low %v3437_v38, %v3444_v15  ;;  %v1598_v35 = vrot.slane %v7614_v25, %v7459_v39  ;;  %7082 = vrcp.f32 %v7807_v12  ;;  %v1602_v43 = vrot.slane %v7614_v25, %v7462_v45  ;;  %v466_v15 = vpop.xlane.xlu1 %465 }
 0x151   : > { %v3916_v42 = vcombine.low %v3908_v30, %v3915_v33  ;;  %v1606_v47 = vrot.slane %v7614_v25, %v7465_v46  ;;  %v766_v53 = vadd.f32 1.0, %v7075_v24  ;;  %v3460_v60 = vcombine.low %v3451_v32, %v3458_v11 }
 0x152   : > { %v3467_v17 = vrot.slane %v3459_v40, %v7485_v59  ;;  %v1610_v6 = vrot.slane %v7614_v25, %v7468_v48  ;;  %v765_v2 = vadd.f32 1.0, %v7077_v36  ;;  %v1614_v5 = vrot.slane %v7614_v25, %v7471_v49 }
 0x153   : > { %6223 = vperm.xlu0 %6938, %v3916_v42   ;;  %v1618_v12 = vrot.slane %v7614_v25, %v7474_v50  ;;  %v1622_v3 = vrot.slane %v7614_v25, %v7477_v54  ;;  %v3474_v20 = vrot.slane %v3460_v60, %v7485_v59  ;;  %v1626_v8 = vrot.slane %v7614_v25, %v7480_v55 }
 0x154   : > { %v3966_v58 = vcombine.low %v1598_v35, %v1602_v43  ;;  %v3967_v13 = vcombine.low %v1606_v47, %v1610_v6  ;;  %v1310_v22 = vrot.slane %v7554_v1, %v7459_v39  ;;  %v1314_v62 = vrot.slane %v7554_v1, %v7462_v45 }
 0x155   : > { %v3968_v21 = vcombine.low %v1614_v5, %v1618_v12  ;;  %v1318_v0 = vrot.slane %v7554_v1, %v7465_v46  ;;  %v3475_v52 = vcombine.low %v3467_v17, %v3474_v20  ;;  %v3969_v63 = vcombine.low %v1622_v3, %v1626_v8  ;;  %v463_v20 = vpop.xlane.xlu0 %462 }
 0x156   : > { %v3976_v23 = vrot.slane %v3966_v58, %v7485_v59  ;;  %v3983_v26 = vrot.slane %v3967_v13, %v7485_v59  ;;  %v1322_v30 = vrot.slane %v7554_v1, %v7468_v48  ;;  %v1326_v34 = vrot.slane %v7554_v1, %v7471_v49 }
 0x157   : > { %v3990_v25 = vrot.slane %v3968_v21, %v7485_v59  ;;  %v1330_v38 = vrot.slane %v7554_v1, %v7474_v50  ;;  %6196 = vperm.xlu1 %6939, %v3475_v52   ;;  %v3997_v24 = vrot.slane %v3969_v63, %v7485_v59  ;;  %v1334_v32 = vrot.slane %v7554_v1, %v7477_v54 }
 0x158   : > { %v3998_v33 = vcombine.low %v3976_v23, %v3983_v26  ;;  %v1338_v36 = vrot.slane %v7554_v1, %v7480_v55  ;;  %v7079_v11 = vpop.eup %7078  ;;  %7084 = vrcp.f32 %v766_v53  ;;  %v3525_v40 = vcombine.low %v1310_v22, %v1314_v62 }
 0x159   : > { %v3526_v35 = vcombine.low %v1318_v0, %v1322_v30  ;;  %v3527_v42 = vcombine.low %v1326_v34, %v1330_v38  ;;  %v7081_v43 = vpop.eup %7080  ;;  %v3999_v47 = vcombine.low %v3990_v25, %v3997_v24  ;;  %v6856_v6 = vmul.f32 -1.442695, %v466_v15 }
 0x15a   : > { %v4006_v60 = vrot.slane %v3998_v33, %v7485_v59  ;;  %v3528_v17 = vcombine.low %v1334_v32, %v1338_v36  ;;  %v7901_v5 = vpop.eup %7082  ;;  %7086 = vrcp.f32 %v765_v2  ;;  %v3535_v12 = vrot.slane %v3525_v40, %v7485_v59 }
 0x15b   : > { %v3542_v3 = vrot.slane %v3526_v35, %v7485_v59  ;;  %v3549_v1 = vrot.slane %v3527_v42, %v7485_v59  ;;  %v768_v53 = vadd.f32 1.0, %v7079_v11  ;;  %v4013_v8 = vrot.slane %v3999_v47, %v7485_v59 }
 0x15c   : > { %v3556_v58 = vrot.slane %v3528_v17, %v7485_v59  ;;  %v6855_v13 = vmul.f32 -1.442695, %v463_v20  ;;  %v767_v21 = vadd.f32 1.0, %v7081_v43  ;;  %v1662_v62 = vrot.slane %v7628_v44, %v7459_v39 }
 0x15d   : > { %v3557_v22 = vcombine.low %v3535_v12, %v3542_v3  ;;  %v1666_v2 = vrot.slane %v7628_v44, %v7462_v45  ;;  %v4014_v0 = vcombine.low %v4006_v60, %v4013_v8  ;;  %7088 = vpow2.f32 %v6856_v6  ;;  %v472_v6 = vpop.xlane.xlu1 %471 }
 0x15e   : > { %v3558_v52 = vcombine.low %v3549_v1, %v3556_v58  ;;  %v1670_v63 = vrot.slane %v7628_v44, %v7465_v46  ;;  %7090 = vpow2.f32 %v6855_v13  ;;  %v1674_v26 = vrot.slane %v7628_v44, %v7468_v48 }
 0x15f   : > { %v3565_v23 = vrot.slane %v3557_v22, %v7485_v59  ;;  %v1678_v25 = vrot.slane %v7628_v44, %v7471_v49  ;;  %6229 = vperm.xlu0 %6938, %v4014_v0   ;;  %v1682_v34 = vrot.slane %v7628_v44, %v7474_v50  ;;  %v1686_v38 = vrot.slane %v7628_v44, %v7477_v54 }
 0x160   : > { %v3572_v30 = vrot.slane %v3558_v52, %v7485_v59  ;;  %v1690_v15 = vrot.slane %v7628_v44, %v7480_v55  ;;  %v4064_v24 = vcombine.low %v1662_v62, %v1666_v2  ;;  %v4065_v33 = vcombine.low %v1670_v63, %v1674_v26 }
 0x161   : > { %v1374_v32 = vrot.slane %v7570_v16, %v7459_v39  ;;  %v1378_v36 = vrot.slane %v7570_v16, %v7462_v45  ;;  %v4066_v40 = vcombine.low %v1678_v25, %v1682_v34  ;;  %v1382_v42 = vrot.slane %v7570_v16, %v7465_v46 }
 0x162   : > { %v3573_v11 = vcombine.low %v3565_v23, %v3572_v30  ;;  %v4067_v35 = vcombine.low %v1686_v38, %v1690_v15  ;;  %v7932_v43 = vpop.eup %7084  ;;  %v4074_v47 = vrot.slane %v4064_v24, %v7485_v59  ;;  %v4081_v44 = vrot.slane %v4065_v33, %v7485_v59  ;;  %v469_v24 = vpop.xlane.xlu0 %468 }
 0x163   : > { %v1386_v60 = vrot.slane %v7570_v16, %v7468_v48  ;;  %v1390_v17 = vrot.slane %v7570_v16, %v7471_v49  ;;  %v4088_v12 = vrot.slane %v4066_v40, %v7485_v59  ;;  %v1394_v1 = vrot.slane %v7570_v16, %v7474_v50 }
 0x164   : > { %6202 = vperm.xlu1 %6939, %v3573_v11   ;;  %v4095_v3 = vrot.slane %v4067_v35, %v7485_v59  ;;  %v1398_v20 = vrot.slane %v7570_v16, %v7477_v54  ;;  %v7946_v8 = vpop.eup %7086  ;;  %v4096_v58 = vcombine.low %v4074_v47, %v4081_v44  ;;  %v1402_v13 = vrot.slane %v7570_v16, %v7480_v55 }
 0x165   : > { %v3623_v22 = vcombine.low %v1374_v32, %v1378_v36  ;;  %v3624_v62 = vcombine.low %v1382_v42, %v1386_v60  ;;  %7092 = vrcp.f32 %v768_v53  ;;  %v3625_v0 = vcombine.low %v1390_v17, %v1394_v1 }
 0x166   : > { %v4097_v2 = vcombine.low %v4088_v12, %v4095_v3  ;;  %v6858_v52 = vmul.f32 -1.442695, %v472_v6  ;;  %v4104_v63 = vrot.slane %v4096_v58, %v7485_v59  ;;  %v3626_v23 = vcombine.low %v1398_v20, %v1402_v13 }
 0x167   : > { %v3633_v26 = vrot.slane %v3623_v22, %v7485_v59  ;;  %v3640_v25 = vrot.slane %v3624_v62, %v7485_v59  ;;  %v7089_v30 = vpop.eup %7088  ;;  %7094 = vrcp.f32 %v767_v21  ;;  %v3647_v38 = vrot.slane %v3625_v0, %v7485_v59 }
 0x168   : > { %v4111_v34 = vrot.slane %v4097_v2, %v7485_v59  ;;  %v7091_v16 = vpop.eup %7090  ;;  %v3654_v15 = vrot.slane %v3626_v23, %v7485_v59  ;;  %7096 = vpow2.f32 %v6858_v52  ;;  %v1726_v33 = vrot.slane %v7650_v18, %v7459_v39 }
 0x169   : > { %v3655_v53 = vcombine.low %v3633_v26, %v3640_v25  ;;  %v6857_v36 = vmul.f32 -1.442695, %v469_v24  ;;  %v1730_v11 = vrot.slane %v7650_v18, %v7462_v45  ;;  %v1734_v21 = vrot.slane %v7650_v18, %v7465_v46 }
 0x16a   : > { %v4112_v32 = vcombine.low %v4104_v63, %v4111_v34  ;;  %v770_v40 = vadd.f32 1.0, %v7089_v30  ;;  %v3656_v35 = vcombine.low %v3647_v38, %v3654_v15  ;;  %v1738_v47 = vrot.slane %v7650_v18, %v7468_v48 }
 0x16b   : > { %v3663_v42 = vrot.slane %v3655_v53, %v7485_v59  ;;  %v769_v44 = vadd.f32 1.0, %v7091_v16  ;;  %v1742_v60 = vrot.slane %v7650_v18, %v7471_v49  ;;  %v1746_v17 = vrot.slane %v7650_v18, %v7474_v50 }
 0x16c   : > { %6235 = vperm.xlu0 %6938, %v4112_v32   ;;  %v1750_v6 = vrot.slane %v7650_v18, %v7477_v54  ;;  %v3670_v12 = vrot.slane %v3656_v35, %v7485_v59  ;;  %v1754_v3 = vrot.slane %v7650_v18, %v7480_v55  ;;  %v4162_v1 = vcombine.low %v1726_v33, %v1730_v11  ;;  %v478_v11 = vpop.xlane.xlu1 %477 }
 0x16d   : > { %v4163_v20 = vcombine.low %v1734_v21, %v1738_v47  ;;  %v4164_v58 = vcombine.low %v1742_v60, %v1746_v17  ;;  %v1438_v13 = vrot.slane %v7587_v41, %v7459_v39  ;;  %v1442_v22 = vrot.slane %v7587_v41, %v7462_v45 }
 0x16e   : > { %v1446_v62 = vrot.slane %v7587_v41, %v7465_v46  ;;  %v3671_v2 = vcombine.low %v3663_v42, %v3670_v12  ;;  %v4165_v0 = vcombine.low %v1750_v6, %v1754_v3  ;;  %v4172_v52 = vrot.slane %v4162_v1, %v7485_v59  ;;  %v475_v12 = vpop.xlane.xlu0 %474 }
 0x16f   : > { %v4179_v63 = vrot.slane %v4163_v20, %v7485_v59  ;;  %v7982_v23 = vpop.eup %7092  ;;  %v4186_v18 = vrot.slane %v4164_v58, %v7485_v59  ;;  %v1450_v26 = vrot.slane %v7587_v41, %v7468_v48  ;;  %v1454_v25 = vrot.slane %v7587_v41, %v7471_v49 }
 0x170   : > { %v1458_v30 = vrot.slane %v7587_v41, %v7474_v50  ;;  %6208 = vperm.xlu1 %6939, %v3671_v2   ;;  %v4193_v34 = vrot.slane %v4165_v0, %v7485_v59  ;;  %v1462_v16 = vrot.slane %v7587_v41, %v7477_v54  ;;  %v1466_v15 = vrot.slane %v7587_v41, %v7480_v55 }
 0x171   : > { %v4194_v38 = vcombine.low %v4172_v52, %v4179_v63  ;;  %v7996_v53 = vpop.eup %7094  ;;  %7098 = vpow2.f32 %v6857_v36  ;;  %v3721_v24 = vcombine.low %v1438_v13, %v1442_v22  ;;  %v3722_v33 = vcombine.low %v1446_v62, %v1450_v26 }
 0x172   : > { %v3723_v32 = vcombine.low %v1454_v25, %v1458_v30  ;;  %v7097_v21 = vpop.eup %7096  ;;  %v4195_v35 = vcombine.low %v4186_v18, %v4193_v34  ;;  %v3724_v47 = vcombine.low %v1462_v16, %v1466_v15  ;;  %v6860_v60 = vmul.f32 -1.442695, %v478_v11 }
 0x173   : > { %v4202_v42 = vrot.slane %v4194_v38, %v7485_v59  ;;  %7100 = vrcp.f32 %v770_v40  ;;  %v3731_v17 = vrot.slane %v3721_v24, %v7485_v59  ;;  %v3738_v6 = vrot.slane %v3722_v33, %v7485_v59 }
 0x174   : > { %v3745_v41 = vrot.slane %v3723_v32, %v7485_v59  ;;  %7102 = vrcp.f32 %v769_v44  ;;  %v4209_v36 = vrot.slane %v4195_v35, %v7485_v59  ;;  %v3752_v3 = vrot.slane %v3724_v47, %v7485_v59 }
 0x175   : > { %v6859_v1 = vmul.f32 -1.442695, %v475_v12  ;;  %v8004_v20 = vadd.f32 1.0, %v7097_v21  ;;  %v3753_v58 = vcombine.low %v3731_v17, %v3738_v6  ;;  %v1790_v13 = vrot.slane %v7662_v51, %v7459_v39 }
 0x176   : > { %v1794_v40 = vrot.slane %v7662_v51, %v7462_v45  ;;  %v4210_v22 = vcombine.low %v4202_v42, %v4209_v36  ;;  %v3754_v62 = vcombine.low %v3745_v41, %v3752_v3  ;;  %7104 = vpow2.f32 %v6860_v60 }
 0x177   : > { %v1798_v44 = vrot.slane %v7662_v51, %v7465_v46  ;;  %v3761_v2 = vrot.slane %v3753_v58, %v7485_v59  ;;  %7106 = vpow2.f32 %v6859_v1  ;;  %v1802_v0 = vrot.slane %v7662_v51, %v7468_v48  ;;  %v484_v58 = vpop.xlane.xlu1 %483 }
 0x178   : > { %v1806_v52 = vrot.slane %v7662_v51, %v7471_v49  ;;  %6241 = vperm.xlu0 %6938, %v4210_v22   ;;  %v3768_v63 = vrot.slane %v3754_v62, %v7485_v59  ;;  %v1810_v18 = vrot.slane %v7662_v51, %v7474_v50  ;;  %v1814_v26 = vrot.slane %v7662_v51, %v7477_v54 }
 0x179   : > { %v1818_v25 = vrot.slane %v7662_v51, %v7480_v55  ;;  %v4260_v30 = vcombine.low %v1790_v13, %v1794_v40  ;;  %v4261_v34 = vcombine.low %v1798_v44, %v1802_v0  ;;  %v1502_v38 = vrot.slane %v7601_v14, %v7459_v39  ;;  %v481_v13 = vpop.xlane.xlu0 %480 }
 0x17a   : > { %v1506_v16 = vrot.slane %v7601_v14, %v7462_v45  ;;  %v3769_v15 = vcombine.low %v3761_v2, %v3768_v63  ;;  %v4262_v24 = vcombine.low %v1806_v52, %v1810_v18  ;;  %v1510_v32 = vrot.slane %v7601_v14, %v7465_v46 }
 0x17b   : > { %v4263_v33 = vcombine.low %v1814_v26, %v1818_v25  ;;  %v7099_v11 = vpop.eup %7098  ;;  %v4270_v21 = vrot.slane %v4260_v30, %v7485_v59  ;;  %v4277_v35 = vrot.slane %v4261_v34, %v7485_v59  ;;  %v1514_v51 = vrot.slane %v7601_v14, %v7468_v48 }
 0x17c   : > { %v1518_v42 = vrot.slane %v7601_v14, %v7471_v49  ;;  %6214 = vperm.xlu1 %6939, %v3769_v15   ;;  %v4284_v47 = vrot.slane %v4262_v24, %v7485_v59  ;;  %v1522_v17 = vrot.slane %v7601_v14, %v7474_v50  ;;  %v1526_v6 = vrot.slane %v7601_v14, %v7477_v54 }
 0x17d   : > { %v4291_v60 = vrot.slane %v4263_v33, %v7485_v59  ;;  %v8042_v41 = vpop.eup %7100  ;;  %v4292_v12 = vcombine.low %v4270_v21, %v4277_v35  ;;  %v1530_v36 = vrot.slane %v7601_v14, %v7480_v55  ;;  %v3819_v3 = vcombine.low %v1502_v38, %v1506_v16 }
 0x17e   : > { %v3820_v1 = vcombine.low %v1510_v32, %v1514_v51  ;;  %v8046_v40 = vpop.eup %7102  ;;  %v3821_v62 = vcombine.low %v1518_v42, %v1522_v17  ;;  %v6862_v44 = vmul.f32 -1.442695, %v484_v58  ;;  %v6861_v2 = vmul.f32 -1.442695, %v481_v13 }
 0x17f   : > { %v4293_v22 = vcombine.low %v4284_v47, %v4291_v60  ;;  %v4300_v0 = vrot.slane %v4292_v12, %v7485_v59  ;;  %v3822_v52 = vcombine.low %v1526_v6, %v1530_v36  ;;  %v3829_v63 = vrot.slane %v3819_v3, %v7485_v59 }
 0x180   : > { %v3836_v18 = vrot.slane %v3820_v1, %v7485_v59  ;;  %v7105_v26 = vpop.eup %7104  ;;  %v3843_v25 = vrot.slane %v3821_v62, %v7485_v59  ;;  %7108 = vpow2.f32 %v6862_v44  ;;  %v771_v34 = vadd.f32 1.0, %v7099_v11 }
 0x181   : > { %v4307_v14 = vrot.slane %v4293_v22, %v7485_v59  ;;  %v7107_v30 = vpop.eup %7106  ;;  %v3850_v38 = vrot.slane %v3822_v52, %v7485_v59  ;;  %v1854_v15 = vrot.slane %v7708_v31, %v7459_v39  ;;  %7110 = vpow2.f32 %v6861_v2 }
 0x182   : > { %v3851_v16 = vcombine.low %v3829_v63, %v3836_v18  ;;  %v1858_v33 = vrot.slane %v7708_v31, %v7462_v45  ;;  %v1862_v32 = vrot.slane %v7708_v31, %v7465_v46  ;;  %7112 = vrcp.f32 %v8004_v20 }
 0x183   : > { %v4308_v24 = vcombine.low %v4300_v0, %v4307_v14  ;;  %v3852_v21 = vcombine.low %v3843_v25, %v3850_v38  ;;  %v1866_v11 = vrot.slane %v7708_v31, %v7468_v48  ;;  %v774_v51 = vadd.f32 1.0, %v7105_v26 }
 0x184   : > { %v3859_v35 = vrot.slane %v3851_v16, %v7485_v59  ;;  %v1870_v42 = vrot.slane %v7708_v31, %v7471_v49  ;;  %v1874_v47 = vrot.slane %v7708_v31, %v7474_v50  ;;  %v1878_v60 = vrot.slane %v7708_v31, %v7477_v54 }
 0x185   : > { %6247 = vperm.xlu0 %6938, %v4308_v24   ;;  %v3866_v17 = vrot.slane %v3852_v21, %v7485_v59  ;;  %v1882_v20 = vrot.slane %v7708_v31, %v7480_v55  ;;  %v4358_v6 = vcombine.low %v1854_v15, %v1858_v33  ;;  %v4359_v12 = vcombine.low %v1862_v32, %v1866_v11 }
 0x186   : > { %v4360_v36 = vcombine.low %v1870_v42, %v1874_v47  ;;  %v1566_v3 = vrot.slane %v7625_v37, %v7459_v39  ;;  %v1570_v1 = vrot.slane %v7625_v37, %v7462_v45  ;;  %v1574_v58 = vrot.slane %v7625_v37, %v7465_v46 }
 0x187   : > { %v3867_v13 = vcombine.low %v3859_v35, %v3866_v17  ;;  %v4361_v22 = vcombine.low %v1878_v60, %v1882_v20  ;;  %v4368_v62 = vrot.slane %v4358_v6, %v7485_v59  ;;  %v4375_v44 = vrot.slane %v4359_v12, %v7485_v59  ;;  %v490_v20 = vpop.xlane.xlu1 %489 }
 0x188   : > { %v4382_v31 = vrot.slane %v4360_v36, %v7485_v59  ;;  %v1578_v2 = vrot.slane %v7625_v37, %v7468_v48  ;;  %v1582_v0 = vrot.slane %v7625_v37, %v7471_v49  ;;  %v1586_v52 = vrot.slane %v7625_v37, %v7474_v50 }
 0x189   : > { %6220 = vperm.xlu1 %6939, %v3867_v13   ;;  %v4389_v63 = vrot.slane %v4361_v22, %v7485_v59  ;;  %v4390_v18 = vcombine.low %v4368_v62, %v4375_v44  ;;  %v1590_v26 = vrot.slane %v7625_v37, %v7477_v54  ;;  %v1594_v14 = vrot.slane %v7625_v37, %v7480_v55  ;;  %v487_v13 = vpop.xlane.xlu0 %486 }
 0x18a   : > { %v7109_v25 = vpop.eup %7108  ;;  %v773_v38 = vadd.f32 1.0, %v7107_v30  ;;  %v3917_v16 = vcombine.low %v1566_v3, %v1570_v1  ;;  %v3918_v15 = vcombine.low %v1574_v58, %v1578_v2  ;;  %v3919_v24 = vcombine.low %v1582_v0, %v1586_v52 }
 0x18b   : > { %7114 = vrcp.f32 %v771_v34  ;;  %v4391_v33 = vcombine.low %v4382_v31, %v4389_v63  ;;  %v4398_v32 = vrot.slane %v4390_v18, %v7485_v59  ;;  %v3920_v21 = vcombine.low %v1590_v26, %v1594_v14  ;;  %v7111_v35 = vpop.eup %7110 }
 0x18c   : > { %v776_v11 = vadd.f32 1.0, %v7109_v25  ;;  %v3927_v42 = vrot.slane %v3917_v16, %v7485_v59  ;;  %v3934_v47 = vrot.slane %v3918_v15, %v7485_v59  ;;  %v3941_v60 = vrot.slane %v3919_v24, %v7485_v59  ;;  %v8097_v17 = vpop.eup %7112 }
 0x18d   : > { %7116 = vrcp.f32 %v774_v51  ;;  %v4405_v37 = vrot.slane %v4391_v33, %v7485_v59  ;;  %v3948_v30 = vrot.slane %v3920_v21, %v7485_v59  ;;  %v1918_v6 = vrot.slane %v7754_v29, %v7459_v39 }
 0x18e   : > { %7118 = vrcp.f32 %v773_v38  ;;  %v3949_v34 = vcombine.low %v3927_v42, %v3934_v47  ;;  %v1922_v12 = vrot.slane %v7754_v29, %v7462_v45  ;;  %v775_v36 = vadd.f32 1.0, %v7111_v35 }
 0x18f   : > { %v4406_v3 = vcombine.low %v4398_v32, %v4405_v37  ;;  %v3950_v1 = vcombine.low %v3941_v60, %v3948_v30  ;;  %v1926_v58 = vrot.slane %v7754_v29, %v7465_v46  ;;  %7120 = vrcp.f32 %v776_v11  ;;  %v496_v32 = vpop.xlane.xlu1 %495 }
 0x190   : > { %v3957_v51 = vrot.slane %v3949_v34, %v7485_v59  ;;  %v1930_v22 = vrot.slane %v7754_v29, %v7468_v48  ;;  %v1934_v62 = vrot.slane %v7754_v29, %v7471_v49  ;;  %v1938_v31 = vrot.slane %v7754_v29, %v7474_v50 }
 0x191   : > { %6253 = vperm.xlu0 %6938, %v4406_v3   ;;  %v3964_v44 = vrot.slane %v3950_v1, %v7485_v59  ;;  %v1942_v2 = vrot.slane %v7754_v29, %v7477_v54  ;;  %v1946_v0 = vrot.slane %v7754_v29, %v7480_v55  ;;  %v4456_v52 = vcombine.low %v1918_v6, %v1922_v12  ;;  %v493_v6 = vpop.xlane.xlu0 %492 }
 0x192   : > { %v4457_v63 = vcombine.low %v1926_v58, %v1930_v22  ;;  %v1630_v18 = vrot.slane %v7632_v57, %v7459_v39  ;;  %v1634_v26 = vrot.slane %v7632_v57, %v7462_v45  ;;  %v4458_v25 = vcombine.low %v1934_v62, %v1938_v31 }
 0x193   : > { %v3965_v14 = vcombine.low %v3957_v51, %v3964_v44  ;;  %v4459_v38 = vcombine.low %v1942_v2, %v1946_v0  ;;  %v1638_v16 = vrot.slane %v7632_v57, %v7465_v46  ;;  %v4466_v15 = vrot.slane %v4456_v52, %v7485_v59 }
 0x194   : > { %v4473_v24 = vrot.slane %v4457_v63, %v7485_v59  ;;  %v1642_v29 = vrot.slane %v7632_v57, %v7468_v48  ;;  %v1646_v33 = vrot.slane %v7632_v57, %v7471_v49  ;;  %v4480_v35 = vrot.slane %v4458_v25, %v7485_v59 }
 0x195   : > { %v8131_v21 = vpop.eup %7114  ;;  %6226 = vperm.xlu1 %6939, %v3965_v14   ;;  %v4487_v11 = vrot.slane %v4459_v38, %v7485_v59  ;;  %v1650_v42 = vrot.slane %v7632_v57, %v7474_v50  ;;  %v1654_v47 = vrot.slane %v7632_v57, %v7477_v54  ;;  %v1658_v37 = vrot.slane %v7632_v57, %v7480_v55 }
 0x196   : > { %v4488_v60 = vcombine.low %v4466_v15, %v4473_v24  ;;  %v4015_v30 = vcombine.low %v1630_v18, %v1634_v26  ;;  %v4016_v34 = vcombine.low %v1638_v16, %v1642_v29  ;;  %v6866_v58 = vmul.f32 -1.442695, %v496_v32 }
 0x197   : > { %v8141_v12 = vpop.eup %7116  ;;  %v4489_v3 = vcombine.low %v4480_v35, %v4487_v11  ;;  %v4017_v1 = vcombine.low %v1646_v33, %v1650_v42  ;;  %v6865_v51 = vmul.f32 -1.442695, %v493_v6  ;;  %v4018_v44 = vcombine.low %v1654_v47, %v1658_v37 }
 0x198   : > { %v8143_v22 = vpop.eup %7118  ;;  %v4496_v62 = vrot.slane %v4488_v60, %v7485_v59  ;;  %v4025_v31 = vrot.slane %v4015_v30, %v7485_v59  ;;  %v4032_v2 = vrot.slane %v4016_v34, %v7485_v59  ;;  %v6864_v0 = vmul.f32 -1.442695, %v490_v20 }
 0x199   : > { %v4503_v57 = vrot.slane %v4489_v3, %v7485_v59  ;;  %v4039_v52 = vrot.slane %v4017_v1, %v7485_v59  ;;  %7122 = vpow2.f32 %v6866_v58  ;;  %v8150_v63 = vpop.eup %7120  ;;  %v4046_v18 = vrot.slane %v4018_v44, %v7485_v59  ;;  %v502_v58 = vpop.xlane.xlu1 %501 }
 0x19a   : > { %v4047_v26 = vcombine.low %v4025_v31, %v4032_v2  ;;  %7124 = vpow2.f32 %v6865_v51  ;;  %v1982_v14 = vrot.slane %v7811_v61, %v7459_v39  ;;  %v6863_v25 = vmul.f32 -1.442695, %v487_v13 }
 0x19b   : > { %v4504_v38 = vcombine.low %v4496_v62, %v4503_v57  ;;  %v1986_v16 = vrot.slane %v7811_v61, %v7462_v45  ;;  %v1990_v20 = vrot.slane %v7811_v61, %v7465_v46  ;;  %7126 = vrcp.f32 %v775_v36 }
 0x19c   : > { %v4048_v15 = vcombine.low %v4039_v52, %v4046_v18  ;;  %v4055_v24 = vrot.slane %v4047_v26, %v7485_v59  ;;  %v1994_v29 = vrot.slane %v7811_v61, %v7468_v48  ;;  %7128 = vpow2.f32 %v6864_v0 }
 0x19d   : > { %6259 = vperm.xlu0 %6938, %v4504_v38   ;;  %v1998_v33 = vrot.slane %v7811_v61, %v7471_v49  ;;  %v2002_v13 = vrot.slane %v7811_v61, %v7474_v50  ;;  %v2006_v32 = vrot.slane %v7811_v61, %v7477_v54  ;;  %v2010_v36 = vrot.slane %v7811_v61, %v7480_v55 }
 0x19e   : > { %v4062_v35 = vrot.slane %v4048_v15, %v7485_v59  ;;  %v4554_v11 = vcombine.low %v1982_v14, %v1986_v16  ;;  %v4555_v42 = vcombine.low %v1990_v20, %v1994_v29  ;;  %v1694_v60 = vrot.slane %v7654_v56, %v7459_v39 }
 0x19f   : > { %v4556_v47 = vcombine.low %v1998_v33, %v2002_v13  ;;  %v1698_v37 = vrot.slane %v7654_v56, %v7462_v45  ;;  %v1702_v30 = vrot.slane %v7654_v56, %v7465_v46  ;;  %v4557_v6 = vcombine.low %v2006_v32, %v2010_v36 }
 0x1a0   : > { %v4063_v34 = vcombine.low %v4055_v24, %v4062_v35  ;;  %v4564_v3 = vrot.slane %v4554_v11, %v7485_v59  ;;  %v4571_v1 = vrot.slane %v4555_v42, %v7485_v59  ;;  %v1706_v51 = vrot.slane %v7654_v56, %v7468_v48  ;;  %v499_v35 = vpop.xlane.xlu0 %498 }
 0x1a1   : > { %v4578_v61 = vrot.slane %v4556_v47, %v7485_v59  ;;  %v1710_v62 = vrot.slane %v7654_v56, %v7471_v49  ;;  %v1714_v44 = vrot.slane %v7654_v56, %v7474_v50  ;;  %v4585_v31 = vrot.slane %v4557_v6, %v7485_v59 }
 0x1a2   : > { %6232 = vperm.xlu1 %6939, %v4063_v34   ;;  %v4586_v2 = vcombine.low %v4564_v3, %v4571_v1  ;;  %v1718_v0 = vrot.slane %v7654_v56, %v7477_v54  ;;  %v1722_v57 = vrot.slane %v7654_v56, %v7480_v55  ;;  %v4113_v18 = vcombine.low %v1694_v60, %v1698_v37 }
 0x1a3   : > { %v7123_v52 = vpop.eup %7122  ;;  %v4114_v26 = vcombine.low %v1702_v30, %v1706_v51  ;;  %v4115_v14 = vcombine.low %v1710_v62, %v1714_v44  ;;  %v6868_v38 = vmul.f32 -1.442695, %v502_v58  ;;  %v4587_v15 = vcombine.low %v4578_v61, %v4585_v31 }
 0x1a4   : > { %v7125_v16 = vpop.eup %7124  ;;  %v780_v20 = vadd.f32 1.0, %v7123_v52  ;;  %v4594_v24 = vrot.slane %v4586_v2, %v7485_v59  ;;  %v4116_v29 = vcombine.low %v1718_v0, %v1722_v57  ;;  %7130 = vpow2.f32 %v6863_v25 }
 0x1a5   : > { %v4123_v33 = vrot.slane %v4113_v18, %v7485_v59  ;;  %v4130_v13 = vrot.slane %v4114_v26, %v7485_v59  ;;  %v4137_v32 = vrot.slane %v4115_v14, %v7485_v59  ;;  %v8195_v56 = vpop.eup %7126  ;;  %v8197_v36 = vadd.f32 1.0, %v7125_v16 }
 0x1a6   : > { %v4601_v11 = vrot.slane %v4587_v15, %v7485_v59  ;;  %v4144_v42 = vrot.slane %v4116_v29, %v7485_v59  ;;  %v6867_v47 = vmul.f32 -1.442695, %v499_v35  ;;  %v8201_v60 = vpop.eup %7128  ;;  %7132 = vrcp.f32 %v780_v20 }
 0x1a7   : > { %v4145_v25 = vcombine.low %v4123_v33, %v4130_v13  ;;  %v2046_v37 = vrot.slane %v7853_v27, %v7459_v39  ;;  %v2050_v30 = vrot.slane %v7853_v27, %v7462_v45  ;;  %7134 = vpow2.f32 %v6868_v38 }
 0x1a8   : > { %v4602_v34 = vcombine.low %v4594_v24, %v4601_v11  ;;  %v4146_v6 = vcombine.low %v4137_v32, %v4144_v42  ;;  %v2054_v3 = vrot.slane %v7853_v27, %v7465_v46  ;;  %7136 = vpow2.f32 %v6867_v47  ;;  %v508_v24 = vpop.xlane.xlu1 %507 }
 0x1a9   : > { %v4153_v1 = vrot.slane %v4145_v25, %v7485_v59  ;;  %v2058_v58 = vrot.slane %v7853_v27, %v7468_v48  ;;  %v2062_v61 = vrot.slane %v7853_v27, %v7471_v49  ;;  %v2066_v62 = vrot.slane %v7853_v27, %v7474_v50 }
 0x1aa   : > { %6265 = vperm.xlu0 %6938, %v4602_v34   ;;  %v4160_v51 = vrot.slane %v4146_v6, %v7485_v59  ;;  %v2070_v44 = vrot.slane %v7853_v27, %v7477_v54  ;;  %v2074_v31 = vrot.slane %v7853_v27, %v7480_v55  ;;  %v4652_v2 = vcombine.low %v2046_v37, %v2050_v30  ;;  %v505_v37 = vpop.xlane.xlu0 %504 }
 0x1ab   : > { %v4653_v0 = vcombine.low %v2054_v3, %v2058_v58  ;;  %v1758_v57 = vrot.slane %v7672_v4, %v7459_v39  ;;  %v1762_v52 = vrot.slane %v7672_v4, %v7462_v45  ;;  %v4654_v26 = vcombine.low %v2062_v61, %v2066_v62 }
 0x1ac   : > { %v4161_v18 = vcombine.low %v4153_v1, %v4160_v51  ;;  %v4655_v14 = vcombine.low %v2070_v44, %v2074_v31  ;;  %v1766_v38 = vrot.slane %v7672_v4, %v7465_v46  ;;  %v4662_v16 = vrot.slane %v4652_v2, %v7485_v59 }
 0x1ad   : > { %v4669_v20 = vrot.slane %v4653_v0, %v7485_v59  ;;  %v1770_v27 = vrot.slane %v7672_v4, %v7468_v48  ;;  %v1774_v15 = vrot.slane %v7672_v4, %v7471_v49  ;;  %v4676_v29 = vrot.slane %v4654_v26, %v7485_v59 }
 0x1ae   : > { %6238 = vperm.xlu1 %6939, %v4161_v18   ;;  %v4683_v33 = vrot.slane %v4655_v14, %v7485_v59  ;;  %v1778_v13 = vrot.slane %v7672_v4, %v7474_v50  ;;  %v1782_v32 = vrot.slane %v7672_v4, %v7477_v54  ;;  %v8239_v35 = vpop.eup %7130  ;;  %v1786_v42 = vrot.slane %v7672_v4, %v7480_v55 }
 0x1af   : > { %v4684_v11 = vcombine.low %v4662_v16, %v4669_v20  ;;  %v4211_v47 = vcombine.low %v1758_v57, %v1762_v52  ;;  %v4212_v25 = vcombine.low %v1766_v38, %v1770_v27  ;;  %v6870_v6 = vmul.f32 -1.442695, %v508_v24 }
 0x1b0   : > { %v4685_v30 = vcombine.low %v4676_v29, %v4683_v33  ;;  %v4213_v34 = vcombine.low %v1774_v15, %v1778_v13  ;;  %v6869_v3 = vmul.f32 -1.442695, %v505_v37  ;;  %v8243_v1 = vpop.eup %7132  ;;  %v4214_v61 = vcombine.low %v1782_v32, %v1786_v42 }
 0x1b1   : > { %v4692_v58 = vrot.slane %v4684_v11, %v7485_v59  ;;  %v4221_v51 = vrot.slane %v4211_v47, %v7485_v59  ;;  %v4228_v62 = vrot.slane %v4212_v25, %v7485_v59  ;;  %v7135_v44 = vpop.eup %7134  ;;  %7138 = vpow2.f32 %v6870_v6 }
 0x1b2   : > { %v4699_v31 = vrot.slane %v4685_v30, %v7485_v59  ;;  %v4235_v4 = vrot.slane %v4213_v34, %v7485_v59  ;;  %v7137_v2 = vpop.eup %7136  ;;  %v4242_v0 = vrot.slane %v4214_v61, %v7485_v59  ;;  %7140 = vpow2.f32 %v6869_v3 }
 0x1b3   : > { %v4243_v57 = vcombine.low %v4221_v51, %v4228_v62  ;;  %v2110_v52 = vrot.slane %v7932_v43, %v7459_v39  ;;  %7142 = vrcp.f32 %v8197_v36  ;;  %v2114_v26 = vrot.slane %v7932_v43, %v7462_v45  ;;  %v514_v62 = vpop.xlane.xlu1 %513 }
 0x1b4   : > { %v4700_v18 = vcombine.low %v4692_v58, %v4699_v31  ;;  %v2118_v14 = vrot.slane %v7932_v43, %v7465_v46  ;;  %v782_v38 = vadd.f32 1.0, %v7135_v44  ;;  %v4244_v16 = vcombine.low %v4235_v4, %v4242_v0 }
 0x1b5   : > { %v4251_v20 = vrot.slane %v4243_v57, %v7485_v59  ;;  %v2122_v27 = vrot.slane %v7932_v43, %v7468_v48  ;;  %v781_v15 = vadd.f32 1.0, %v7137_v2  ;;  %v2126_v24 = vrot.slane %v7932_v43, %v7471_v49 }
 0x1b6   : > { %6271 = vperm.xlu0 %6938, %v4700_v18   ;;  %v2130_v36 = vrot.slane %v7932_v43, %v7474_v50  ;;  %v2134_v29 = vrot.slane %v7932_v43, %v7477_v54  ;;  %v4258_v33 = vrot.slane %v4244_v16, %v7485_v59  ;;  %v2138_v13 = vrot.slane %v7932_v43, %v7480_v55 }
 0x1b7   : > { %v4750_v32 = vcombine.low %v2110_v52, %v2114_v26  ;;  %v4751_v11 = vcombine.low %v2118_v14, %v2122_v27  ;;  %v1822_v47 = vrot.slane %v7750_v10, %v7459_v39  ;;  %v1826_v25 = vrot.slane %v7750_v10, %v7462_v45 }
 0x1b8   : > { %v4752_v42 = vcombine.low %v2126_v24, %v2130_v36  ;;  %v1830_v37 = vrot.slane %v7750_v10, %v7465_v46  ;;  %v4259_v30 = vcombine.low %v4251_v20, %v4258_v33  ;;  %v4753_v34 = vcombine.low %v2134_v29, %v2138_v13  ;;  %v511_v33 = vpop.xlane.xlu0 %510 }
 0x1b9   : > { %v4760_v6 = vrot.slane %v4750_v32, %v7485_v59  ;;  %v4767_v3 = vrot.slane %v4751_v11, %v7485_v59  ;;  %v1834_v58 = vrot.slane %v7750_v10, %v7468_v48  ;;  %v1838_v61 = vrot.slane %v7750_v10, %v7471_v49 }
 0x1ba   : > { %v4774_v43 = vrot.slane %v4752_v42, %v7485_v59  ;;  %v1842_v51 = vrot.slane %v7750_v10, %v7474_v50  ;;  %6244 = vperm.xlu1 %6939, %v4259_v30   ;;  %v4781_v44 = vrot.slane %v4753_v34, %v7485_v59  ;;  %v1846_v4 = vrot.slane %v7750_v10, %v7477_v54 }
 0x1bb   : > { %v4782_v31 = vcombine.low %v4760_v6, %v4767_v3  ;;  %v1850_v2 = vrot.slane %v7750_v10, %v7480_v55  ;;  %v7139_v0 = vpop.eup %7138  ;;  %7144 = vrcp.f32 %v782_v38  ;;  %v4309_v57 = vcombine.low %v1822_v47, %v1826_v25 }
 0x1bc   : > { %v4310_v52 = vcombine.low %v1830_v37, %v1834_v58  ;;  %v4311_v18 = vcombine.low %v1838_v61, %v1842_v51  ;;  %v7141_v26 = vpop.eup %7140  ;;  %v4783_v14 = vcombine.low %v4774_v43, %v4781_v44  ;;  %v6872_v27 = vmul.f32 -1.442695, %v514_v62 }
 0x1bd   : > { %v4790_v16 = vrot.slane %v4782_v31, %v7485_v59  ;;  %v4312_v20 = vcombine.low %v1846_v4, %v1850_v2  ;;  %v8291_v24 = vpop.eup %7142  ;;  %7146 = vrcp.f32 %v781_v15  ;;  %v4319_v36 = vrot.slane %v4309_v57, %v7485_v59 }
 0x1be   : > { %v4326_v29 = vrot.slane %v4310_v52, %v7485_v59  ;;  %v4333_v10 = vrot.slane %v4311_v18, %v7485_v59  ;;  %v784_v38 = vadd.f32 1.0, %v7139_v0  ;;  %v4797_v13 = vrot.slane %v4783_v14, %v7485_v59 }
 0x1bf   : > { %v4340_v32 = vrot.slane %v4312_v20, %v7485_v59  ;;  %v6871_v11 = vmul.f32 -1.442695, %v511_v33  ;;  %v783_v42 = vadd.f32 1.0, %v7141_v26  ;;  %v2174_v25 = vrot.slane %v7982_v23, %v7459_v39 }
 0x1c0   : > { %v4341_v47 = vcombine.low %v4319_v36, %v4326_v29  ;;  %v2178_v15 = vrot.slane %v7982_v23, %v7462_v45  ;;  %v4798_v37 = vcombine.low %v4790_v16, %v4797_v13  ;;  %7148 = vpow2.f32 %v6872_v27  ;;  %v520_v27 = vpop.xlane.xlu1 %519 }
 0x1c1   : > { %v4342_v30 = vcombine.low %v4333_v10, %v4340_v32  ;;  %v2182_v34 = vrot.slane %v7982_v23, %v7465_v46  ;;  %7150 = vpow2.f32 %v6871_v11  ;;  %v2186_v3 = vrot.slane %v7982_v23, %v7468_v48 }
 0x1c2   : > { %v4349_v6 = vrot.slane %v4341_v47, %v7485_v59  ;;  %v2190_v43 = vrot.slane %v7982_v23, %v7471_v49  ;;  %6277 = vperm.xlu0 %6938, %v4798_v37   ;;  %v2194_v61 = vrot.slane %v7982_v23, %v7474_v50  ;;  %v2198_v51 = vrot.slane %v7982_v23, %v7477_v54 }
 0x1c3   : > { %v4356_v58 = vrot.slane %v4342_v30, %v7485_v59  ;;  %v2202_v62 = vrot.slane %v7982_v23, %v7480_v55  ;;  %v4848_v44 = vcombine.low %v2174_v25, %v2178_v15  ;;  %v4849_v31 = vcombine.low %v2182_v34, %v2186_v3 }
 0x1c4   : > { %v1886_v4 = vrot.slane %v7802_v7, %v7459_v39  ;;  %v1890_v2 = vrot.slane %v7802_v7, %v7462_v45  ;;  %v4850_v57 = vcombine.low %v2190_v43, %v2194_v61  ;;  %v1894_v18 = vrot.slane %v7802_v7, %v7465_v46 }
 0x1c5   : > { %v4357_v0 = vcombine.low %v4349_v6, %v4356_v58  ;;  %v4851_v52 = vcombine.low %v2198_v51, %v2202_v62  ;;  %v8322_v26 = vpop.eup %7144  ;;  %v4858_v14 = vrot.slane %v4848_v44, %v7485_v59  ;;  %v4865_v23 = vrot.slane %v4849_v31, %v7485_v59  ;;  %v517_v44 = vpop.xlane.xlu0 %516 }
 0x1c6   : > { %v1898_v16 = vrot.slane %v7802_v7, %v7468_v48  ;;  %v1902_v20 = vrot.slane %v7802_v7, %v7471_v49  ;;  %v4872_v36 = vrot.slane %v4850_v57, %v7485_v59  ;;  %v1906_v10 = vrot.slane %v7802_v7, %v7474_v50 }
 0x1c7   : > { %6250 = vperm.xlu1 %6939, %v4357_v0   ;;  %v4879_v29 = vrot.slane %v4851_v52, %v7485_v59  ;;  %v1910_v33 = vrot.slane %v7802_v7, %v7477_v54  ;;  %v8336_v13 = vpop.eup %7146  ;;  %v4880_v32 = vcombine.low %v4858_v14, %v4865_v23  ;;  %v1914_v11 = vrot.slane %v7802_v7, %v7480_v55 }
 0x1c8   : > { %v4407_v47 = vcombine.low %v1886_v4, %v1890_v2  ;;  %v4408_v25 = vcombine.low %v1894_v18, %v1898_v16  ;;  %7152 = vrcp.f32 %v784_v38  ;;  %v4409_v37 = vcombine.low %v1902_v20, %v1906_v10 }
 0x1c9   : > { %v4881_v15 = vcombine.low %v4872_v36, %v4879_v29  ;;  %v6874_v30 = vmul.f32 -1.442695, %v520_v27  ;;  %v4888_v34 = vrot.slane %v4880_v32, %v7485_v59  ;;  %v4410_v6 = vcombine.low %v1910_v33, %v1914_v11 }
 0x1ca   : > { %v4417_v3 = vrot.slane %v4407_v47, %v7485_v59  ;;  %v4424_v43 = vrot.slane %v4408_v25, %v7485_v59  ;;  %v7149_v58 = vpop.eup %7148  ;;  %7154 = vrcp.f32 %v783_v42  ;;  %v4431_v51 = vrot.slane %v4409_v37, %v7485_v59 }
 0x1cb   : > { %v4895_v61 = vrot.slane %v4881_v15, %v7485_v59  ;;  %v7151_v7 = vpop.eup %7150  ;;  %v4438_v62 = vrot.slane %v4410_v6, %v7485_v59  ;;  %7156 = vpow2.f32 %v6874_v30  ;;  %v2238_v31 = vrot.slane %v8042_v41, %v7459_v39 }
 0x1cc   : > { %v4439_v38 = vcombine.low %v4417_v3, %v4424_v43  ;;  %v6873_v2 = vmul.f32 -1.442695, %v517_v44  ;;  %v2242_v0 = vrot.slane %v8042_v41, %v7462_v45  ;;  %v2246_v42 = vrot.slane %v8042_v41, %v7465_v46 }
 0x1cd   : > { %v4896_v4 = vcombine.low %v4888_v34, %v4895_v61  ;;  %v786_v57 = vadd.f32 1.0, %v7149_v58  ;;  %v4440_v52 = vcombine.low %v4431_v51, %v4438_v62  ;;  %v2250_v14 = vrot.slane %v8042_v41, %v7468_v48  ;;  %v523_v61 = vpop.xlane.xlu0 %522 }
 0x1ce   : > { %v4447_v18 = vrot.slane %v4439_v38, %v7485_v59  ;;  %v785_v23 = vadd.f32 1.0, %v7151_v7  ;;  %v2254_v16 = vrot.slane %v8042_v41, %v7471_v49  ;;  %v2258_v20 = vrot.slane %v8042_v41, %v7474_v50 }
 0x1cf   : > { %6283 = vperm.xlu0 %6938, %v4896_v4   ;;  %v2262_v27 = vrot.slane %v8042_v41, %v7477_v54  ;;  %v4454_v36 = vrot.slane %v4440_v52, %v7485_v59  ;;  %v2266_v29 = vrot.slane %v8042_v41, %v7480_v55  ;;  %v4946_v10 = vcombine.low %v2238_v31, %v2242_v0 }
 0x1d0   : > { %v4947_v33 = vcombine.low %v2246_v42, %v2250_v14  ;;  %v4948_v32 = vcombine.low %v2254_v16, %v2258_v20  ;;  %v1950_v11 = vrot.slane %v7849_v9, %v7459_v39  ;;  %v1954_v47 = vrot.slane %v7849_v9, %v7462_v45 }
 0x1d1   : > { %v1958_v25 = vrot.slane %v7849_v9, %v7465_v46  ;;  %v4455_v15 = vcombine.low %v4447_v18, %v4454_v36  ;;  %v4949_v37 = vcombine.low %v2262_v27, %v2266_v29  ;;  %v4956_v30 = vrot.slane %v4946_v10, %v7485_v59 }
 0x1d2   : > { %v4963_v34 = vrot.slane %v4947_v33, %v7485_v59  ;;  %v8372_v6 = vpop.eup %7152  ;;  %v4970_v41 = vrot.slane %v4948_v32, %v7485_v59  ;;  %v1962_v3 = vrot.slane %v7849_v9, %v7468_v48  ;;  %v1966_v43 = vrot.slane %v7849_v9, %v7471_v49 }
 0x1d3   : > { %v1970_v58 = vrot.slane %v7849_v9, %v7474_v50  ;;  %6256 = vperm.xlu1 %6939, %v4455_v15   ;;  %v4977_v51 = vrot.slane %v4949_v37, %v7485_v59  ;;  %v1974_v62 = vrot.slane %v7849_v9, %v7477_v54  ;;  %v1978_v38 = vrot.slane %v7849_v9, %v7480_v55 }
 0x1d4   : > { %v4978_v7 = vcombine.low %v4956_v30, %v4963_v34  ;;  %v8386_v44 = vpop.eup %7154  ;;  %7158 = vpow2.f32 %v6873_v2  ;;  %v4505_v31 = vcombine.low %v1950_v11, %v1954_v47  ;;  %v4506_v4 = vcombine.low %v1958_v25, %v1962_v3 }
 0x1d5   : > { %v4507_v0 = vcombine.low %v1966_v43, %v1970_v58  ;;  %v7157_v42 = vpop.eup %7156  ;;  %v4979_v52 = vcombine.low %v4970_v41, %v4977_v51  ;;  %v4508_v14 = vcombine.low %v1974_v62, %v1978_v38  ;;  %v6875_v16 = vmul.f32 -1.442695, %v523_v61 }
 0x1d6   : > { %v4986_v18 = vrot.slane %v4978_v7, %v7485_v59  ;;  %7160 = vrcp.f32 %v786_v57  ;;  %v4515_v20 = vrot.slane %v4505_v31, %v7485_v59  ;;  %v4522_v27 = vrot.slane %v4506_v4, %v7485_v59 }
 0x1d7   : > { %v4529_v36 = vrot.slane %v4507_v0, %v7485_v59  ;;  %7162 = vrcp.f32 %v785_v23  ;;  %v4993_v9 = vrot.slane %v4979_v52, %v7485_v59  ;;  %v4536_v2 = vrot.slane %v4508_v14, %v7485_v59  ;;  %v526_v0 = vpop.xlane.xlu1 %525 }
 0x1d8   : > { %v2302_v29 = vrot.slane %v8097_v17, %v7459_v39  ;;  %v8396_v10 = vadd.f32 1.0, %v7157_v42  ;;  %v4537_v33 = vcombine.low %v4515_v20, %v4522_v27  ;;  %v2306_v57 = vrot.slane %v8097_v17, %v7462_v45 }
 0x1d9   : > { %v2310_v32 = vrot.slane %v8097_v17, %v7465_v46  ;;  %v4994_v11 = vcombine.low %v4986_v18, %v4993_v9  ;;  %v4538_v47 = vcombine.low %v4529_v36, %v4536_v2  ;;  %7164 = vpow2.f32 %v6875_v16 }
 0x1da   : > { %v2314_v23 = vrot.slane %v8097_v17, %v7468_v48  ;;  %v4545_v25 = vrot.slane %v4537_v33, %v7485_v59  ;;  %v2318_v15 = vrot.slane %v8097_v17, %v7471_v49  ;;  %v2322_v37 = vrot.slane %v8097_v17, %v7474_v50 }
 0x1db   : > { %v2326_v30 = vrot.slane %v8097_v17, %v7477_v54  ;;  %6289 = vperm.xlu0 %6938, %v4994_v11   ;;  %v4552_v34 = vrot.slane %v4538_v47, %v7485_v59  ;;  %v2330_v41 = vrot.slane %v8097_v17, %v7480_v55  ;;  %v5044_v3 = vcombine.low %v2302_v29, %v2306_v57 }
 0x1dc   : > { %v5045_v43 = vcombine.low %v2310_v32, %v2314_v23  ;;  %v5046_v58 = vcombine.low %v2318_v15, %v2322_v37  ;;  %v2014_v61 = vrot.slane %v7901_v5, %v7459_v39  ;;  %v2018_v51 = vrot.slane %v7901_v5, %v7462_v45 }
 0x1dd   : > { %v2022_v7 = vrot.slane %v7901_v5, %v7465_v46  ;;  %v4553_v62 = vcombine.low %v4545_v25, %v4552_v34  ;;  %v5047_v38 = vcombine.low %v2326_v30, %v2330_v41  ;;  %v5054_v31 = vrot.slane %v5044_v3, %v7485_v59 }
 0x1de   : > { %v5061_v4 = vrot.slane %v5045_v43, %v7485_v59  ;;  %v7159_v17 = vpop.eup %7158  ;;  %v5068_v42 = vrot.slane %v5046_v58, %v7485_v59  ;;  %v2026_v52 = vrot.slane %v7901_v5, %v7468_v48  ;;  %v2030_v18 = vrot.slane %v7901_v5, %v7471_v49 }
 0x1df   : > { %v2034_v14 = vrot.slane %v7901_v5, %v7474_v50  ;;  %6262 = vperm.xlu1 %6939, %v4553_v62   ;;  %v5075_v16 = vrot.slane %v5047_v38, %v7485_v59  ;;  %v2038_v27 = vrot.slane %v7901_v5, %v7477_v54  ;;  %v2042_v36 = vrot.slane %v7901_v5, %v7480_v55  ;;  %v529_v62 = vpop.xlane.xlu0 %528 }
 0x1e0   : > { %v5076_v20 = vcombine.low %v5054_v31, %v5061_v4  ;;  %v8434_v9 = vpop.eup %7160  ;;  %v4603_v2 = vcombine.low %v2014_v61, %v2018_v51  ;;  %v4604_v29 = vcombine.low %v2022_v7, %v2026_v52  ;;  %v6876_v57 = vmul.f32 -1.442695, %v526_v0 }
 0x1e1   : > { %v4605_v33 = vcombine.low %v2030_v18, %v2034_v14  ;;  %v8436_v32 = vpop.eup %7162  ;;  %v5077_v11 = vcombine.low %v5068_v42, %v5075_v16  ;;  %v4606_v23 = vcombine.low %v2038_v27, %v2042_v36  ;;  %v2078_v25 = vrot.slane %v7946_v8, %v7459_v39 }
 0x1e2   : > { %v5084_v47 = vrot.slane %v5076_v20, %v7485_v59  ;;  %v4613_v15 = vrot.slane %v4603_v2, %v7485_v59  ;;  %v4620_v37 = vrot.slane %v4604_v29, %v7485_v59  ;;  %7166 = vpow2.f32 %v6876_v57  ;;  %v532_v57 = vpop.xlane.xlu1 %531 }
 0x1e3   : > { %v4627_v5 = vrot.slane %v4605_v33, %v7485_v59  ;;  %v7165_v30 = vpop.eup %7164  ;;  %v5091_v34 = vrot.slane %v5077_v11, %v7485_v59  ;;  %v4634_v41 = vrot.slane %v4606_v23, %v7485_v59  ;;  %v2082_v3 = vrot.slane %v7946_v8, %v7462_v45 }
 0x1e4   : > { %v2086_v43 = vrot.slane %v7946_v8, %v7465_v46  ;;  %v8450_v58 = vadd.f32 1.0, %v7159_v17  ;;  %v4635_v61 = vcombine.low %v4613_v15, %v4620_v37  ;;  %v2090_v51 = vrot.slane %v7946_v8, %v7468_v48 }
 0x1e5   : > { %v2094_v7 = vrot.slane %v7946_v8, %v7471_v49  ;;  %v5092_v38 = vcombine.low %v5084_v47, %v5091_v34  ;;  %v4636_v31 = vcombine.low %v4627_v5, %v4634_v41  ;;  %v2098_v4 = vrot.slane %v7946_v8, %v7474_v50 }
 0x1e6   : > { %v2102_v0 = vrot.slane %v7946_v8, %v7477_v54  ;;  %7168 = vrcp.f32 %v8396_v10  ;;  %v4643_v17 = vrot.slane %v4635_v61, %v7485_v59  ;;  %v2106_v42 = vrot.slane %v7946_v8, %v7480_v55 }
 0x1e7   : > { %v4701_v52 = vcombine.low %v2078_v25, %v2082_v3  ;;  %6295 = vperm.xlu0 %6938, %v5092_v38   ;;  %v4650_v18 = vrot.slane %v4636_v31, %v7485_v59  ;;  %v4702_v14 = vcombine.low %v2086_v43, %v2090_v51  ;;  %v4703_v16 = vcombine.low %v2094_v7, %v2098_v4 }
 0x1e8   : > { %v6877_v20 = vmul.f32 -1.442695, %v529_v62  ;;  %v4704_v27 = vcombine.low %v2102_v0, %v2106_v42  ;;  %v2142_v2 = vrot.slane %v7996_v53, %v7459_v39  ;;  %v2146_v10 = vrot.slane %v7996_v53, %v7462_v45 }
 0x1e9   : > { %v4711_v36 = vrot.slane %v4701_v52, %v7485_v59  ;;  %v4651_v29 = vcombine.low %v4643_v17, %v4650_v18  ;;  %v4718_v33 = vrot.slane %v4702_v14, %v7485_v59  ;;  %v4725_v8 = vrot.slane %v4703_v16, %v7485_v59 }
 0x1ea   : > { %7170 = vpow2.f32 %v6877_v20  ;;  %v4732_v11 = vrot.slane %v4704_v27, %v7485_v59  ;;  %v2150_v47 = vrot.slane %v7996_v53, %v7465_v46  ;;  %v2154_v23 = vrot.slane %v7996_v53, %v7468_v48 }
 0x1eb   : > { %v2158_v25 = vrot.slane %v7996_v53, %v7471_v49  ;;  %6268 = vperm.xlu1 %6939, %v4651_v29   ;;  %v4733_v15 = vcombine.low %v4711_v36, %v4718_v33  ;;  %v2162_v37 = vrot.slane %v7996_v53, %v7474_v50  ;;  %v2166_v5 = vrot.slane %v7996_v53, %v7477_v54 }
 0x1ec   : > { %v2170_v34 = vrot.slane %v7996_v53, %v7480_v55  ;;  %v7167_v41 = vpop.eup %7166  ;;  %v4734_v3 = vcombine.low %v4725_v8, %v4732_v11  ;;  %v4799_v43 = vcombine.low %v2142_v2, %v2146_v10  ;;  %v4800_v61 = vcombine.low %v2150_v47, %v2154_v23 }
 0x1ed   : > { %v6878_v51 = vmul.f32 -1.442695, %v532_v57  ;;  %v789_v7 = vadd.f32 1.0, %v7165_v30  ;;  %v4741_v62 = vrot.slane %v4733_v15, %v7485_v59  ;;  %v4801_v38 = vcombine.low %v2158_v25, %v2162_v37  ;;  %v535_v37 = vpop.xlane.xlu0 %534 }
 0x1ee   : > { %v4802_v31 = vcombine.low %v2166_v5, %v2170_v34  ;;  %v4748_v4 = vrot.slane %v4734_v3, %v7485_v59  ;;  %v4809_v0 = vrot.slane %v4799_v43, %v7485_v59  ;;  %v4816_v17 = vrot.slane %v4800_v61, %v7485_v59 }
 0x1ef   : > { %7172 = vpow2.f32 %v6878_v51  ;;  %v790_v42 = vadd.f32 1.0, %v7167_v41  ;;  %v4823_v53 = vrot.slane %v4801_v38, %v7485_v59  ;;  %v2206_v18 = vrot.slane %v8046_v40, %v7459_v39 }
 0x1f0   : > { %v4830_v52 = vrot.slane %v4802_v31, %v7485_v59  ;;  %v8493_v30 = vpop.eup %7168  ;;  %v4749_v14 = vcombine.low %v4741_v62, %v4748_v4  ;;  %v4831_v16 = vcombine.low %v4809_v0, %v4816_v17  ;;  %v2210_v20 = vrot.slane %v8046_v40, %v7462_v45 }
 0x1f1   : > { %v2214_v27 = vrot.slane %v8046_v40, %v7465_v46  ;;  %v2218_v2 = vrot.slane %v8046_v40, %v7468_v48  ;;  %v2222_v10 = vrot.slane %v8046_v40, %v7471_v49  ;;  %v2226_v29 = vrot.slane %v8046_v40, %v7474_v50 }
 0x1f2   : > { %v4832_v36 = vcombine.low %v4823_v53, %v4830_v52  ;;  %6274 = vperm.xlu1 %6939, %v4749_v14   ;;  %v4839_v33 = vrot.slane %v4831_v16, %v7485_v59  ;;  %v2230_v8 = vrot.slane %v8046_v40, %v7477_v54  ;;  %v2234_v57 = vrot.slane %v8046_v40, %v7480_v55 }
 0x1f3   : > { %v4897_v11 = vcombine.low %v2206_v18, %v2210_v20  ;;  %7174 = vrcp.f32 %v8450_v58  ;;  %v4898_v25 = vcombine.low %v2214_v27, %v2218_v2  ;;  %v4899_v15 = vcombine.low %v2222_v10, %v2226_v29 }
 0x1f4   : > { %v7171_v47 = vpop.eup %7170  ;;  %v4846_v23 = vrot.slane %v4832_v36, %v7485_v59  ;;  %7176 = vrcp.f32 %v789_v7  ;;  %v4900_v5 = vcombine.low %v2230_v8, %v2234_v57  ;;  %v2558_v41 = vrot.slane %v8243_v1, %v7459_v39 }
 0x1f5   : > { %v4907_v34 = vrot.slane %v4897_v11, %v7485_v59  ;;  %7178 = vrcp.f32 %v790_v42  ;;  %v4914_v40 = vrot.slane %v4898_v25, %v7485_v59  ;;  %v4921_v43 = vrot.slane %v4899_v15, %v7485_v59 }
 0x1f6   : > { %v4847_v3 = vcombine.low %v4839_v33, %v4846_v23  ;;  %v4928_v58 = vrot.slane %v4900_v5, %v7485_v59  ;;  %v6879_v61 = vmul.f32 -1.442695, %v535_v37  ;;  %v2562_v51 = vrot.slane %v8243_v1, %v7462_v45 }
 0x1f7   : > { %v2566_v7 = vrot.slane %v8243_v1, %v7465_v46  ;;  %v4929_v62 = vcombine.low %v4907_v34, %v4914_v40  ;;  %v2570_v38 = vrot.slane %v8243_v1, %v7468_v48  ;;  %v2574_v31 = vrot.slane %v8243_v1, %v7471_v49 }
 0x1f8   : > { %6280 = vperm.xlu1 %6939, %v4847_v3   ;;  %v2578_v4 = vrot.slane %v8243_v1, %v7474_v50  ;;  %v4930_v17 = vcombine.low %v4921_v43, %v4928_v58  ;;  %v2582_v42 = vrot.slane %v8243_v1, %v7477_v54  ;;  %v2586_v53 = vrot.slane %v8243_v1, %v7480_v55 }
 0x1f9   : > { %v7173_v0 = vpop.eup %7172  ;;  %v5436_v52 = vcombine.low %v2558_v41, %v2562_v51  ;;  %v791_v18 = vadd.f32 1.0, %v7171_v47  ;;  %v4937_v14 = vrot.slane %v4929_v62, %v7485_v59  ;;  %v5437_v16 = vcombine.low %v2566_v7, %v2570_v38 }
 0x1fa   : > { %v5438_v20 = vcombine.low %v2574_v31, %v2578_v4  ;;  %v4944_v27 = vrot.slane %v4930_v17, %v7485_v59  ;;  %v5439_v36 = vcombine.low %v2582_v42, %v2586_v53  ;;  %v2270_v10 = vrot.slane %v8131_v21, %v7459_v39 }
 0x1fb   : > { %v5446_v2 = vrot.slane %v5436_v52, %v7485_v59  ;;  %v792_v29 = vadd.f32 1.0, %v7173_v0  ;;  %v5453_v33 = vrot.slane %v5437_v16, %v7485_v59  ;;  %v2274_v1 = vrot.slane %v8131_v21, %v7462_v45 }
 0x1fc   : > { %v5460_v8 = vrot.slane %v5438_v20, %v7485_v59  ;;  %v4945_v57 = vcombine.low %v4937_v14, %v4944_v27  ;;  %v5467_v11 = vrot.slane %v5439_v36, %v7485_v59  ;;  %v2278_v47 = vrot.slane %v8131_v21, %v7465_v46 }
 0x1fd   : > { %v2282_v23 = vrot.slane %v8131_v21, %v7468_v48  ;;  %v8546_v25 = vpop.eup %7174  ;;  %v5468_v15 = vcombine.low %v5446_v2, %v5453_v33  ;;  %v2286_v37 = vrot.slane %v8131_v21, %v7471_v49  ;;  %v2290_v5 = vrot.slane %v8131_v21, %v7474_v50 }
 0x1fe   : > { %v2294_v34 = vrot.slane %v8131_v21, %v7477_v54  ;;  %v8554_v41 = vpop.eup %7176  ;;  %6286 = vperm.xlu1 %6939, %v4945_v57   ;;  %v5469_v3 = vcombine.low %v5460_v8, %v5467_v11  ;;  %v2298_v40 = vrot.slane %v8131_v21, %v7480_v55  ;;  %v4995_v43 = vcombine.low %v2270_v10, %v2274_v1 }
 0x1ff   : > { %v4996_v58 = vcombine.low %v2278_v47, %v2282_v23  ;;  %v8558_v51 = vpop.eup %7178  ;;  %7180 = vpow2.f32 %v6879_v61  ;;  %v5476_v7 = vrot.slane %v5468_v15, %v7485_v59  ;;  %v4997_v62 = vcombine.low %v2286_v37, %v2290_v5 }
 0x200   : > { %v5483_v38 = vrot.slane %v5469_v3, %v7485_v59  ;;  %v4998_v31 = vcombine.low %v2294_v34, %v2298_v40  ;;  %v5005_v4 = vrot.slane %v4995_v43, %v7485_v59  ;;  %v2622_v0 = vrot.slane %v8322_v26, %v7459_v39 }
 0x201   : > { %7182 = vrcp.f32 %v791_v18  ;;  %v5012_v17 = vrot.slane %v4996_v58, %v7485_v59  ;;  %v5019_v21 = vrot.slane %v4997_v62, %v7485_v59  ;;  %v2626_v42 = vrot.slane %v8322_v26, %v7462_v45 }
 0x202   : > { %7184 = vrcp.f32 %v792_v29  ;;  %v5484_v61 = vcombine.low %v5476_v7, %v5483_v38  ;;  %v5026_v53 = vrot.slane %v4998_v31, %v7485_v59  ;;  %v2630_v52 = vrot.slane %v8322_v26, %v7465_v46  ;;  %v538_v7 = vpop.xlane.xlu1 %537 }
 0x203   : > { %v5027_v14 = vcombine.low %v5005_v4, %v5012_v17  ;;  %v2634_v16 = vrot.slane %v8322_v26, %v7468_v48  ;;  %v2638_v18 = vrot.slane %v8322_v26, %v7471_v49  ;;  %v2642_v20 = vrot.slane %v8322_v26, %v7474_v50 }
 0x204   : > { %6319 = vperm.xlu0 %6938, %v5484_v61   ;;  %v5028_v27 = vcombine.low %v5019_v21, %v5026_v53  ;;  %v2646_v36 = vrot.slane %v8322_v26, %v7477_v54  ;;  %v2650_v2 = vrot.slane %v8322_v26, %v7480_v55  ;;  %v5534_v10 = vcombine.low %v2622_v0, %v2626_v42 }
 0x205   : > { %v5035_v29 = vrot.slane %v5027_v14, %v7485_v59  ;;  %v5535_v33 = vcombine.low %v2630_v52, %v2634_v16  ;;  %v5536_v8 = vcombine.low %v2638_v18, %v2642_v20  ;;  %v2526_v1 = vrot.slane %v8291_v24, %v7459_v39 }
 0x206   : > { %v5042_v57 = vrot.slane %v5028_v27, %v7485_v59  ;;  %v5537_v11 = vcombine.low %v2646_v36, %v2650_v2  ;;  %v5544_v47 = vrot.slane %v5534_v10, %v7485_v59  ;;  %v2530_v23 = vrot.slane %v8291_v24, %v7462_v45 }
 0x207   : > { %v5551_v15 = vrot.slane %v5535_v33, %v7485_v59  ;;  %v5558_v26 = vrot.slane %v5536_v8, %v7485_v59  ;;  %v2534_v37 = vrot.slane %v8291_v24, %v7465_v46  ;;  %v2538_v5 = vrot.slane %v8291_v24, %v7468_v48 }
 0x208   : > { %v5043_v34 = vcombine.low %v5035_v29, %v5042_v57  ;;  %v5565_v3 = vrot.slane %v5537_v11, %v7485_v59  ;;  %v2542_v40 = vrot.slane %v8291_v24, %v7471_v49  ;;  %v2546_v43 = vrot.slane %v8291_v24, %v7474_v50 }
 0x209   : > { %v7181_v58 = vpop.eup %7180  ;;  %v5566_v62 = vcombine.low %v5544_v47, %v5551_v15  ;;  %v2550_v38 = vrot.slane %v8291_v24, %v7477_v54  ;;  %v2554_v31 = vrot.slane %v8291_v24, %v7480_v55  ;;  %v5387_v4 = vcombine.low %v2526_v1, %v2530_v23 }
 0x20a   : > { %6292 = vperm.xlu1 %6939, %v5043_v34   ;;  %v5567_v0 = vcombine.low %v5558_v26, %v5565_v3  ;;  %v5388_v17 = vcombine.low %v2534_v37, %v2538_v5  ;;  %v5389_v21 = vcombine.low %v2542_v40, %v2546_v43  ;;  %v2686_v42 = vrot.slane %v8372_v6, %v7459_v39 }
 0x20b   : > { %v8606_v61 = vpop.eup %7182  ;;  %v5574_v53 = vrot.slane %v5566_v62, %v7485_v59  ;;  %v5390_v52 = vcombine.low %v2550_v38, %v2554_v31  ;;  %v5397_v14 = vrot.slane %v5387_v4, %v7485_v59  ;;  %v2690_v16 = vrot.slane %v8372_v6, %v7462_v45 }
 0x20c   : > { %v8612_v18 = vpop.eup %7184  ;;  %v8614_v24 = vmul.f32 -1.442695, %v538_v7  ;;  %v5581_v20 = vrot.slane %v5567_v0, %v7485_v59  ;;  %v5404_v27 = vrot.slane %v5388_v17, %v7485_v59  ;;  %v5411_v36 = vrot.slane %v5389_v21, %v7485_v59 }
 0x20d   : > { %v5418_v2 = vrot.slane %v5390_v52, %v7485_v59  ;;  %v2694_v10 = vrot.slane %v8372_v6, %v7465_v46  ;;  %v2698_v29 = vrot.slane %v8372_v6, %v7468_v48  ;;  %v2702_v33 = vrot.slane %v8372_v6, %v7471_v49 }
 0x20e   : > { %v8626_v8 = vadd.f32 1.0, %v7181_v58  ;;  %v5582_v1 = vcombine.low %v5574_v53, %v5581_v20  ;;  %v5419_v57 = vcombine.low %v5397_v14, %v5404_v27  ;;  %v2706_v11 = vrot.slane %v8372_v6, %v7474_v50 }
 0x20f   : > { %v5420_v47 = vcombine.low %v5411_v36, %v5418_v2  ;;  %v2710_v23 = vrot.slane %v8372_v6, %v7477_v54  ;;  %v2714_v15 = vrot.slane %v8372_v6, %v7480_v55  ;;  %v5632_v26 = vcombine.low %v2686_v42, %v2690_v16 }
 0x210   : > { %6325 = vperm.xlu0 %6938, %v5582_v1   ;;  %v5427_v37 = vrot.slane %v5419_v57, %v7485_v59  ;;  %v5633_v5 = vcombine.low %v2694_v10, %v2698_v29  ;;  %v5634_v34 = vcombine.low %v2702_v33, %v2706_v11  ;;  %v2590_v3 = vrot.slane %v8336_v13, %v7459_v39 }
 0x211   : > { %v5434_v40 = vrot.slane %v5420_v47, %v7485_v59  ;;  %v5635_v43 = vcombine.low %v2710_v23, %v2714_v15  ;;  %v5642_v58 = vrot.slane %v5632_v26, %v7485_v59  ;;  %v2594_v7 = vrot.slane %v8336_v13, %v7462_v45 }
 0x212   : > { %v5649_v62 = vrot.slane %v5633_v5, %v7485_v59  ;;  %v5656_v6 = vrot.slane %v5634_v34, %v7485_v59  ;;  %v2598_v38 = vrot.slane %v8336_v13, %v7465_v46  ;;  %v2602_v31 = vrot.slane %v8336_v13, %v7468_v48 }
 0x213   : > { %v5435_v4 = vcombine.low %v5427_v37, %v5434_v40  ;;  %v5663_v0 = vrot.slane %v5635_v43, %v7485_v59  ;;  %v2606_v17 = vrot.slane %v8336_v13, %v7471_v49  ;;  %v2610_v21 = vrot.slane %v8336_v13, %v7474_v50 }
 0x214   : > { %v5664_v42 = vcombine.low %v5642_v58, %v5649_v62  ;;  %v2614_v53 = vrot.slane %v8336_v13, %v7477_v54  ;;  %v2618_v52 = vrot.slane %v8336_v13, %v7480_v55  ;;  %v5485_v14 = vcombine.low %v2590_v3, %v2594_v7 }
 0x215   : > { %6316 = vperm.xlu1 %6939, %v5435_v4   ;;  %v5665_v16 = vcombine.low %v5656_v6, %v5663_v0  ;;  %v5486_v20 = vcombine.low %v2598_v38, %v2602_v31  ;;  %v5487_v27 = vcombine.low %v2606_v17, %v2610_v21  ;;  %v2750_v36 = vrot.slane %v8434_v9, %v7459_v39 }
 0x216   : > { %v5672_v2 = vrot.slane %v5664_v42, %v7485_v59  ;;  %v5488_v10 = vcombine.low %v2614_v53, %v2618_v52  ;;  %v5495_v29 = vrot.slane %v5485_v14, %v7485_v59  ;;  %v2754_v33 = vrot.slane %v8434_v9, %v7462_v45 }
 0x217   : > { %v5679_v1 = vrot.slane %v5665_v16, %v7485_v59  ;;  %v5502_v13 = vrot.slane %v5486_v20, %v7485_v59  ;;  %v5509_v57 = vrot.slane %v5487_v27, %v7485_v59  ;;  %v2758_v11 = vrot.slane %v8434_v9, %v7465_v46 }
 0x218   : > { %v5516_v47 = vrot.slane %v5488_v10, %v7485_v59  ;;  %v2762_v23 = vrot.slane %v8434_v9, %v7468_v48  ;;  %v2766_v15 = vrot.slane %v8434_v9, %v7471_v49  ;;  %v2770_v26 = vrot.slane %v8434_v9, %v7474_v50 }
 0x219   : > { %v5680_v37 = vcombine.low %v5672_v2, %v5679_v1  ;;  %v5517_v5 = vcombine.low %v5495_v29, %v5502_v13  ;;  %v2774_v34 = vrot.slane %v8434_v9, %v7477_v54  ;;  %v2778_v3 = vrot.slane %v8434_v9, %v7480_v55 }
 0x21a   : > { %v5518_v40 = vcombine.low %v5509_v57, %v5516_v47  ;;  %v5730_v43 = vcombine.low %v2750_v36, %v2754_v33  ;;  %v5731_v58 = vcombine.low %v2758_v11, %v2762_v23  ;;  %v5732_v7 = vcombine.low %v2766_v15, %v2770_v26 }
 0x21b   : > { %6331 = vperm.xlu0 %6938, %v5680_v37   ;;  %v5525_v62 = vrot.slane %v5517_v5, %v7485_v59  ;;  %v5733_v6 = vcombine.low %v2774_v34, %v2778_v3  ;;  %v2654_v38 = vrot.slane %v8386_v44, %v7459_v39  ;;  %v2658_v31 = vrot.slane %v8386_v44, %v7462_v45 }
 0x21c   : > { %v5532_v4 = vrot.slane %v5518_v40, %v7485_v59  ;;  %v5740_v0 = vrot.slane %v5730_v43, %v7485_v59  ;;  %v5747_v9 = vrot.slane %v5731_v58, %v7485_v59  ;;  %v5754_v17 = vrot.slane %v5732_v7, %v7485_v59 }
 0x21d   : > { %v5761_v21 = vrot.slane %v5733_v6, %v7485_v59  ;;  %v2662_v42 = vrot.slane %v8386_v44, %v7465_v46  ;;  %v2666_v53 = vrot.slane %v8386_v44, %v7468_v48  ;;  %v2670_v52 = vrot.slane %v8386_v44, %v7471_v49 }
 0x21e   : > { %v5533_v14 = vcombine.low %v5525_v62, %v5532_v4  ;;  %v5762_v16 = vcombine.low %v5740_v0, %v5747_v9  ;;  %v2674_v20 = vrot.slane %v8386_v44, %v7474_v50  ;;  %v2678_v27 = vrot.slane %v8386_v44, %v7477_v54 }
 0x21f   : > { %v5763_v36 = vcombine.low %v5754_v17, %v5761_v21  ;;  %v2682_v2 = vrot.slane %v8386_v44, %v7480_v55  ;;  %v5583_v10 = vcombine.low %v2654_v38, %v2658_v31  ;;  %v5584_v29 = vcombine.low %v2662_v42, %v2666_v53  ;;  %v8708_v44 = vpop.permute.xlu1 %6175 }
 0x220   : > { %6322 = vperm.xlu1 %6939, %v5533_v14   ;;  %v5770_v33 = vrot.slane %v5762_v16, %v7485_v59  ;;  %v5585_v1 = vcombine.low %v2670_v52, %v2674_v20  ;;  %v2814_v13 = vrot.slane %v8493_v30, %v7459_v39  ;;  %v2818_v57 = vrot.slane %v8493_v30, %v7462_v45 }
 0x221   : > { %v5777_v11 = vrot.slane %v5763_v36, %v7485_v59  ;;  %v5586_v47 = vcombine.low %v2678_v27, %v2682_v2  ;;  %v5593_v23 = vrot.slane %v5583_v10, %v7485_v59  ;;  %v5600_v15 = vrot.slane %v5584_v29, %v7485_v59 }
 0x222   : > { %v5607_v26 = vrot.slane %v5585_v1, %v7485_v59  ;;  %v2822_v37 = vrot.slane %v8493_v30, %v7465_v46  ;;  %v2826_v5 = vrot.slane %v8493_v30, %v7468_v48  ;;  %v2830_v34 = vrot.slane %v8493_v30, %v7471_v49 }
 0x223   : > { %v5778_v3 = vcombine.low %v5770_v33, %v5777_v11  ;;  %v5614_v40 = vrot.slane %v5586_v47, %v7485_v59  ;;  %v5615_v43 = vcombine.low %v5593_v23, %v5600_v15  ;;  %v2834_v58 = vrot.slane %v8493_v30, %v7474_v50  ;;  %v8737_v20 = vpop.permute.xlu1 %6178 }
 0x224   : > { %v2838_v7 = vrot.slane %v8493_v30, %v7477_v54  ;;  %v2842_v62 = vrot.slane %v8493_v30, %v7480_v55  ;;  %v5828_v6 = vcombine.low %v2814_v13, %v2818_v57  ;;  %v5829_v38 = vcombine.low %v2822_v37, %v2826_v5 }
 0x225   : > { %6337 = vperm.xlu0 %6938, %v5778_v3   ;;  %v5616_v31 = vcombine.low %v5607_v26, %v5614_v40  ;;  %v5623_v4 = vrot.slane %v5615_v43, %v7485_v59  ;;  %v5830_v0 = vcombine.low %v2830_v34, %v2834_v58  ;;  %v2718_v9 = vrot.slane %v8436_v32, %v7459_v39 }
 0x226   : > { %v5831_v17 = vcombine.low %v2838_v7, %v2842_v62  ;;  %v5838_v21 = vrot.slane %v5828_v6, %v7485_v59  ;;  %v5845_v42 = vrot.slane %v5829_v38, %v7485_v59  ;;  %v2722_v53 = vrot.slane %v8436_v32, %v7462_v45 }
 0x227   : > { %v5630_v30 = vrot.slane %v5616_v31, %v7485_v59  ;;  %v5852_v52 = vrot.slane %v5830_v0, %v7485_v59  ;;  %v2726_v14 = vrot.slane %v8436_v32, %v7465_v46  ;;  %v2730_v16 = vrot.slane %v8436_v32, %v7468_v48  ;;  %v8766_v6 = vpop.permute.xlu1 %6181 }
 0x228   : > { %v5859_v27 = vrot.slane %v5831_v17, %v7485_v59  ;;  %v5860_v36 = vcombine.low %v5838_v21, %v5845_v42  ;;  %v2734_v2 = vrot.slane %v8436_v32, %v7471_v49  ;;  %v2738_v10 = vrot.slane %v8436_v32, %v7474_v50 }
 0x229   : > { %v5631_v29 = vcombine.low %v5623_v4, %v5630_v30  ;;  %v2742_v33 = vrot.slane %v8436_v32, %v7477_v54  ;;  %v2746_v1 = vrot.slane %v8436_v32, %v7480_v55  ;;  %v5681_v13 = vcombine.low %v2718_v9, %v2722_v53 }
 0x22a   : > { %v5861_v57 = vcombine.low %v5852_v52, %v5859_v27  ;;  %v5868_v11 = vrot.slane %v5860_v36, %v7485_v59  ;;  %v5682_v47 = vcombine.low %v2726_v14, %v2730_v16  ;;  %v5683_v23 = vcombine.low %v2734_v2, %v2738_v10 }
 0x22b   : > { %6328 = vperm.xlu1 %6939, %v5631_v29   ;;  %v5684_v15 = vcombine.low %v2742_v33, %v2746_v1  ;;  %v5691_v26 = vrot.slane %v5681_v13, %v7485_v59  ;;  %v2782_v37 = vrot.slane %v8546_v25, %v7459_v39  ;;  %v2786_v5 = vrot.slane %v8546_v25, %v7462_v45 }
 0x22c   : > { %v5875_v34 = vrot.slane %v5861_v57, %v7485_v59  ;;  %v5698_v32 = vrot.slane %v5682_v47, %v7485_v59  ;;  %v5705_v3 = vrot.slane %v5683_v23, %v7485_v59  ;;  %v2790_v40 = vrot.slane %v8546_v25, %v7465_v46  ;;  %v8792_v47 = vpop.permute.xlu1 %6184 }
 0x22d   : > { %v5712_v43 = vrot.slane %v5684_v15, %v7485_v59  ;;  %v2794_v58 = vrot.slane %v8546_v25, %v7468_v48  ;;  %v2798_v7 = vrot.slane %v8546_v25, %v7471_v49  ;;  %v2802_v62 = vrot.slane %v8546_v25, %v7474_v50 }
 0x22e   : > { %v5876_v38 = vcombine.low %v5868_v11, %v5875_v34  ;;  %v5713_v31 = vcombine.low %v5691_v26, %v5698_v32  ;;  %v2806_v4 = vrot.slane %v8546_v25, %v7477_v54  ;;  %v2810_v0 = vrot.slane %v8546_v25, %v7480_v55 }
 0x22f   : > { %v5714_v9 = vcombine.low %v5705_v3, %v5712_v43  ;;  %v5779_v17 = vcombine.low %v2782_v37, %v2786_v5  ;;  %v5780_v21 = vcombine.low %v2790_v40, %v2794_v58  ;;  %v5781_v42 = vcombine.low %v2798_v7, %v2802_v62 }
 0x230   : > { %6343 = vperm.xlu0 %6938, %v5876_v38   ;;  %v5721_v53 = vrot.slane %v5713_v31, %v7485_v59  ;;  %v5782_v30 = vcombine.low %v2806_v4, %v2810_v0  ;;  %v2846_v52 = vrot.slane %v8554_v41, %v7459_v39  ;;  %v2850_v14 = vrot.slane %v8554_v41, %v7462_v45 }
 0x231   : > { %v5728_v16 = vrot.slane %v5714_v9, %v7485_v59  ;;  %v5789_v27 = vrot.slane %v5779_v17, %v7485_v59  ;;  %v5796_v25 = vrot.slane %v5780_v21, %v7485_v59  ;;  %v5803_v36 = vrot.slane %v5781_v42, %v7485_v59 }
 0x232   : > { %v5810_v2 = vrot.slane %v5782_v30, %v7485_v59  ;;  %v2854_v10 = vrot.slane %v8554_v41, %v7465_v46  ;;  %v2858_v29 = vrot.slane %v8554_v41, %v7468_v48  ;;  %v2862_v33 = vrot.slane %v8554_v41, %v7471_v49 }
 0x233   : > { %v5729_v1 = vcombine.low %v5721_v53, %v5728_v16  ;;  %v5811_v13 = vcombine.low %v5789_v27, %v5796_v25  ;;  %v2866_v57 = vrot.slane %v8554_v41, %v7474_v50  ;;  %v2870_v11 = vrot.slane %v8554_v41, %v7477_v54 }
 0x234   : > { %v5812_v23 = vcombine.low %v5803_v36, %v5810_v2  ;;  %v2874_v15 = vrot.slane %v8554_v41, %v7480_v55  ;;  %v5877_v26 = vcombine.low %v2846_v52, %v2850_v14  ;;  %v5878_v37 = vcombine.low %v2854_v10, %v2858_v29  ;;  %v8818_v52 = vpop.permute.xlu1 %6187 }
 0x235   : > { %6334 = vperm.xlu1 %6939, %v5729_v1   ;;  %v5819_v5 = vrot.slane %v5811_v13, %v7485_v59  ;;  %v5879_v34 = vcombine.low %v2862_v33, %v2866_v57  ;;  %v2334_v32 = vrot.slane %v8143_v22, %v7459_v39  ;;  %v2338_v3 = vrot.slane %v8143_v22, %v7462_v45 }
 0x236   : > { %v5826_v40 = vrot.slane %v5812_v23, %v7485_v59  ;;  %v5880_v43 = vcombine.low %v2870_v11, %v2874_v15  ;;  %v5887_v58 = vrot.slane %v5877_v26, %v7485_v59  ;;  %v5894_v7 = vrot.slane %v5878_v37, %v7485_v59 }
 0x237   : > { %v5901_v41 = vrot.slane %v5879_v34, %v7485_v59  ;;  %v2342_v62 = vrot.slane %v8143_v22, %v7465_v46  ;;  %v2346_v38 = vrot.slane %v8143_v22, %v7468_v48  ;;  %v2350_v31 = vrot.slane %v8143_v22, %v7471_v49 }
 0x238   : > { %v5827_v4 = vcombine.low %v5819_v5, %v5826_v40  ;;  %v5908_v0 = vrot.slane %v5880_v43, %v7485_v59  ;;  %v5909_v9 = vcombine.low %v5887_v58, %v5894_v7  ;;  %v2354_v17 = vrot.slane %v8143_v22, %v7474_v50  ;;  %v8843_v58 = vpop.permute.xlu1 %6190 }
 0x239   : > { %v2358_v21 = vrot.slane %v8143_v22, %v7477_v54  ;;  %v2362_v42 = vrot.slane %v8143_v22, %v7480_v55  ;;  %v5093_v53 = vcombine.low %v2334_v32, %v2338_v3  ;;  %v5094_v30 = vcombine.low %v2342_v62, %v2346_v38 }
 0x23a   : > { %6340 = vperm.xlu1 %6939, %v5827_v4   ;;  %v5910_v14 = vcombine.low %v5901_v41, %v5908_v0  ;;  %v5917_v16 = vrot.slane %v5909_v9, %v7485_v59  ;;  %v5095_v27 = vcombine.low %v2350_v31, %v2354_v17  ;;  %v2878_v25 = vrot.slane %v8558_v51, %v7459_v39 }
 0x23b   : > { %v5096_v36 = vcombine.low %v2358_v21, %v2362_v42  ;;  %v5103_v2 = vrot.slane %v5093_v53, %v7485_v59  ;;  %v5110_v10 = vrot.slane %v5094_v30, %v7485_v59  ;;  %v2882_v22 = vrot.slane %v8558_v51, %v7462_v45 }
 0x23c   : > { %v5924_v29 = vrot.slane %v5910_v14, %v7485_v59  ;;  %v5117_v33 = vrot.slane %v5095_v27, %v7485_v59  ;;  %v2886_v1 = vrot.slane %v8558_v51, %v7465_v46  ;;  %v2890_v13 = vrot.slane %v8558_v51, %v7468_v48 }
 0x23d   : > { %v5124_v57 = vrot.slane %v5096_v36, %v7485_v59  ;;  %v5125_v11 = vcombine.low %v5103_v2, %v5110_v10  ;;  %v2894_v23 = vrot.slane %v8558_v51, %v7471_v49  ;;  %v2898_v15 = vrot.slane %v8558_v51, %v7474_v50 }
 0x23e   : > { %v5925_v26 = vcombine.low %v5917_v16, %v5924_v29  ;;  %v2902_v37 = vrot.slane %v8558_v51, %v7477_v54  ;;  %v2906_v5 = vrot.slane %v8558_v51, %v7480_v55  ;;  %v5926_v34 = vcombine.low %v2878_v25, %v2882_v22 }
 0x23f   : > { %v5126_v32 = vcombine.low %v5117_v33, %v5124_v57  ;;  %v5133_v3 = vrot.slane %v5125_v11, %v7485_v59  ;;  %v5927_v40 = vcombine.low %v2886_v1, %v2890_v13  ;;  %v5928_v43 = vcombine.low %v2894_v23, %v2898_v15  ;;  %v8871_v1 = vpop.permute.xlu1 %6193 }
 0x240   : > { %6346 = vperm.xlu0 %6938, %v5925_v26   ;;  %v5929_v7 = vcombine.low %v2902_v37, %v2906_v5  ;;  %v5936_v41 = vrot.slane %v5926_v34, %v7485_v59  ;;  %v2366_v62 = vrot.slane %v8141_v12, %v7459_v39  ;;  %v2370_v38 = vrot.slane %v8141_v12, %v7462_v45 }
 0x241   : > { %v5140_v51 = vrot.slane %v5126_v32, %v7485_v59  ;;  %v5943_v31 = vrot.slane %v5927_v40, %v7485_v59  ;;  %v5950_v4 = vrot.slane %v5928_v43, %v7485_v59  ;;  %v2374_v0 = vrot.slane %v8141_v12, %v7465_v46 }
 0x242   : > { %v5957_v9 = vrot.slane %v5929_v7, %v7485_v59  ;;  %v2378_v17 = vrot.slane %v8141_v12, %v7468_v48  ;;  %v2382_v21 = vrot.slane %v8141_v12, %v7471_v49  ;;  %v2386_v42 = vrot.slane %v8141_v12, %v7474_v50 }
 0x243   : > { %v5141_v53 = vcombine.low %v5133_v3, %v5140_v51  ;;  %v5958_v30 = vcombine.low %v5936_v41, %v5943_v31  ;;  %v2390_v14 = vrot.slane %v8141_v12, %v7477_v54  ;;  %v2394_v16 = vrot.slane %v8141_v12, %v7480_v55  ;;  %v8892_v51 = vpop.permute.xlu0 %6172 }
 0x244   : > { %v5959_v27 = vcombine.low %v5950_v4, %v5957_v9  ;;  %v5142_v25 = vcombine.low %v2366_v62, %v2370_v38  ;;  %v5143_v36 = vcombine.low %v2374_v0, %v2378_v17  ;;  %v5144_v2 = vcombine.low %v2382_v21, %v2386_v42  ;;  %v8899_v17 = vpop.permute.xlu1 %6196 }
 0x245   : > { %6298 = vperm.xlu1 %6939, %v5141_v53   ;;  %v5966_v10 = vrot.slane %v5958_v30, %v7485_v59  ;;  %v5145_v22 = vcombine.low %v2390_v14, %v2394_v16  ;;  %v2910_v29 = vrot.slane %v8606_v61, %v7459_v39  ;;  %v2914_v33 = vrot.slane %v8606_v61, %v7462_v45 }
 0x246   : > { %v5973_v13 = vrot.slane %v5959_v27, %v7485_v59  ;;  %v5152_v12 = vrot.slane %v5142_v25, %v7485_v59  ;;  %v5159_v57 = vrot.slane %v5143_v36, %v7485_v59  ;;  %v5166_v11 = vrot.slane %v5144_v2, %v7485_v59 }
 0x247   : > { %v5173_v23 = vrot.slane %v5145_v22, %v7485_v59  ;;  %v2918_v15 = vrot.slane %v8606_v61, %v7465_v46  ;;  %v2922_v26 = vrot.slane %v8606_v61, %v7468_v48  ;;  %v2926_v37 = vrot.slane %v8606_v61, %v7471_v49  ;;  %v8917_v2 = vpop.permute.xlu0 %6199 }
 0x248   : > { %v5974_v5 = vcombine.low %v5966_v10, %v5973_v13  ;;  %v5174_v34 = vcombine.low %v5152_v12, %v5159_v57  ;;  %v2930_v32 = vrot.slane %v8606_v61, %v7474_v50  ;;  %v2934_v3 = vrot.slane %v8606_v61, %v7477_v54 }
 0x249   : > { %v5175_v40 = vcombine.low %v5166_v11, %v5173_v23  ;;  %v2938_v43 = vrot.slane %v8606_v61, %v7480_v55  ;;  %v5975_v7 = vcombine.low %v2910_v29, %v2914_v33  ;;  %v5976_v41 = vcombine.low %v2918_v15, %v2922_v26 }
 0x24a   : > { %7186 = vpow2.f32 %v8614_v24  ;;  %6349 = vperm.xlu0 %6938, %v5974_v5   ;;  %v5182_v62 = vrot.slane %v5174_v34, %v7485_v59  ;;  %v5977_v38 = vcombine.low %v2926_v37, %v2930_v32  ;;  %v2398_v31 = vrot.slane %v8195_v56, %v7459_v39  ;;  %v8930_v37 = vpop.permute.xlu1 %6202 }
 0x24b   : > { %v5189_v4 = vrot.slane %v5175_v40, %v7485_v59  ;;  %v5978_v0 = vcombine.low %v2934_v3, %v2938_v43  ;;  %v5985_v9 = vrot.slane %v5975_v7, %v7485_v59  ;;  %v5992_v61 = vrot.slane %v5976_v41, %v7485_v59 }
 0x24c   : > { %v777_v24 = vadd.f32 1.0, %v8239_v35  ;;  %v5999_v21 = vrot.slane %v5977_v38, %v7485_v59  ;;  %v2402_v42 = vrot.slane %v8195_v56, %v7462_v45  ;;  %v2406_v53 = vrot.slane %v8195_v56, %v7465_v46 }
 0x24d   : > { %v5190_v30 = vcombine.low %v5182_v62, %v5189_v4  ;;  %v6006_v14 = vrot.slane %v5978_v0, %v7485_v59  ;;  %v6007_v16 = vcombine.low %v5985_v9, %v5992_v61  ;;  %v2410_v27 = vrot.slane %v8195_v56, %v7468_v48  ;;  %v8945_v0 = vpop.permute.xlu0 %6205 }
 0x24e   : > { %7188 = vrcp.f32 %v8626_v8  ;;  %v2414_v35 = vrot.slane %v8195_v56, %v7471_v49  ;;  %v2418_v25 = vrot.slane %v8195_v56, %v7474_v50  ;;  %v2422_v36 = vrot.slane %v8195_v56, %v7477_v54 }
 0x24f   : > { %6301 = vperm.xlu1 %6939, %v5190_v30   ;;  %v6008_v10 = vcombine.low %v5999_v21, %v6006_v14  ;;  %v6015_v22 = vrot.slane %v6007_v16, %v7485_v59  ;;  %v2426_v29 = vrot.slane %v8195_v56, %v7480_v55  ;;  %v5191_v33 = vcombine.low %v2398_v31, %v2402_v42 }
 0x250   : > { %v5192_v8 = vcombine.low %v2406_v53, %v2410_v27  ;;  %v5193_v13 = vcombine.low %v2414_v35, %v2418_v25  ;;  %v2942_v12 = vrot.slane %v8612_v18, %v7459_v39  ;;  %v2946_v57 = vrot.slane %v8612_v18, %v7462_v45  ;;  %v8954_v35 = vpop.permute.xlu1 %6208 }
 0x251   : > { %v6022_v11 = vrot.slane %v6008_v10, %v7485_v59  ;;  %v5194_v23 = vcombine.low %v2422_v36, %v2426_v29  ;;  %v5201_v15 = vrot.slane %v5191_v33, %v7485_v59  ;;  %v2950_v26 = vrot.slane %v8612_v18, %v7465_v46 }
 0x252   : > { %v5208_v56 = vrot.slane %v5192_v8, %v7485_v59  ;;  %v5215_v5 = vrot.slane %v5193_v13, %v7485_v59  ;;  %v2954_v34 = vrot.slane %v8612_v18, %v7468_v48  ;;  %v2958_v32 = vrot.slane %v8612_v18, %v7471_v49 }
 0x253   : > { %v6023_v3 = vcombine.low %v6015_v22, %v6022_v11  ;;  %v5222_v40 = vrot.slane %v5194_v23, %v7485_v59  ;;  %v2962_v43 = vrot.slane %v8612_v18, %v7474_v50  ;;  %v2966_v7 = vrot.slane %v8612_v18, %v7477_v54 }
 0x254   : > { %v7187_v41 = vpop.eup %7186  ;;  %v5223_v62 = vcombine.low %v5201_v15, %v5208_v56  ;;  %v2970_v38 = vrot.slane %v8612_v18, %v7480_v55  ;;  %v6024_v31 = vcombine.low %v2942_v12, %v2946_v57  ;;  %v6025_v4 = vcombine.low %v2950_v26, %v2954_v34  ;;  %v8971_v15 = vpop.permute.xlu0 %6211 }
 0x255   : > { %7190 = vrcp.f32 %v777_v24  ;;  %6352 = vperm.xlu0 %6938, %v6023_v3   ;;  %v5224_v9 = vcombine.low %v5215_v5, %v5222_v40  ;;  %v6026_v61 = vcombine.low %v2958_v32, %v2962_v43  ;;  %v794_v14 = vadd.f32 1.0, %v7187_v41 }
 0x256   : > { %v5231_v21 = vrot.slane %v5223_v62, %v7485_v59  ;;  %v6027_v42 = vcombine.low %v2966_v7, %v2970_v38  ;;  %v6034_v53 = vrot.slane %v6024_v31, %v7485_v59  ;;  %v6041_v30 = vrot.slane %v6025_v4, %v7485_v59  ;;  %v8981_v62 = vpop.permute.xlu1 %6214 }
 0x257   : > { %v5238_v16 = vrot.slane %v5224_v9, %v7485_v59  ;;  %v6048_v18 = vrot.slane %v6026_v61, %v7485_v59  ;;  %v2430_v27 = vrot.slane %v8150_v63, %v7459_v39  ;;  %v2434_v10 = vrot.slane %v8150_v63, %v7462_v45 }
 0x258   : > { %v7189_v24 = vpop.eup %7188  ;;  %v6055_v25 = vrot.slane %v6027_v42, %v7485_v59  ;;  %v6056_v36 = vcombine.low %v6034_v53, %v6041_v30  ;;  %v2438_v22 = vrot.slane %v8150_v63, %v7465_v46  ;;  %v778_v29 = vadd.f32 1.0, %v8201_v60 }
 0x259   : > { %v5239_v33 = vcombine.low %v5231_v21, %v5238_v16  ;;  %v2442_v8 = vrot.slane %v8150_v63, %v7468_v48  ;;  %v2446_v13 = vrot.slane %v8150_v63, %v7471_v49  ;;  %v2450_v11 = vrot.slane %v8150_v63, %v7474_v50 }
 0x25a   : > { %v6057_v12 = vcombine.low %v6048_v18, %v6055_v25  ;;  %v6064_v57 = vrot.slane %v6056_v36, %v7485_v59  ;;  %v2454_v23 = vrot.slane %v8150_v63, %v7477_v54  ;;  %7192 = vrcp.f32 %v794_v14  ;;  %v8990_v18 = vpop.permute.xlu0 %6217 }
 0x25b   : > { %6304 = vperm.xlu1 %6939, %v5239_v33   ;;  %v2458_v60 = vrot.slane %v8150_v63, %v7480_v55  ;;  %v5240_v26 = vcombine.low %v2430_v27, %v2434_v10  ;;  %v5241_v56 = vcombine.low %v2438_v22, %v2442_v8  ;;  %v5242_v34 = vcombine.low %v2446_v13, %v2450_v11 }
 0x25c   : > { %v6071_v5 = vrot.slane %v6057_v12, %v7485_v59  ;;  %v2974_v32 = vrot.slane %v7189_v24, %v7459_v39  ;;  %v2978_v3 = vrot.slane %v7189_v24, %v7462_v45  ;;  %v2982_v41 = vrot.slane %v7189_v24, %v7465_v46  ;;  %9375 = vst [vmem:[#allocation12_spill] sm:$0xff] %v8990_v18 }
 0x25d   : > { %v5243_v40 = vcombine.low %v2454_v23, %v2458_v60  ;;  %v5250_v43 = vrot.slane %v5240_v26, %v7485_v59  ;;  %v5257_v7 = vrot.slane %v5241_v56, %v7485_v59  ;;  %v5264_v63 = vrot.slane %v5242_v34, %v7485_v59 }
 0x25e   : > { %v6072_v38 = vcombine.low %v6064_v57, %v6071_v5  ;;  %v2986_v31 = vrot.slane %v7189_v24, %v7468_v48  ;;  %v2990_v4 = vrot.slane %v7189_v24, %v7471_v49  ;;  %v2994_v42 = vrot.slane %v7189_v24, %v7474_v50  ;;  %v8999_v57 = vpop.permute.xlu1 %6220 }
 0x25f   : > { %v7191_v9 = vpop.eup %7190  ;;  %v5271_v61 = vrot.slane %v5243_v40, %v7485_v59  ;;  %v5272_v21 = vcombine.low %v5250_v43, %v5257_v7  ;;  %v2998_v53 = vrot.slane %v7189_v24, %v7477_v54  ;;  %v3002_v30 = vrot.slane %v7189_v24, %v7480_v55  ;;  %v9008_v43 = vpop.permute.xlu0 %6223 }
 0x260   : > { %6355 = vperm.xlu0 %6938, %v6072_v38   ;;  %v6073_v14 = vcombine.low %v2974_v32, %v2978_v3  ;;  %v6074_v16 = vcombine.low %v2982_v41, %v2986_v31  ;;  %v6075_v36 = vcombine.low %v2990_v4, %v2994_v42  ;;  %7194 = vrcp.f32 %v778_v29 }
 0x261   : > { %v5273_v27 = vcombine.low %v5264_v63, %v5271_v61  ;;  %v5280_v25 = vrot.slane %v5272_v21, %v7485_v59  ;;  %v6076_v10 = vcombine.low %v2998_v53, %v3002_v30  ;;  %v2462_v24 = vrot.slane %v7191_v9, %v7459_v39 }
 0x262   : > { %v6083_v22 = vrot.slane %v6073_v14, %v7485_v59  ;;  %v6090_v33 = vrot.slane %v6074_v16, %v7485_v59  ;;  %v6097_v13 = vrot.slane %v6075_v36, %v7485_v59  ;;  %v2466_v12 = vrot.slane %v7191_v9, %v7462_v45  ;;  %v9018_v16 = vpop.permute.xlu1 %6226 }
 0x263   : > { %v5287_v8 = vrot.slane %v5273_v27, %v7485_v59  ;;  %v6104_v11 = vrot.slane %v6076_v10, %v7485_v59  ;;  %v2470_v29 = vrot.slane %v7191_v9, %v7465_v46  ;;  %v2474_v56 = vrot.slane %v7191_v9, %v7468_v48 }
 0x264   : > { %v6105_v23 = vcombine.low %v6083_v22, %v6090_v33  ;;  %v7193_v60 = vpop.eup %7192  ;;  %v2478_v5 = vrot.slane %v7191_v9, %v7471_v49  ;;  %v2482_v34 = vrot.slane %v7191_v9, %v7474_v50  ;;  %v2486_v40 = vrot.slane %v7191_v9, %v7477_v54 }
 0x265   : > { %v5288_v26 = vcombine.low %v5280_v25, %v5287_v8  ;;  %v6106_v32 = vcombine.low %v6097_v13, %v6104_v11  ;;  %v2490_v7 = vrot.slane %v7191_v9, %v7480_v55  ;;  %v5289_v41 = vcombine.low %v2462_v24, %v2466_v12 }
 0x266   : > { %v6113_v3 = vrot.slane %v6105_v23, %v7485_v59  ;;  %v5290_v38 = vcombine.low %v2470_v29, %v2474_v56  ;;  %v5291_v63 = vcombine.low %v2478_v5, %v2482_v34  ;;  %v3006_v4 = vrot.slane %v7193_v60, %v7459_v39  ;;  %v9026_v23 = vpop.permute.xlu0 %6229 }
 0x267   : > { %6307 = vperm.xlu1 %6939, %v5288_v26   ;;  %v6120_v31 = vrot.slane %v6106_v32, %v7485_v59  ;;  %v3010_v61 = vrot.slane %v7193_v60, %v7462_v45  ;;  %v3014_v21 = vrot.slane %v7193_v60, %v7465_v46  ;;  %v5292_v42 = vcombine.low %v2486_v40, %v2490_v7 }
 0x268   : > { %v5299_v53 = vrot.slane %v5289_v41, %v7485_v59  ;;  %v5306_v30 = vrot.slane %v5290_v38, %v7485_v59  ;;  %v5313_v14 = vrot.slane %v5291_v63, %v7485_v59  ;;  %v3018_v27 = vrot.slane %v7193_v60, %v7468_v48  ;;  %v9036_v41 = vpop.permute.xlu1 %6232 }
 0x269   : > { %v6121_v9 = vcombine.low %v6113_v3, %v6120_v31  ;;  %v3022_v25 = vrot.slane %v7193_v60, %v7471_v49  ;;  %v3026_v36 = vrot.slane %v7193_v60, %v7474_v50  ;;  %v5320_v10 = vrot.slane %v5292_v42, %v7485_v59 }
 0x26a   : > { %v5321_v22 = vcombine.low %v5299_v53, %v5306_v30  ;;  %v3030_v33 = vrot.slane %v7193_v60, %v7477_v54  ;;  %v3034_v8 = vrot.slane %v7193_v60, %v7480_v55  ;;  %v7195_v13 = vpop.eup %7194  ;;  %v6122_v24 = vcombine.low %v3006_v4, %v3010_v61 }
 0x26b   : > { %6358 = vperm.xlu0 %6938, %v6121_v9   ;;  %v6123_v12 = vcombine.low %v3014_v21, %v3018_v27  ;;  %v6124_v11 = vcombine.low %v3022_v25, %v3026_v36  ;;  %v5322_v29 = vcombine.low %v5313_v14, %v5320_v10  ;;  %v2494_v40 = vrot.slane %v7195_v13, %v7459_v39 }
 0x26c   : > { %v5329_v26 = vrot.slane %v5321_v22, %v7485_v59  ;;  %v6125_v56 = vcombine.low %v3030_v33, %v3034_v8  ;;  %v6132_v5 = vrot.slane %v6122_v24, %v7485_v59  ;;  %v2498_v7 = vrot.slane %v7195_v13, %v7462_v45  ;;  %v9045_v45 = vpop.permute.xlu0 %6235  ;;  %v9051_v10 = vpop.permute.xlu1 %6238 }
 0x26d   : > { %v6139_v34 = vrot.slane %v6123_v12, %v7485_v59  ;;  %v6146_v32 = vrot.slane %v6124_v11, %v7485_v59  ;;  %v5336_v3 = vrot.slane %v5322_v29, %v7485_v59  ;;  %v2502_v63 = vrot.slane %v7195_v13, %v7465_v46 }
 0x26e   : > { %v6153_v60 = vrot.slane %v6125_v56, %v7485_v59  ;;  %v2506_v31 = vrot.slane %v7195_v13, %v7468_v48  ;;  %v2510_v21 = vrot.slane %v7195_v13, %v7471_v49  ;;  %v2514_v42 = vrot.slane %v7195_v13, %v7474_v50 }
 0x26f   : > { %v6154_v38 = vcombine.low %v6132_v5, %v6139_v34  ;;  %v5337_v4 = vcombine.low %v5329_v26, %v5336_v3  ;;  %v2518_v30 = vrot.slane %v7195_v13, %v7477_v54  ;;  %v2522_v39 = vrot.slane %v7195_v13, %v7480_v55 }
 0x270   : > { %v6155_v61 = vcombine.low %v6146_v32, %v6153_v60  ;;  %v5338_v46 = vcombine.low %v2494_v40, %v2498_v7  ;;  %v5339_v9 = vcombine.low %v2502_v63, %v2506_v31  ;;  %v5340_v48 = vcombine.low %v2510_v21, %v2514_v42  ;;  %v9054_v33 = vpop.permute.xlu0 %6241  ;;  %v9058_v24 = vpop.permute.xlu1 %6244 }
 0x271   : > { %v6162_v53 = vrot.slane %v6154_v38, %v7485_v59  ;;  %6310 = vperm.xlu1 %6939, %v5337_v4   ;;  %v5341_v27 = vcombine.low %v2518_v30, %v2522_v39  ;;  %v6364_v12 = vand.u32 127, %v9367_v19 }
 0x272   : > { %v6169_v14 = vrot.slane %v6155_v61, %v7485_v59  ;;  %v5348_v49 = vrot.slane %v5338_v46, %v7485_v59  ;;  %v5355_v50 = vrot.slane %v5339_v9, %v7485_v59  ;;  %v5362_v36 = vrot.slane %v5340_v48, %v7485_v59 }
 0x273   : > { %v5369_v54 = vrot.slane %v5341_v27, %v7485_v59  ;;  %v6369_v29 = vadd.s32 4294967288, %v6364_v12  ;;  %v6376_v56 = vadd.s32 4294967280, %v6364_v12  ;;  %v6383_v5 = vadd.s32 4294967272, %v6364_v12 }
 0x274   : > { %v6170_v25 = vcombine.low %v6162_v53, %v6169_v14  ;;  %v5370_v55 = vcombine.low %v5348_v49, %v5355_v50  ;;  %v9061_v26 = vpop.permute.xlu0 %6247  ;;  %v6390_v34 = vadd.s32 4294967264, %v6364_v12  ;;  %v9064_v32 = vsub.s32 %v6364_v12, %v7456_v28  ;;  %v9066_v3 = vpop.permute.xlu1 %6250 }
 0x275   : > { %v5371_v22 = vcombine.low %v5362_v36, %v5369_v54  ;;  %v9069_v60 = vsub.s32 %v6369_v29, %v7456_v28  ;;  %v6425_v40 = vadd.s32 4294967224, %v6364_v12  ;;  %v6404_v7 = vadd.s32 4294967248, %v6364_v12 }
 0x276   : > { %6361 = vperm.xlu0 %6938, %v6170_v25   ;;  %v5378_v8 = vrot.slane %v5370_v55, %v7485_v59  ;;  %v9072_v38 = vsub.s32 %v6376_v56, %v7456_v28  ;;  %v9075_v63 = vsub.s32 %v6383_v5, %v7456_v28  ;;  %v6397_v31 = vadd.s32 4294967256, %v6364_v12 }
 0x277   : > { %v5385_v13 = vrot.slane %v5371_v22, %v7485_v59  ;;  %v9078_v4 = vsub.s32 %v6390_v34, %v7456_v28  ;;  %v6439_v61 = vadd.s32 4294967208, %v6364_v12  ;;  %v6418_v21 = vadd.s32 4294967232, %v6364_v12 }
 0x278   : > { %v6254_v42 = vpop.permute.xlu0 %6253  ;;  %v6411_v53 = vadd.s32 4294967240, %v6364_v12  ;;  %v6481_v30 = vrot.slane %v9008_v43, %v9069_v60  ;;  %v6477_v39 = vrot.slane %v8999_v57, %v9064_v32  ;;  %v6486_v14 = vrot.slane %v9018_v16, %v9072_v38  ;;  %v6257_v16 = vpop.permute.xlu1 %6256 }
 0x279   : > { %v5386_v11 = vcombine.low %v5378_v8, %v5385_v13  ;;  %v9087_v46 = vsub.s32 %v6425_v40, %v7456_v28  ;;  %v9090_v9 = vsub.s32 %v6404_v7, %v7456_v28  ;;  %v6432_v48 = vadd.s32 4294967216, %v6364_v12 }
 0x27a   : > { %v6496_v27 = vrot.slane %v9036_v41, %v9078_v4  ;;  %v9095_v25 = vsub.s32 %v6397_v31, %v7456_v28  ;;  %v6491_v57 = vrot.slane %v9026_v23, %v9075_v63  ;;  %v6482_v43 = vsel %vm6374_vm2, %v6481_v30, %v6477_v39 }
 0x27b   : > { %6313 = vperm.xlu1 %6939, %v5386_v11   ;;  %v9101_v49 = vsub.s32 %v6418_v21, %v7456_v28  ;;  %v6446_v50 = vadd.s32 4294967200, %v6364_v12  ;;  %v6487_v36 = vsel %vm6381_vm3, %v6486_v14, %v6482_v43  ;;  %v6506_v54 = vrot.slane %v9051_v10, %v9090_v9 }
 0x27c   : > { %v9107_v41 = vsub.s32 %v6439_v61, %v7456_v28  ;;  %v9110_v55 = vsub.s32 %v6411_v53, %v7456_v28  ;;  %v6501_v23 = vrot.slane %v9045_v45, %v9095_v25  ;;  %v6492_v22 = vsel %vm6388_vm4, %v6491_v57, %v6487_v36  ;;  %v6260_v29 = vpop.permute.xlu0 %6259  ;;  %v6263_v21 = vpop.permute.xlu1 %6262 }
 0x27d   : > { %v9116_v8 = vsub.s32 %v6432_v48, %v7456_v28  ;;  %v6460_v13 = vadd.s32 4294967184, %v6364_v12  ;;  %v6497_v11 = vsel %vm6395_vm5, %v6496_v27, %v6492_v22  ;;  %v6516_v10 = vrot.slane %v9058_v24, %v9101_v49 }
 0x27e   : > { %v6453_v56 = vadd.s32 4294967192, %v6364_v12  ;;  %v6511_v5 = vrot.slane %v9054_v33, %v9110_v55  ;;  %v6502_v34 = vsel %vm6402_vm6, %v6501_v23, %v6497_v11  ;;  %v9125_v45 = vsub.s32 %v6446_v50, %v7456_v28 }
 0x27f   : > { %v6507_v40 = vsel %vm6409_vm7, %v6506_v54, %v6502_v34  ;;  %v6526_v7 = vrot.slane %v9066_v3, %v9116_v8  ;;  %v6467_v31 = vadd.s32 4294967176, %v6364_v12  ;;  %v6521_v24 = vrot.slane %v9061_v26, %v9087_v46 }
 0x280   : > { %v6512_v61 = vsel %vm6416_vm8, %v6511_v5, %v6507_v40  ;;  %v9134_v33 = vsub.s32 %v6460_v13, %v7456_v28  ;;  %v6536_v30 = vrot.slane %v6257_v16, %v9125_v45  ;;  %v9139_v39 = vsub.s32 %v6453_v56, %v7456_v28  ;;  %v6266_v26 = vpop.permute.xlu0 %6265  ;;  %v6269_v23 = vpop.permute.xlu1 %6268 }
 0x281   : > { %v6517_v53 = vsel %vm6423_vm9, %v6516_v10, %v6512_v61  ;;  %v6531_v12 = vrot.slane %v6254_v42, %v9107_v41  ;;  %v9146_v27 = vsub.s32 %v6467_v31, %v7456_v28  ;;  %v6394_v59 = vrot.slane %v8792_v47, %v9078_v4 }
 0x282   : > { %v6522_v3 = vsel %vm6430_vm10, %v6521_v24, %v6517_v53  ;;  %v6546_v48 = vrot.slane %v6263_v21, %v9134_v33  ;;  %v6541_v57 = vrot.slane %v6260_v29, %v9139_v39 }
 0x283   : > { %v6527_v14 = vsel %vm6437_vm11, %v6526_v7, %v6522_v3  ;;  %9376 = vst [vmem:[#allocation13_spill] sm:$0xff] %v9146_v27  ;;  %v6551_v42 = vrot.slane %v6266_v26, %v9146_v27 }
 0x284   : > { %v6532_v43 = vsel %vm6444_vm12, %v6531_v12, %v6527_v14  ;;  %v6272_v28 = vpop.permute.xlu0 %6271  ;;  %v6275_v13 = vpop.permute.xlu1 %6274 }
 0x285   : > { %v6537_v16 = vsel %vm6451_vm13, %v6536_v30, %v6532_v43 }
 0x286   : > { %v6542_v50 = vsel %vm6458_vm14, %v6541_v57, %v6537_v16  ;;  %v6373_v57 = vrot.slane %v8708_v44, %v9069_v60  ;;  %v6380_v16 = vrot.slane %v8737_v20, %v9072_v38  ;;  %v6401_v20 = vrot.slane %v8818_v52, %v9095_v25 }
 0x287   : > { %v6547_v36 = vsel %vm6465_vm15, %v6546_v48, %v6542_v50  ;;  %v6368_v50 = vrot.slane %v8892_v51, %v9064_v32  ;;  %v6560_v52 = vrot.slane %v6272_v28, %v9069_v60 }
 0x288   : > { %v9155_v54 = vsel %vm6472_vm0, %v6551_v42, %v6547_v36  ;;  %v9157_v22 = vpop.permute.xlu0 %6277  ;;  %v6281_v29 = vpop.permute.xlu1 %6280  ;;  %v6387_v36 = vrot.slane %v8766_v6, %v9075_v63  ;;  %v6565_v6 = vrot.slane %v6275_v13, %v9072_v38  ;;  %v6422_v13 = vrot.slane %v8899_v17, %v9101_v49 }
 0x289   : > { %9377 = vst [vmem:[#allocation14_spill] sm:$0xff] %v9155_v54  ;;  %v6375_v44 = vsel %vm6374_vm2, %v6373_v57, %v6368_v50  ;;  %v6408_v57 = vrot.slane %v8843_v58, %v9090_v9 }
 0x28a   : > { %v6382_v51 = vsel %vm6381_vm3, %v6380_v16, %v6375_v44 }
 0x28b   : > { %v6389_v27 = vsel %vm6388_vm4, %v6387_v36, %v6382_v51 }
 0x28c   : > { %v9159_v11 = vpop.permute.xlu0 %6283  ;;  %v9163_v56 = vpop.permute.xlu1 %6286 }
 0x28d   : > { %v6585_v36 = vrot.slane %v9163_v56, %v9090_v9 }
 0x290   : > { %v9161_v10 = vpop.permute.xlu0 %6289  ;;  %v9167_v34 = vpop.permute.xlu1 %6292 }
 0x294   : > { %v9165_v5 = vpop.permute.xlu0 %6295  ;;  %v6317_v7 = vpop.permute.xlu1 %6316 }
 0x295   : > { %v6635_v43 = vrot.slane %v6317_v7, %v9064_v32  ;;  %v6556_v7 = vrot.slane %v6269_v23, %v9064_v32 }
 0x298   : > { %v6320_v40 = vpop.permute.xlu0 %6319 }
 0x299   : > { %v6639_v19 = vrot.slane %v6320_v40, %v9069_v60  ;;  %v6575_v60 = vrot.slane %v6281_v29, %v9078_v4 }
 0x29c   : > { %v6326_v31 = vpop.permute.xlu0 %6325 }
 0x29d   : > { %v6649_v32 = vrot.slane %v6326_v31, %v9075_v63  ;;  %v6570_v31 = vrot.slane %v9157_v22, %v9075_v63 }
 0x29f   : > { %v6323_v24 = vpop.permute.xlu1 %6322 }
 0x2a0   : > { %v6332_v61 = vpop.permute.xlu0 %6331  ;;  %v6644_v42 = vrot.slane %v6323_v24, %v9072_v38  ;;  %v6640_v24 = vsel %vm6374_vm2, %v6639_v19, %v6635_v43  ;;  %v6396_v19 = vsel %vm6395_vm5, %v6394_v59, %v6389_v27  ;;  %v6415_v38 = vrot.slane %v8871_v1, %v9110_v55 }
 0x2a1   : > { %v6403_v23 = vsel %vm6402_vm6, %v6401_v20, %v6396_v19  ;;  %v6659_v17 = vrot.slane %v6332_v61, %v9095_v25  ;;  %v6429_v61 = vrot.slane %v8917_v2, %v9087_v46  ;;  %v6595_v2 = vrot.slane %v9167_v34, %v9101_v49 }
 0x2a2   : > { %v6645_v40 = vsel %vm6381_vm3, %v6644_v42, %v6640_v24  ;;  %v6410_v1 = vsel %vm6409_vm7, %v6408_v57, %v6403_v23  ;;  %v6450_v24 = vrot.slane %v8954_v35, %v9125_v45  ;;  %v6590_v35 = vrot.slane %v9161_v10, %v9110_v55 }
 0x2a3   : > { %v6650_v43 = vsel %vm6388_vm4, %v6649_v32, %v6645_v40  ;;  %v6417_v16 = vsel %vm6416_vm8, %v6415_v38, %v6410_v1  ;;  %v6464_v57 = vrot.slane %v8981_v62, %v9134_v33  ;;  %v6600_v62 = vrot.slane %v9165_v5, %v9087_v46 }
 0x2a4   : > { %v6338_v53 = vpop.permute.xlu0 %6337  ;;  %v6424_v50 = vsel %vm6423_vm9, %v6422_v13, %v6417_v16  ;;  %v9380_v16 = vld [vmem:[#allocation14_spill] sm:$0xff] }
 0x2a5   : > { %v6669_v44 = vrot.slane %v6338_v53, %v9110_v55  ;;  %v6443_v53 = vrot.slane %v8945_v0, %v9107_v41 }
 0x2aa   : > { %v6329_v21 = vpop.permute.xlu1 %6328 }
 0x2ab   : > { %v6654_v18 = vrot.slane %v6329_v21, %v9078_v4  ;;  %v6561_v21 = vsel %vm6374_vm2, %v6560_v52, %v6556_v7  ;;  %v6436_v4 = vrot.slane %v8930_v37, %v9116_v8  ;;  %v6580_v37 = vrot.slane %v9159_v11, %v9095_v25 }
 0x2ac   : > { %v6566_v58 = vsel %vm6381_vm3, %v6565_v6, %v6561_v21  ;;  %v6431_v7 = vsel %vm6430_vm10, %v6429_v61, %v6424_v50 }
 0x2ad   : > { %v6655_v28 = vsel %vm6395_vm5, %v6654_v18, %v6650_v43  ;;  %v6571_v18 = vsel %vm6388_vm4, %v6570_v31, %v6566_v58  ;;  %v9379_v43 = vld [vmem:[#allocation12_spill] sm:$0xff] }
 0x2ae   : > { %v6660_v29 = vsel %vm6402_vm6, %v6659_v17, %v6655_v28 }
 0x2af   : > { %v9169_v12 = vpop.permute.xlu0 %6343 }
 0x2b0   : > { %v6679_v6 = vrot.slane %v9169_v12, %v9087_v46  ;;  %v6457_v12 = vrot.slane %v8971_v15, %v9139_v39 }
 0x2b4   : > { %v6335_v30 = vpop.permute.xlu1 %6334 }
 0x2b5   : > { %v6664_v59 = vrot.slane %v6335_v30, %v9090_v9  ;;  %v6576_v30 = vsel %vm6395_vm5, %v6575_v60, %v6571_v18 }
 0x2b6   : > { %v6581_v9 = vsel %vm6402_vm6, %v6580_v37, %v6576_v30  ;;  %v9382_v37 = vlaneseq }
 0x2b7   : > { %v6665_v63 = vsel %vm6409_vm7, %v6664_v59, %v6660_v29  ;;  %v6586_v51 = vsel %vm6409_vm7, %v6585_v36, %v6581_v9  ;;  %v9381_v36 = vld [vmem:[#allocation11_spill] sm:$0xff] }
 0x2b8   : > { %v6670_v56 = vsel %vm6416_vm8, %v6669_v44, %v6665_v63  ;;  %v6591_v52 = vsel %vm6416_vm8, %v6590_v35, %v6586_v51  ;;  %vm6738_vm1 = vcmp.lt.s32.totalorder %v9382_v37, 512 }
 0x2b9   : > { %v9171_v3 = vpop.permute.xlu1 %6340  ;;  %v6596_v32 = vsel %vm6423_vm9, %v6595_v2, %v6591_v52 }
 0x2ba   : > { %v6674_v22 = vrot.slane %v9171_v3, %v9101_v49  ;;  %v6438_v3 = vsel %vm6437_vm11, %v6436_v4, %v6431_v7  ;;  %v6601_v15 = vsel %vm6430_vm10, %v6600_v62, %v6596_v32 }
 0x2bb   : > { %v6445_v40 = vsel %vm6444_vm12, %v6443_v53, %v6438_v3 }
 0x2bc   : > { %v6675_v25 = vsel %vm6423_vm9, %v6674_v22, %v6670_v56  ;;  %v6452_v34 = vsel %vm6451_vm13, %v6450_v24, %v6445_v40 }
 0x2bd   : > { %v6680_v49 = vsel %vm6430_vm10, %v6679_v6, %v6675_v25  ;;  %v6459_v13 = vsel %vm6458_vm14, %v6457_v12, %v6452_v34 }
 0x2bf   : > { %v9173_v26 = vpop.permute.xlu0 %6346 }
 0x2c0   : > { %v6684_v0 = vrot.slane %v9173_v26, %v9116_v8 }
 0x2c2   : > { %v6685_v23 = vsel %vm6437_vm11, %v6684_v0, %v6680_v49 }
 0x2c4   : > { %v9175_v14 = vpop.permute.xlu1 %6298 }
 0x2c5   : > { %v6605_v55 = vrot.slane %v9175_v14, %v9116_v8 }
 0x2c9   : > { %v9177_v48 = vpop.permute.xlu0 %6349 }
 0x2ca   : > { %v6689_v19 = vrot.slane %v9177_v48, %v9107_v41  ;;  %v6466_v48 = vsel %vm6465_vm15, %v6464_v57, %v6459_v13 }
 0x2cc   : > { %v6690_v58 = vsel %vm6444_vm12, %v6689_v19, %v6685_v23 }
 0x2ce   : > { %v9192_v54 = vpop.permute.xlu1 %6301 }
 0x2cf   : > { %v6610_v38 = vrot.slane %v9192_v54, %v9107_v41  ;;  %v6606_v41 = vsel %vm6437_vm11, %v6605_v55, %v6601_v15 }
 0x2d1   : > { %v6611_v60 = vsel %vm6444_vm12, %v6610_v38, %v6606_v41 }
 0x2d4   : > { %v9203_v47 = vpop.permute.xlu0 %6352 }
 0x2d5   : > { %v6694_v26 = vrot.slane %v9203_v47, %v9125_v45  ;;  %v9378_v47 = vld [vmem:[#allocation13_spill] sm:$0xff] }
 0x2da   : > { %v6305_v27 = vpop.permute.xlu1 %6304 }
 0x2db   : > { %v6615_v8 = vrot.slane %v6305_v27, %v9125_v45  ;;  %v6471_v45 = vrot.slane %v9379_v43, %v9378_v47 }
 0x2dd   : > { %v6616_v59 = vsel %vm6451_vm13, %v6615_v8, %v6611_v60  ;;  %v6473_v1 = vsel %vm6472_vm0, %v6471_v45, %v6466_v48 }
 0x2df   : > { %v6356_v42 = vpop.permute.xlu0 %6355 }
 0x2e0   : > { %v6699_v46 = vrot.slane %v6356_v42, %v9139_v39  ;;  %v6711_v42 = vcombine.low %v6473_v1, %v9380_v16 }
 0x2e2   : > { %v6719_v22 = vrot.slane %v6711_v42, %v9381_v36 }
 0x2e6   : > { %v6308_v20 = vpop.permute.xlu1 %6307 }
 0x2e7   : > { %v6620_v5 = vrot.slane %v6308_v20, %v9139_v39  ;;  %v6695_v39 = vsel %vm6451_vm13, %v6694_v26, %v6690_v58 }
 0x2e9   : > { %v6621_v31 = vsel %vm6458_vm14, %v6620_v5, %v6616_v59 }
 0x2ea   : > { %v6359_v11 = vpop.permute.xlu0 %6358 }
 0x2eb   : > { %v6704_v54 = vrot.slane %v6359_v11, %v9134_v33 }
 0x2f0   : > { %v6311_v10 = vpop.permute.xlu1 %6310 }
 0x2f1   : > { %v6625_v21 = vrot.slane %v6311_v10, %v9134_v33  ;;  %v6700_v33 = vsel %vm6458_vm14, %v6699_v46, %v6695_v39 }
 0x2f2   : > { %v6705_v50 = vsel %vm6465_vm15, %v6704_v54, %v6700_v33 }
 0x2f3   : > { %v6626_v4 = vsel %vm6465_vm15, %v6625_v21, %v6621_v31 }
 0x2f5   : > { %v6362_v14 = vpop.permute.xlu0 %6361 }
 0x2f6   : > { %v6709_v28 = vrot.slane %v6362_v14, %v9378_v47 }
 0x2f8   : > { %v6710_v18 = vsel %vm6472_vm0, %v6709_v28, %v6705_v50 }
 0x2fa   : > { %v6314_v27 = vpop.permute.xlu1 %6313 }
 0x2fb   : > { %v6630_v17 = vrot.slane %v6314_v27, %v9378_v47 }
 0x2fd   : > { %v6631_v29 = vsel %vm6472_vm0, %v6630_v17, %v6626_v4 }
 0x2fe   : > { %v6712_v30 = vcombine.low %v6631_v29, %v6710_v18 }
 0x300   : > { %v6726_v63 = vrot.slane %v6712_v30, %v9381_v36 }
 0x302   : > { %v6727_v61 = vcombine.low %v6719_v22, %v6726_v63 }
 0x304   : > { %v6734_v44 = vrot.slane %v6727_v61, %v9381_v36 }
 0x306   : > { %6740 = vst.msk [vmem:[%s133_s12] sm:$0xf] %vm6738_vm1, %v6734_v44 }
 0x307   : > { %7233 = shalt.err (!%p7230_p13)
}
 0x308   : > { %s7234_s9 = scalar_lea.hbm %s9316_s13, 64  ;;  %s7238_s18 = scalar_lea.hbm %s9365_s4, 128 }
 0x309   : > { %p7235_p0 = scmp.ne.s32.totalorder %s9316_s13, %s7234_s9  ;;  %p7239_p5 = scmp.lt.u32.totalorder %s9316_s13, %s9365_s4 }
 0x30a   : > { %p7240_p6 = scmp.lt.u32.totalorder %s7238_s18, %s7234_s9  ;;  %p7242_p8 = scmp.lt.u32.totalorder %s7234_s9, %s9316_s13 }
 0x30b   : > { %p7236_p3 = pnand %p7235_p0, %p7368_p1 }
 0x30c   : > { %p7241_p7 = por %p7240_p6, %p7239_p5 }
 0x30d   : > { %p7237_p4 = pneg %p7236_p3 }
 0x30e   : > { %p7243_p9 = por %p7242_p8, %p7241_p7 }
 0x310   : > { %p7244_p10 = pnand %p7243_p9, %p7237_p4 }
 0x312   : > { %7247 = shalt.err (!%p7244_p10)
}
 0x313   : > { %6887 = dma.vmem_to_hbm [thread:$0]  (%p7368_p1), %s9318_s30, 64, %s9316_s13, %s6742_s27  }
 0x314 PF: > { %p6893_p11 = scmp.ge.s32.totalorder %s7288_s26, 2  ;;  %s6768_s21 = sand.u32 1, %s7276_s1  }
 0x315   : > { %s6769_s22 = scalar_lea.sflag [#allocation8], %s6768_s21 }
 0x316   : > { %p6890_p12 = pnand %p6893_p11, %p7372_p2 }
 0x318   : > { %7271 = dma.done.wait (!%p6890_p12), %s6769_s22, 64  }
 0x319   : > { %7273 = vsyncadd (!%p6890_p12), %s6769_s22, 4294967232  ;;  %p24_p13 = scmp.ge.s32.totalorder %s7355_s29, 4   ;;  %s9383_s1 = smov %s7280_s24 }
 0x31a   : > { %s9384_s24 = smov %s7284_s25  ;;  %s9385_s25 = smov %s7366_s6 }
 0x31b   : > { %s9386_s26 = smov %s7355_s29  ;;  %26 = sbr.rel (!%p24_p13) target bundleno = 28 (0x1c), region = 82 }
 0x322   :  { %6774 = vsyncpa [#allocation8], 1 }
 0x323   :  { %6776 = vsyncpa [#allocation8 + $0x1], 1 }

</bundles_post_ra>
